<compile_context>
chip_gen: v7x
topology: tpu7x:2x2x1
jax: 0.10.0
libtpu: 0.0.40
codegen_flags: <defaults>
</compile_context>

<pallas_src>
import functools

import jax
import jax.numpy as jnp
from jax.experimental import pallas as pl
from jax.experimental.pallas import tpu as pltpu


def _layer_norm(x, gamma, beta, eps=1e-5):
    mu = jnp.mean(x, axis=-1, keepdims=True)
    xc = x - mu
    var = jnp.mean(xc * xc, axis=-1, keepdims=True)
    inv = jax.lax.rsqrt(var + eps)
    return xc * inv * gamma + beta


def risk_scorer_kernel(
    # inputs (all fully VMEM-resident; single grid step)
    x_ref, pos_ref, mask_ref, wp_ref, bp_ref,
    wqkv_ref, bqkv_ref, wo_ref, w1_ref, b1_ref, w2_ref, smallp_ref,
    wc_ref, bc_ref,
    # output
    out_ref,
    *, nhead, batch, num_layers,
):
    BS, _ = x_ref.shape                      # B*S rows (batch folded into M)
    H = wp_ref.shape[1]
    S = BS // batch
    hd = H // nhead
    scale = 1.0 / (hd ** 0.5)

    amask = mask_ref[...]                    # (BS, BS) additive block-diag mask, f32

    # ---- input projection + positional embedding ---------------------------
    x = x_ref[...].astype(jnp.bfloat16)
    h = (jnp.dot(x, wp_ref[...], preferred_element_type=jnp.float32)
         + bp_ref[...] + pos_ref[...])       # (BS, H) f32

    # ---- encoder layers (weights resident, loop unrolled) -------------------
    for l in range(num_layers):
        sp = smallp_ref[l]                   # (6, H): [bo, ln1w, ln1b, b2, ln2w, ln2b]
        bo, ln1w, ln1b = sp[0:1, :], sp[1:2, :], sp[2:3, :]
        b2, ln2w, ln2b = sp[3:4, :], sp[4:5, :], sp[5:6, :]
        wo_l = wo_ref[l]                     # (H, H) bf16

        h_bf = h.astype(jnp.bfloat16)

        # fused QKV projection: one (BS,H) @ (H,3H) matmul + one bias add
        qkv = (jnp.dot(h_bf, wqkv_ref[l], preferred_element_type=jnp.float32)
               + bqkv_ref[l])                # (BS, 3H) f32

        # multi-head attention, block-diagonal over batch via additive mask.
        # Output projection is fused per head (ctx_h @ Wo[rows of head h]),
        # avoiding a lane-dim concatenate of the per-head contexts.
        attn_o = jnp.zeros((BS, H), jnp.float32)
        for hh in range(nhead):
            c0 = hh * hd
            qh = qkv[:, c0:c0 + hd].astype(jnp.bfloat16)             # (BS, hd)
            kh = qkv[:, H + c0:H + c0 + hd].astype(jnp.bfloat16)
            vh = qkv[:, 2 * H + c0:2 * H + c0 + hd].astype(jnp.bfloat16)
            s = jnp.einsum('qd,kd->qk', qh, kh,
                           preferred_element_type=jnp.float32) * scale + amask
            s = s - jnp.max(s, axis=-1, keepdims=True)
            p = jnp.exp(s)
            p = p / jnp.sum(p, axis=-1, keepdims=True)               # exact softmax
            ctx = jnp.dot(p.astype(jnp.bfloat16), vh,
                          preferred_element_type=jnp.float32)         # (BS, hd)
            attn_o = attn_o + jnp.dot(ctx.astype(jnp.bfloat16),
                                      wo_l[c0:c0 + hd, :],
                                      preferred_element_type=jnp.float32)
        attn_o = attn_o + bo

        h = _layer_norm(h + attn_o, ln1w, ln1b)

        # feed-forward: Linear -> ReLU -> Linear (dropout = identity, eval mode)
        f = (jnp.dot(h.astype(jnp.bfloat16), w1_ref[l],
                     preferred_element_type=jnp.float32) + b1_ref[l])
        f = jnp.maximum(f, 0.0)
        f = (jnp.dot(f.astype(jnp.bfloat16), w2_ref[l],
                     preferred_element_type=jnp.float32) + b2)

        h = _layer_norm(h + f, ln2w, ln2b)

    # ---- classifier on last sequence position of each batch row -------------
    rows = [h[b * S + S - 1:b * S + S, :] for b in range(batch)]
    h_last = jnp.concatenate(rows, axis=0) if batch > 1 else rows[0]  # (B, H)
    logits = (jnp.dot(h_last.astype(jnp.bfloat16), wc_ref[...],
                      preferred_element_type=jnp.float32) + bc_ref[...])
    out_ref[...] = logits.astype(out_ref.dtype)


def init_params(key, input_dim, seq_len, hidden, num_classes, num_layers, dim_ff):
    """Deterministic synthetic parameters, PyTorch layout: (out_features, in_features)."""
    ks = iter(jax.random.split(key, 32))
    n = lambda shape, s=0.05: (s * jax.random.normal(next(ks), shape)).astype(jnp.float32)
    L, H, F = num_layers, hidden, dim_ff
    return dict(
        pos=n((1, seq_len, H), 1.0),               # nn.Parameter(torch.randn(...))
        wp=n((H, input_dim)), bp=jnp.zeros((1, H), jnp.float32),
        ipw=n((L, 3 * H, H)), ipb=jnp.zeros((L, 1, 3 * H), jnp.float32),
        opw=n((L, H, H)),     opb=jnp.zeros((L, 1, H), jnp.float32),
        ln1w=jnp.ones((L, 1, H), jnp.float32), ln1b=jnp.zeros((L, 1, H), jnp.float32),
        w1=n((L, F, H)), b1=jnp.zeros((L, 1, F), jnp.float32),
        w2=n((L, H, F)), b2=jnp.zeros((L, 1, H), jnp.float32),
        ln2w=jnp.ones((L, 1, H), jnp.float32), ln2b=jnp.zeros((L, 1, H), jnp.float32),
        wc=n((num_classes, H)), bc=jnp.zeros((1, num_classes), jnp.float32),
    )


def risk_scorer_forward(x, params, *, nhead=4):
    B, S, D = x.shape
    H = params['wp'].shape[0]
    C = params['wc'].shape[0]
    L = params['ipw'].shape[0]

    bf = jnp.bfloat16
    t2 = lambda w: jnp.swapaxes(w, -1, -2).astype(bf)   # (.., out, in) -> (.., in, out) bf16

    # ---- host-side prep ------------------------------------------------------
    x_flat = x.reshape(B * S, D)
    pos = jnp.tile(params['pos'].reshape(S, H).astype(jnp.float32), (B, 1))      # (B*S, H)
    bid = jnp.repeat(jnp.arange(B, dtype=jnp.int32), S)
    mask = jnp.where(bid[:, None] == bid[None, :], 0.0, -1e30).astype(jnp.float32)

    wp_t = t2(params['wp'])                              # (D, H)
    wqkv_t = t2(params['ipw'])                           # (L, H, 3H)  fused QKV
    wo_t = t2(params['opw'])                             # (L, H, H)
    w1_t = t2(params['w1'])                              # (L, H, F)
    w2_t = t2(params['w2'])                              # (L, F, H)
    wc_t = t2(params['wc'])                              # (H, C)
    # pack tiny per-layer (1,H) params into one slab: [bo, ln1w, ln1b, b2, ln2w, ln2b]
    smallp = jnp.concatenate([params['opb'], params['ln1w'], params['ln1b'],
                              params['b2'], params['ln2w'], params['ln2b']],
                             axis=1)                     # (L, 6, H)

    args = (x_flat, pos, mask, wp_t, params['bp'],
            wqkv_t, params['ipb'], wo_t, w1_t, params['b1'], w2_t, smallp,
            wc_t, params['bc'])

    def full_spec(arr):
        nd = arr.ndim
        return pl.BlockSpec(arr.shape, lambda i, nd=nd: (0,) * nd)

    in_specs = [full_spec(a) for a in args]
    out_spec = pl.BlockSpec((B, C), lambda i: (0, 0))

    kernel = functools.partial(risk_scorer_kernel, nhead=nhead, batch=B, num_layers=L)
    out = pl.pallas_call(
        kernel,
        out_shape=jax.ShapeDtypeStruct((B, C), jnp.float32),
        grid=(1,),                                       # single step: all weights resident
        in_specs=in_specs,
        out_specs=out_spec,
        compiler_params=pltpu.CompilerParams(dimension_semantics=("arbitrary",)),
    )(*args)
    return out


if __name__ == "__main__":
    # Small shapes consistent with the module's forward
    B, S, D = 2, 8, 16              # batch, sequence_length, input_dim
    H, C = 32, 3                    # hidden_size, num_classes
    NHEAD, LAYERS, FF = 4, 2, 2048  # TransformerEncoderLayer defaults (dim_feedforward=2048)

    key = jax.random.PRNGKey(0)
    kx, kp = jax.random.split(key)
    x = jax.random.normal(kx, (B, S, D), dtype=jnp.float32)
    params = init_params(kp, D, S, H, C, LAYERS, FF)

    out = risk_scorer_forward(x, params, nhead=NHEAD)
    out = jax.block_until_ready(out)
    assert out.shape == (B, C) and out.dtype == jnp.float32
    print("KERNEL_OK")
</pallas_src>

<mosaic_0001>
module attributes {stable_mosaic.version = 11 : i64} {
  func.func @risk_scorer_kernel(%arg0: i32, %arg1: memref<16x16xf32, #tpu.memory_space<vmem>>, %arg2: memref<16x32xf32, #tpu.memory_space<vmem>>, %arg3: memref<16x16xf32, #tpu.memory_space<vmem>>, %arg4: memref<16x32xbf16, #tpu.memory_space<vmem>>, %arg5: memref<1x32xf32, #tpu.memory_space<vmem>>, %arg6: memref<2x32x96xbf16, #tpu.memory_space<vmem>>, %arg7: memref<2x1x96xf32, #tpu.memory_space<vmem>>, %arg8: memref<2x32x32xbf16, #tpu.memory_space<vmem>>, %arg9: memref<2x32x2048xbf16, #tpu.memory_space<vmem>>, %arg10: memref<2x1x2048xf32, #tpu.memory_space<vmem>>, %arg11: memref<2x2048x32xbf16, #tpu.memory_space<vmem>>, %arg12: memref<2x6x32xf32, #tpu.memory_space<vmem>>, %arg13: memref<32x3xbf16, #tpu.memory_space<vmem>>, %arg14: memref<1x3xf32, #tpu.memory_space<vmem>>, %arg15: memref<2x3xf32, #tpu.memory_space<vmem>>) attributes {dimension_semantics = [#tpu.dimension_semantics<arbitrary>], iteration_bounds = array<i64: 1>, scalar_prefetch = 0 : i64, scratch_operands = 0 : i64, tpu.core_type = #tpu.core_type<tc>, window_params = [{pipeline_mode = #tpu.pipeline_mode<synchronous>, transform_indices = @transform_0, window_bounds = array<i64: 16, 16>}, {pipeline_mode = #tpu.pipeline_mode<synchronous>, transform_indices = @transform_1, window_bounds = array<i64: 16, 32>}, {pipeline_mode = #tpu.pipeline_mode<synchronous>, transform_indices = @transform_2, window_bounds = array<i64: 16, 16>}, {pipeline_mode = #tpu.pipeline_mode<synchronous>, transform_indices = @transform_3, window_bounds = array<i64: 16, 32>}, {pipeline_mode = #tpu.pipeline_mode<synchronous>, transform_indices = @transform_4, window_bounds = array<i64: 1, 32>}, {pipeline_mode = #tpu.pipeline_mode<synchronous>, transform_indices = @transform_5, window_bounds = array<i64: 2, 32, 96>}, {pipeline_mode = #tpu.pipeline_mode<synchronous>, transform_indices = @transform_6, window_bounds = array<i64: 2, 1, 96>}, {pipeline_mode = #tpu.pipeline_mode<synchronous>, transform_indices = @transform_7, window_bounds = array<i64: 2, 32, 32>}, {pipeline_mode = #tpu.pipeline_mode<synchronous>, transform_indices = @transform_8, window_bounds = array<i64: 2, 32, 2048>}, {pipeline_mode = #tpu.pipeline_mode<synchronous>, transform_indices = @transform_9, window_bounds = array<i64: 2, 1, 2048>}, {pipeline_mode = #tpu.pipeline_mode<synchronous>, transform_indices = @transform_10, window_bounds = array<i64: 2, 2048, 32>}, {pipeline_mode = #tpu.pipeline_mode<synchronous>, transform_indices = @transform_11, window_bounds = array<i64: 2, 6, 32>}, {pipeline_mode = #tpu.pipeline_mode<synchronous>, transform_indices = @transform_12, window_bounds = array<i64: 32, 3>}, {pipeline_mode = #tpu.pipeline_mode<synchronous>, transform_indices = @transform_13, window_bounds = array<i64: 1, 3>}, {pipeline_mode = #tpu.pipeline_mode<synchronous>, transform_indices = @transform_14, window_bounds = array<i64: 2, 3>}]} {
    %c0 = arith.constant 0 : index
    %c0_0 = arith.constant 0 : index
    %0 = vector.load %arg3[%c0, %c0_0] : memref<16x16xf32, #tpu.memory_space<vmem>>, vector<16x16xf32>
    %c0_1 = arith.constant 0 : index
    %c0_2 = arith.constant 0 : index
    %1 = vector.load %arg1[%c0_1, %c0_2] : memref<16x16xf32, #tpu.memory_space<vmem>>, vector<16x16xf32>
    %2 = arith.truncf %1 : vector<16x16xf32> to vector<16x16xbf16>
    %c0_3 = arith.constant 0 : index
    %c0_4 = arith.constant 0 : index
    %3 = vector.load %arg4[%c0_3, %c0_4] : memref<16x32xbf16, #tpu.memory_space<vmem>>, vector<16x32xbf16>
    %cst = arith.constant dense<0.000000e+00> : vector<16x32xf32>
    %4 = tpu.matmul %2, %3, %cst {dimension_numbers = #tpu.dot_dimension_numbers<[1], [0], [0], [1], [0, 0, 1, 1], [], []>} : vector<16x16xbf16>, vector<16x32xbf16>, vector<16x32xf32> -> vector<16x32xf32>
    %c0_5 = arith.constant 0 : index
    %c0_6 = arith.constant 0 : index
    %5 = vector.load %arg5[%c0_5, %c0_6] : memref<1x32xf32, #tpu.memory_space<vmem>>, vector<1x32xf32>
    %6 = vector.broadcast %5 : vector<1x32xf32> to vector<16x32xf32>
    %7 = arith.addf %4, %6 : vector<16x32xf32>
    %c0_7 = arith.constant 0 : index
    %c0_8 = arith.constant 0 : index
    %8 = vector.load %arg2[%c0_7, %c0_8] : memref<16x32xf32, #tpu.memory_space<vmem>>, vector<16x32xf32>
    %9 = arith.addf %7, %8 : vector<16x32xf32>
    %c0_9 = arith.constant 0 : index
    %c0_10 = arith.constant 0 : index
    %c0_11 = arith.constant 0 : index
    %10 = vector.load %arg12[%c0_9, %c0_10, %c0_11] : memref<2x6x32xf32, #tpu.memory_space<vmem>>, vector<1x6x32xf32>
    %11 = vector.shape_cast %10 : vector<1x6x32xf32> to vector<6x32xf32>
    %12 = vector.extract_strided_slice %11 {offsets = [0, 0], sizes = [1, 32], strides = [1, 1]} : vector<6x32xf32> to vector<1x32xf32>
    %13 = vector.extract_strided_slice %11 {offsets = [1, 0], sizes = [1, 32], strides = [1, 1]} : vector<6x32xf32> to vector<1x32xf32>
    %14 = vector.extract_strided_slice %11 {offsets = [2, 0], sizes = [1, 32], strides = [1, 1]} : vector<6x32xf32> to vector<1x32xf32>
    %15 = vector.extract_strided_slice %11 {offsets = [3, 0], sizes = [1, 32], strides = [1, 1]} : vector<6x32xf32> to vector<1x32xf32>
    %16 = vector.extract_strided_slice %11 {offsets = [4, 0], sizes = [1, 32], strides = [1, 1]} : vector<6x32xf32> to vector<1x32xf32>
    %17 = vector.extract_strided_slice %11 {offsets = [5, 0], sizes = [1, 32], strides = [1, 1]} : vector<6x32xf32> to vector<1x32xf32>
    %c0_12 = arith.constant 0 : index
    %c0_13 = arith.constant 0 : index
    %c0_14 = arith.constant 0 : index
    %18 = vector.load %arg8[%c0_12, %c0_13, %c0_14] : memref<2x32x32xbf16, #tpu.memory_space<vmem>>, vector<1x32x32xbf16>
    %19 = vector.shape_cast %18 : vector<1x32x32xbf16> to vector<32x32xbf16>
    %20 = arith.truncf %9 : vector<16x32xf32> to vector<16x32xbf16>
    %c0_15 = arith.constant 0 : index
    %c0_16 = arith.constant 0 : index
    %c0_17 = arith.constant 0 : index
    %21 = vector.load %arg6[%c0_15, %c0_16, %c0_17] : memref<2x32x96xbf16, #tpu.memory_space<vmem>>, vector<1x32x96xbf16>
    %22 = vector.shape_cast %21 : vector<1x32x96xbf16> to vector<32x96xbf16>
    %cst_18 = arith.constant dense<0.000000e+00> : vector<16x96xf32>
    %23 = tpu.matmul %20, %22, %cst_18 {dimension_numbers = #tpu.dot_dimension_numbers<[1], [0], [0], [1], [0, 0, 1, 1], [], []>} : vector<16x32xbf16>, vector<32x96xbf16>, vector<16x96xf32> -> vector<16x96xf32>
    %c0_19 = arith.constant 0 : index
    %c0_20 = arith.constant 0 : index
    %c0_21 = arith.constant 0 : index
    %24 = vector.load %arg7[%c0_19, %c0_20, %c0_21] : memref<2x1x96xf32, #tpu.memory_space<vmem>>, vector<1x1x96xf32>
    %25 = vector.shape_cast %24 : vector<1x1x96xf32> to vector<1x96xf32>
    %26 = vector.broadcast %25 : vector<1x96xf32> to vector<16x96xf32>
    %27 = arith.addf %23, %26 : vector<16x96xf32>
    %cst_22 = arith.constant 0.000000e+00 : f32
    %28 = vector.broadcast %cst_22 : f32 to vector<16x32xf32>
    %29 = vector.extract_strided_slice %27 {offsets = [0, 0], sizes = [16, 8], strides = [1, 1]} : vector<16x96xf32> to vector<16x8xf32>
    %30 = arith.truncf %29 : vector<16x8xf32> to vector<16x8xbf16>
    %31 = vector.extract_strided_slice %27 {offsets = [0, 32], sizes = [16, 8], strides = [1, 1]} : vector<16x96xf32> to vector<16x8xf32>
    %32 = arith.truncf %31 : vector<16x8xf32> to vector<16x8xbf16>
    %33 = vector.extract_strided_slice %27 {offsets = [0, 64], sizes = [16, 8], strides = [1, 1]} : vector<16x96xf32> to vector<16x8xf32>
    %34 = arith.truncf %33 : vector<16x8xf32> to vector<16x8xbf16>
    "tpu.trace_start"() <{level = 10 : i32, message = "qd,kd->qk"}> : () -> ()
    %cst_23 = arith.constant dense<0.000000e+00> : vector<16x16xf32>
    %35 = tpu.matmul %30, %32, %cst_23 {dimension_numbers = #tpu.dot_dimension_numbers<[1], [1], [0], [0], [0, 0, 1, 0], [], []>} : vector<16x8xbf16>, vector<16x8xbf16>, vector<16x16xf32> -> vector<16x16xf32>
    "tpu.trace_stop"() : () -> ()
    %cst_24 = arith.constant 0.353553385 : f32
    %36 = vector.broadcast %cst_24 : f32 to vector<16x16xf32>
    %37 = arith.mulf %35, %36 : vector<16x16xf32>
    %38 = arith.addf %37, %0 : vector<16x16xf32>
    %cst_25 = arith.constant dense<0xFF800000> : vector<16xf32>
    %39 = vector.multi_reduction <maximumf>, %38, %cst_25 [1] : vector<16x16xf32> to vector<16xf32>
    %40 = vector.shape_cast %39 : vector<16xf32> to vector<16x1xf32>
    %41 = vector.broadcast %40 : vector<16x1xf32> to vector<16x16xf32>
    %42 = arith.subf %38, %41 : vector<16x16xf32>
    %43 = math.exp %42 : vector<16x16xf32>
    %cst_26 = arith.constant dense<0.000000e+00> : vector<16xf32>
    %44 = vector.multi_reduction <add>, %43, %cst_26 [1] : vector<16x16xf32> to vector<16xf32>
    %45 = vector.shape_cast %44 : vector<16xf32> to vector<16x1xf32>
    %46 = vector.broadcast %45 : vector<16x1xf32> to vector<16x16xf32>
    %47 = arith.divf %43, %46 : vector<16x16xf32>
    %48 = arith.truncf %47 : vector<16x16xf32> to vector<16x16xbf16>
    %cst_27 = arith.constant dense<0.000000e+00> : vector<16x8xf32>
    %49 = tpu.matmul %48, %34, %cst_27 {dimension_numbers = #tpu.dot_dimension_numbers<[1], [0], [0], [1], [0, 0, 1, 1], [], []>} : vector<16x16xbf16>, vector<16x8xbf16>, vector<16x8xf32> -> vector<16x8xf32>
    %50 = arith.truncf %49 : vector<16x8xf32> to vector<16x8xbf16>
    %51 = vector.extract_strided_slice %19 {offsets = [0, 0], sizes = [8, 32], strides = [1, 1]} : vector<32x32xbf16> to vector<8x32xbf16>
    %cst_28 = arith.constant dense<0.000000e+00> : vector<16x32xf32>
    %52 = tpu.matmul %50, %51, %cst_28 {dimension_numbers = #tpu.dot_dimension_numbers<[1], [0], [0], [1], [0, 0, 1, 1], [], []>} : vector<16x8xbf16>, vector<8x32xbf16>, vector<16x32xf32> -> vector<16x32xf32>
    %53 = arith.addf %28, %52 : vector<16x32xf32>
    %54 = vector.extract_strided_slice %27 {offsets = [0, 8], sizes = [16, 8], strides = [1, 1]} : vector<16x96xf32> to vector<16x8xf32>
    %55 = arith.truncf %54 : vector<16x8xf32> to vector<16x8xbf16>
    %56 = vector.extract_strided_slice %27 {offsets = [0, 40], sizes = [16, 8], strides = [1, 1]} : vector<16x96xf32> to vector<16x8xf32>
    %57 = arith.truncf %56 : vector<16x8xf32> to vector<16x8xbf16>
    %58 = vector.extract_strided_slice %27 {offsets = [0, 72], sizes = [16, 8], strides = [1, 1]} : vector<16x96xf32> to vector<16x8xf32>
    %59 = arith.truncf %58 : vector<16x8xf32> to vector<16x8xbf16>
    "tpu.trace_start"() <{level = 10 : i32, message = "qd,kd->qk"}> : () -> ()
    %cst_29 = arith.constant dense<0.000000e+00> : vector<16x16xf32>
    %60 = tpu.matmul %55, %57, %cst_29 {dimension_numbers = #tpu.dot_dimension_numbers<[1], [1], [0], [0], [0, 0, 1, 0], [], []>} : vector<16x8xbf16>, vector<16x8xbf16>, vector<16x16xf32> -> vector<16x16xf32>
    "tpu.trace_stop"() : () -> ()
    %cst_30 = arith.constant 0.353553385 : f32
    %61 = vector.broadcast %cst_30 : f32 to vector<16x16xf32>
    %62 = arith.mulf %60, %61 : vector<16x16xf32>
    %63 = arith.addf %62, %0 : vector<16x16xf32>
    %cst_31 = arith.constant dense<0xFF800000> : vector<16xf32>
    %64 = vector.multi_reduction <maximumf>, %63, %cst_31 [1] : vector<16x16xf32> to vector<16xf32>
    %65 = vector.shape_cast %64 : vector<16xf32> to vector<16x1xf32>
    %66 = vector.broadcast %65 : vector<16x1xf32> to vector<16x16xf32>
    %67 = arith.subf %63, %66 : vector<16x16xf32>
    %68 = math.exp %67 : vector<16x16xf32>
    %cst_32 = arith.constant dense<0.000000e+00> : vector<16xf32>
    %69 = vector.multi_reduction <add>, %68, %cst_32 [1] : vector<16x16xf32> to vector<16xf32>
    %70 = vector.shape_cast %69 : vector<16xf32> to vector<16x1xf32>
    %71 = vector.broadcast %70 : vector<16x1xf32> to vector<16x16xf32>
    %72 = arith.divf %68, %71 : vector<16x16xf32>
    %73 = arith.truncf %72 : vector<16x16xf32> to vector<16x16xbf16>
    %cst_33 = arith.constant dense<0.000000e+00> : vector<16x8xf32>
    %74 = tpu.matmul %73, %59, %cst_33 {dimension_numbers = #tpu.dot_dimension_numbers<[1], [0], [0], [1], [0, 0, 1, 1], [], []>} : vector<16x16xbf16>, vector<16x8xbf16>, vector<16x8xf32> -> vector<16x8xf32>
    %75 = arith.truncf %74 : vector<16x8xf32> to vector<16x8xbf16>
    %76 = vector.extract_strided_slice %19 {offsets = [8, 0], sizes = [8, 32], strides = [1, 1]} : vector<32x32xbf16> to vector<8x32xbf16>
    %cst_34 = arith.constant dense<0.000000e+00> : vector<16x32xf32>
    %77 = tpu.matmul %75, %76, %cst_34 {dimension_numbers = #tpu.dot_dimension_numbers<[1], [0], [0], [1], [0, 0, 1, 1], [], []>} : vector<16x8xbf16>, vector<8x32xbf16>, vector<16x32xf32> -> vector<16x32xf32>
    %78 = arith.addf %53, %77 : vector<16x32xf32>
    %79 = vector.extract_strided_slice %27 {offsets = [0, 16], sizes = [16, 8], strides = [1, 1]} : vector<16x96xf32> to vector<16x8xf32>
    %80 = arith.truncf %79 : vector<16x8xf32> to vector<16x8xbf16>
    %81 = vector.extract_strided_slice %27 {offsets = [0, 48], sizes = [16, 8], strides = [1, 1]} : vector<16x96xf32> to vector<16x8xf32>
    %82 = arith.truncf %81 : vector<16x8xf32> to vector<16x8xbf16>
    %83 = vector.extract_strided_slice %27 {offsets = [0, 80], sizes = [16, 8], strides = [1, 1]} : vector<16x96xf32> to vector<16x8xf32>
    %84 = arith.truncf %83 : vector<16x8xf32> to vector<16x8xbf16>
    "tpu.trace_start"() <{level = 10 : i32, message = "qd,kd->qk"}> : () -> ()
    %cst_35 = arith.constant dense<0.000000e+00> : vector<16x16xf32>
    %85 = tpu.matmul %80, %82, %cst_35 {dimension_numbers = #tpu.dot_dimension_numbers<[1], [1], [0], [0], [0, 0, 1, 0], [], []>} : vector<16x8xbf16>, vector<16x8xbf16>, vector<16x16xf32> -> vector<16x16xf32>
    "tpu.trace_stop"() : () -> ()
    %cst_36 = arith.constant 0.353553385 : f32
    %86 = vector.broadcast %cst_36 : f32 to vector<16x16xf32>
    %87 = arith.mulf %85, %86 : vector<16x16xf32>
    %88 = arith.addf %87, %0 : vector<16x16xf32>
    %cst_37 = arith.constant dense<0xFF800000> : vector<16xf32>
    %89 = vector.multi_reduction <maximumf>, %88, %cst_37 [1] : vector<16x16xf32> to vector<16xf32>
    %90 = vector.shape_cast %89 : vector<16xf32> to vector<16x1xf32>
    %91 = vector.broadcast %90 : vector<16x1xf32> to vector<16x16xf32>
    %92 = arith.subf %88, %91 : vector<16x16xf32>
    %93 = math.exp %92 : vector<16x16xf32>
    %cst_38 = arith.constant dense<0.000000e+00> : vector<16xf32>
    %94 = vector.multi_reduction <add>, %93, %cst_38 [1] : vector<16x16xf32> to vector<16xf32>
    %95 = vector.shape_cast %94 : vector<16xf32> to vector<16x1xf32>
    %96 = vector.broadcast %95 : vector<16x1xf32> to vector<16x16xf32>
    %97 = arith.divf %93, %96 : vector<16x16xf32>
    %98 = arith.truncf %97 : vector<16x16xf32> to vector<16x16xbf16>
    %cst_39 = arith.constant dense<0.000000e+00> : vector<16x8xf32>
    %99 = tpu.matmul %98, %84, %cst_39 {dimension_numbers = #tpu.dot_dimension_numbers<[1], [0], [0], [1], [0, 0, 1, 1], [], []>} : vector<16x16xbf16>, vector<16x8xbf16>, vector<16x8xf32> -> vector<16x8xf32>
    %100 = arith.truncf %99 : vector<16x8xf32> to vector<16x8xbf16>
    %101 = vector.extract_strided_slice %19 {offsets = [16, 0], sizes = [8, 32], strides = [1, 1]} : vector<32x32xbf16> to vector<8x32xbf16>
    %cst_40 = arith.constant dense<0.000000e+00> : vector<16x32xf32>
    %102 = tpu.matmul %100, %101, %cst_40 {dimension_numbers = #tpu.dot_dimension_numbers<[1], [0], [0], [1], [0, 0, 1, 1], [], []>} : vector<16x8xbf16>, vector<8x32xbf16>, vector<16x32xf32> -> vector<16x32xf32>
    %103 = arith.addf %78, %102 : vector<16x32xf32>
    %104 = vector.extract_strided_slice %27 {offsets = [0, 24], sizes = [16, 8], strides = [1, 1]} : vector<16x96xf32> to vector<16x8xf32>
    %105 = arith.truncf %104 : vector<16x8xf32> to vector<16x8xbf16>
    %106 = vector.extract_strided_slice %27 {offsets = [0, 56], sizes = [16, 8], strides = [1, 1]} : vector<16x96xf32> to vector<16x8xf32>
    %107 = arith.truncf %106 : vector<16x8xf32> to vector<16x8xbf16>
    %108 = vector.extract_strided_slice %27 {offsets = [0, 88], sizes = [16, 8], strides = [1, 1]} : vector<16x96xf32> to vector<16x8xf32>
    %109 = arith.truncf %108 : vector<16x8xf32> to vector<16x8xbf16>
    "tpu.trace_start"() <{level = 10 : i32, message = "qd,kd->qk"}> : () -> ()
    %cst_41 = arith.constant dense<0.000000e+00> : vector<16x16xf32>
    %110 = tpu.matmul %105, %107, %cst_41 {dimension_numbers = #tpu.dot_dimension_numbers<[1], [1], [0], [0], [0, 0, 1, 0], [], []>} : vector<16x8xbf16>, vector<16x8xbf16>, vector<16x16xf32> -> vector<16x16xf32>
    "tpu.trace_stop"() : () -> ()
    %cst_42 = arith.constant 0.353553385 : f32
    %111 = vector.broadcast %cst_42 : f32 to vector<16x16xf32>
    %112 = arith.mulf %110, %111 : vector<16x16xf32>
    %113 = arith.addf %112, %0 : vector<16x16xf32>
    %cst_43 = arith.constant dense<0xFF800000> : vector<16xf32>
    %114 = vector.multi_reduction <maximumf>, %113, %cst_43 [1] : vector<16x16xf32> to vector<16xf32>
    %115 = vector.shape_cast %114 : vector<16xf32> to vector<16x1xf32>
    %116 = vector.broadcast %115 : vector<16x1xf32> to vector<16x16xf32>
    %117 = arith.subf %113, %116 : vector<16x16xf32>
    %118 = math.exp %117 : vector<16x16xf32>
    %cst_44 = arith.constant dense<0.000000e+00> : vector<16xf32>
    %119 = vector.multi_reduction <add>, %118, %cst_44 [1] : vector<16x16xf32> to vector<16xf32>
    %120 = vector.shape_cast %119 : vector<16xf32> to vector<16x1xf32>
    %121 = vector.broadcast %120 : vector<16x1xf32> to vector<16x16xf32>
    %122 = arith.divf %118, %121 : vector<16x16xf32>
    %123 = arith.truncf %122 : vector<16x16xf32> to vector<16x16xbf16>
    %cst_45 = arith.constant dense<0.000000e+00> : vector<16x8xf32>
    %124 = tpu.matmul %123, %109, %cst_45 {dimension_numbers = #tpu.dot_dimension_numbers<[1], [0], [0], [1], [0, 0, 1, 1], [], []>} : vector<16x16xbf16>, vector<16x8xbf16>, vector<16x8xf32> -> vector<16x8xf32>
    %125 = arith.truncf %124 : vector<16x8xf32> to vector<16x8xbf16>
    %126 = vector.extract_strided_slice %19 {offsets = [24, 0], sizes = [8, 32], strides = [1, 1]} : vector<32x32xbf16> to vector<8x32xbf16>
    %cst_46 = arith.constant dense<0.000000e+00> : vector<16x32xf32>
    %127 = tpu.matmul %125, %126, %cst_46 {dimension_numbers = #tpu.dot_dimension_numbers<[1], [0], [0], [1], [0, 0, 1, 1], [], []>} : vector<16x8xbf16>, vector<8x32xbf16>, vector<16x32xf32> -> vector<16x32xf32>
    %128 = arith.addf %103, %127 : vector<16x32xf32>
    %129 = vector.broadcast %12 : vector<1x32xf32> to vector<16x32xf32>
    %130 = arith.addf %128, %129 : vector<16x32xf32>
    %131 = arith.addf %9, %130 : vector<16x32xf32>
    %cst_47 = arith.constant dense<0.000000e+00> : vector<16xf32>
    %132 = vector.multi_reduction <add>, %131, %cst_47 [1] : vector<16x32xf32> to vector<16xf32>
    %133 = vector.shape_cast %132 : vector<16xf32> to vector<16x1xf32>
    %cst_48 = arith.constant 3.200000e+01 : f32
    %134 = vector.broadcast %cst_48 : f32 to vector<16x1xf32>
    %135 = arith.divf %133, %134 : vector<16x1xf32>
    %136 = vector.broadcast %135 : vector<16x1xf32> to vector<16x32xf32>
    %137 = arith.subf %131, %136 : vector<16x32xf32>
    %138 = arith.mulf %137, %137 : vector<16x32xf32>
    %cst_49 = arith.constant dense<0.000000e+00> : vector<16xf32>
    %139 = vector.multi_reduction <add>, %138, %cst_49 [1] : vector<16x32xf32> to vector<16xf32>
    %140 = vector.shape_cast %139 : vector<16xf32> to vector<16x1xf32>
    %cst_50 = arith.constant 3.200000e+01 : f32
    %141 = vector.broadcast %cst_50 : f32 to vector<16x1xf32>
    %142 = arith.divf %140, %141 : vector<16x1xf32>
    %cst_51 = arith.constant 9.99999974E-6 : f32
    %143 = vector.broadcast %cst_51 : f32 to vector<16x1xf32>
    %144 = arith.addf %142, %143 : vector<16x1xf32>
    %145 = math.rsqrt %144 : vector<16x1xf32>
    %146 = vector.broadcast %145 : vector<16x1xf32> to vector<16x32xf32>
    %147 = arith.mulf %137, %146 : vector<16x32xf32>
    %148 = vector.broadcast %13 : vector<1x32xf32> to vector<16x32xf32>
    %149 = arith.mulf %147, %148 : vector<16x32xf32>
    %150 = vector.broadcast %14 : vector<1x32xf32> to vector<16x32xf32>
    %151 = arith.addf %149, %150 : vector<16x32xf32>
    %152 = arith.truncf %151 : vector<16x32xf32> to vector<16x32xbf16>
    %c0_52 = arith.constant 0 : index
    %c0_53 = arith.constant 0 : index
    %c0_54 = arith.constant 0 : index
    %153 = vector.load %arg9[%c0_52, %c0_53, %c0_54] : memref<2x32x2048xbf16, #tpu.memory_space<vmem>>, vector<1x32x2048xbf16>
    %154 = vector.shape_cast %153 : vector<1x32x2048xbf16> to vector<32x2048xbf16>
    %cst_55 = arith.constant dense<0.000000e+00> : vector<16x2048xf32>
    %155 = tpu.matmul %152, %154, %cst_55 {dimension_numbers = #tpu.dot_dimension_numbers<[1], [0], [0], [1], [0, 0, 1, 1], [], []>} : vector<16x32xbf16>, vector<32x2048xbf16>, vector<16x2048xf32> -> vector<16x2048xf32>
    %c0_56 = arith.constant 0 : index
    %c0_57 = arith.constant 0 : index
    %c0_58 = arith.constant 0 : index
    %156 = vector.load %arg10[%c0_56, %c0_57, %c0_58] : memref<2x1x2048xf32, #tpu.memory_space<vmem>>, vector<1x1x2048xf32>
    %157 = vector.shape_cast %156 : vector<1x1x2048xf32> to vector<1x2048xf32>
    %158 = vector.broadcast %157 : vector<1x2048xf32> to vector<16x2048xf32>
    %159 = arith.addf %155, %158 : vector<16x2048xf32>
    %cst_59 = arith.constant 0.000000e+00 : f32
    %160 = vector.broadcast %cst_59 : f32 to vector<16x2048xf32>
    %161 = arith.maximumf %159, %160 : vector<16x2048xf32>
    %162 = arith.truncf %161 : vector<16x2048xf32> to vector<16x2048xbf16>
    %c0_60 = arith.constant 0 : index
    %c0_61 = arith.constant 0 : index
    %c0_62 = arith.constant 0 : index
    %163 = vector.load %arg11[%c0_60, %c0_61, %c0_62] : memref<2x2048x32xbf16, #tpu.memory_space<vmem>>, vector<1x2048x32xbf16>
    %164 = vector.shape_cast %163 : vector<1x2048x32xbf16> to vector<2048x32xbf16>
    %cst_63 = arith.constant dense<0.000000e+00> : vector<16x32xf32>
    %165 = tpu.matmul %162, %164, %cst_63 {dimension_numbers = #tpu.dot_dimension_numbers<[1], [0], [0], [1], [0, 0, 1, 1], [], []>} : vector<16x2048xbf16>, vector<2048x32xbf16>, vector<16x32xf32> -> vector<16x32xf32>
    %166 = vector.broadcast %15 : vector<1x32xf32> to vector<16x32xf32>
    %167 = arith.addf %165, %166 : vector<16x32xf32>
    %168 = arith.addf %151, %167 : vector<16x32xf32>
    %cst_64 = arith.constant dense<0.000000e+00> : vector<16xf32>
    %169 = vector.multi_reduction <add>, %168, %cst_64 [1] : vector<16x32xf32> to vector<16xf32>
    %170 = vector.shape_cast %169 : vector<16xf32> to vector<16x1xf32>
    %cst_65 = arith.constant 3.200000e+01 : f32
    %171 = vector.broadcast %cst_65 : f32 to vector<16x1xf32>
    %172 = arith.divf %170, %171 : vector<16x1xf32>
    %173 = vector.broadcast %172 : vector<16x1xf32> to vector<16x32xf32>
    %174 = arith.subf %168, %173 : vector<16x32xf32>
    %175 = arith.mulf %174, %174 : vector<16x32xf32>
    %cst_66 = arith.constant dense<0.000000e+00> : vector<16xf32>
    %176 = vector.multi_reduction <add>, %175, %cst_66 [1] : vector<16x32xf32> to vector<16xf32>
    %177 = vector.shape_cast %176 : vector<16xf32> to vector<16x1xf32>
    %cst_67 = arith.constant 3.200000e+01 : f32
    %178 = vector.broadcast %cst_67 : f32 to vector<16x1xf32>
    %179 = arith.divf %177, %178 : vector<16x1xf32>
    %cst_68 = arith.constant 9.99999974E-6 : f32
    %180 = vector.broadcast %cst_68 : f32 to vector<16x1xf32>
    %181 = arith.addf %179, %180 : vector<16x1xf32>
    %182 = math.rsqrt %181 : vector<16x1xf32>
    %183 = vector.broadcast %182 : vector<16x1xf32> to vector<16x32xf32>
    %184 = arith.mulf %174, %183 : vector<16x32xf32>
    %185 = vector.broadcast %16 : vector<1x32xf32> to vector<16x32xf32>
    %186 = arith.mulf %184, %185 : vector<16x32xf32>
    %187 = vector.broadcast %17 : vector<1x32xf32> to vector<16x32xf32>
    %188 = arith.addf %186, %187 : vector<16x32xf32>
    %c1 = arith.constant 1 : index
    %c0_69 = arith.constant 0 : index
    %c0_70 = arith.constant 0 : index
    %189 = vector.load %arg12[%c1, %c0_69, %c0_70] : memref<2x6x32xf32, #tpu.memory_space<vmem>>, vector<1x6x32xf32>
    %190 = vector.shape_cast %189 : vector<1x6x32xf32> to vector<6x32xf32>
    %191 = vector.extract_strided_slice %190 {offsets = [0, 0], sizes = [1, 32], strides = [1, 1]} : vector<6x32xf32> to vector<1x32xf32>
    %192 = vector.extract_strided_slice %190 {offsets = [1, 0], sizes = [1, 32], strides = [1, 1]} : vector<6x32xf32> to vector<1x32xf32>
    %193 = vector.extract_strided_slice %190 {offsets = [2, 0], sizes = [1, 32], strides = [1, 1]} : vector<6x32xf32> to vector<1x32xf32>
    %194 = vector.extract_strided_slice %190 {offsets = [3, 0], sizes = [1, 32], strides = [1, 1]} : vector<6x32xf32> to vector<1x32xf32>
    %195 = vector.extract_strided_slice %190 {offsets = [4, 0], sizes = [1, 32], strides = [1, 1]} : vector<6x32xf32> to vector<1x32xf32>
    %196 = vector.extract_strided_slice %190 {offsets = [5, 0], sizes = [1, 32], strides = [1, 1]} : vector<6x32xf32> to vector<1x32xf32>
    %c1_71 = arith.constant 1 : index
    %c0_72 = arith.constant 0 : index
    %c0_73 = arith.constant 0 : index
    %197 = vector.load %arg8[%c1_71, %c0_72, %c0_73] : memref<2x32x32xbf16, #tpu.memory_space<vmem>>, vector<1x32x32xbf16>
    %198 = vector.shape_cast %197 : vector<1x32x32xbf16> to vector<32x32xbf16>
    %199 = arith.truncf %188 : vector<16x32xf32> to vector<16x32xbf16>
    %c1_74 = arith.constant 1 : index
    %c0_75 = arith.constant 0 : index
    %c0_76 = arith.constant 0 : index
    %200 = vector.load %arg6[%c1_74, %c0_75, %c0_76] : memref<2x32x96xbf16, #tpu.memory_space<vmem>>, vector<1x32x96xbf16>
    %201 = vector.shape_cast %200 : vector<1x32x96xbf16> to vector<32x96xbf16>
    %cst_77 = arith.constant dense<0.000000e+00> : vector<16x96xf32>
    %202 = tpu.matmul %199, %201, %cst_77 {dimension_numbers = #tpu.dot_dimension_numbers<[1], [0], [0], [1], [0, 0, 1, 1], [], []>} : vector<16x32xbf16>, vector<32x96xbf16>, vector<16x96xf32> -> vector<16x96xf32>
    %c1_78 = arith.constant 1 : index
    %c0_79 = arith.constant 0 : index
    %c0_80 = arith.constant 0 : index
    %203 = vector.load %arg7[%c1_78, %c0_79, %c0_80] : memref<2x1x96xf32, #tpu.memory_space<vmem>>, vector<1x1x96xf32>
    %204 = vector.shape_cast %203 : vector<1x1x96xf32> to vector<1x96xf32>
    %205 = vector.broadcast %204 : vector<1x96xf32> to vector<16x96xf32>
    %206 = arith.addf %202, %205 : vector<16x96xf32>
    %cst_81 = arith.constant 0.000000e+00 : f32
    %207 = vector.broadcast %cst_81 : f32 to vector<16x32xf32>
    %208 = vector.extract_strided_slice %206 {offsets = [0, 0], sizes = [16, 8], strides = [1, 1]} : vector<16x96xf32> to vector<16x8xf32>
    %209 = arith.truncf %208 : vector<16x8xf32> to vector<16x8xbf16>
    %210 = vector.extract_strided_slice %206 {offsets = [0, 32], sizes = [16, 8], strides = [1, 1]} : vector<16x96xf32> to vector<16x8xf32>
    %211 = arith.truncf %210 : vector<16x8xf32> to vector<16x8xbf16>
    %212 = vector.extract_strided_slice %206 {offsets = [0, 64], sizes = [16, 8], strides = [1, 1]} : vector<16x96xf32> to vector<16x8xf32>
    %213 = arith.truncf %212 : vector<16x8xf32> to vector<16x8xbf16>
    "tpu.trace_start"() <{level = 10 : i32, message = "qd,kd->qk"}> : () -> ()
    %cst_82 = arith.constant dense<0.000000e+00> : vector<16x16xf32>
    %214 = tpu.matmul %209, %211, %cst_82 {dimension_numbers = #tpu.dot_dimension_numbers<[1], [1], [0], [0], [0, 0, 1, 0], [], []>} : vector<16x8xbf16>, vector<16x8xbf16>, vector<16x16xf32> -> vector<16x16xf32>
    "tpu.trace_stop"() : () -> ()
    %cst_83 = arith.constant 0.353553385 : f32
    %215 = vector.broadcast %cst_83 : f32 to vector<16x16xf32>
    %216 = arith.mulf %214, %215 : vector<16x16xf32>
    %217 = arith.addf %216, %0 : vector<16x16xf32>
    %cst_84 = arith.constant dense<0xFF800000> : vector<16xf32>
    %218 = vector.multi_reduction <maximumf>, %217, %cst_84 [1] : vector<16x16xf32> to vector<16xf32>
    %219 = vector.shape_cast %218 : vector<16xf32> to vector<16x1xf32>
    %220 = vector.broadcast %219 : vector<16x1xf32> to vector<16x16xf32>
    %221 = arith.subf %217, %220 : vector<16x16xf32>
    %222 = math.exp %221 : vector<16x16xf32>
    %cst_85 = arith.constant dense<0.000000e+00> : vector<16xf32>
    %223 = vector.multi_reduction <add>, %222, %cst_85 [1] : vector<16x16xf32> to vector<16xf32>
    %224 = vector.shape_cast %223 : vector<16xf32> to vector<16x1xf32>
    %225 = vector.broadcast %224 : vector<16x1xf32> to vector<16x16xf32>
    %226 = arith.divf %222, %225 : vector<16x16xf32>
    %227 = arith.truncf %226 : vector<16x16xf32> to vector<16x16xbf16>
    %cst_86 = arith.constant dense<0.000000e+00> : vector<16x8xf32>
    %228 = tpu.matmul %227, %213, %cst_86 {dimension_numbers = #tpu.dot_dimension_numbers<[1], [0], [0], [1], [0, 0, 1, 1], [], []>} : vector<16x16xbf16>, vector<16x8xbf16>, vector<16x8xf32> -> vector<16x8xf32>
    %229 = arith.truncf %228 : vector<16x8xf32> to vector<16x8xbf16>
    %230 = vector.extract_strided_slice %198 {offsets = [0, 0], sizes = [8, 32], strides = [1, 1]} : vector<32x32xbf16> to vector<8x32xbf16>
    %cst_87 = arith.constant dense<0.000000e+00> : vector<16x32xf32>
    %231 = tpu.matmul %229, %230, %cst_87 {dimension_numbers = #tpu.dot_dimension_numbers<[1], [0], [0], [1], [0, 0, 1, 1], [], []>} : vector<16x8xbf16>, vector<8x32xbf16>, vector<16x32xf32> -> vector<16x32xf32>
    %232 = arith.addf %207, %231 : vector<16x32xf32>
    %233 = vector.extract_strided_slice %206 {offsets = [0, 8], sizes = [16, 8], strides = [1, 1]} : vector<16x96xf32> to vector<16x8xf32>
    %234 = arith.truncf %233 : vector<16x8xf32> to vector<16x8xbf16>
    %235 = vector.extract_strided_slice %206 {offsets = [0, 40], sizes = [16, 8], strides = [1, 1]} : vector<16x96xf32> to vector<16x8xf32>
    %236 = arith.truncf %235 : vector<16x8xf32> to vector<16x8xbf16>
    %237 = vector.extract_strided_slice %206 {offsets = [0, 72], sizes = [16, 8], strides = [1, 1]} : vector<16x96xf32> to vector<16x8xf32>
    %238 = arith.truncf %237 : vector<16x8xf32> to vector<16x8xbf16>
    "tpu.trace_start"() <{level = 10 : i32, message = "qd,kd->qk"}> : () -> ()
    %cst_88 = arith.constant dense<0.000000e+00> : vector<16x16xf32>
    %239 = tpu.matmul %234, %236, %cst_88 {dimension_numbers = #tpu.dot_dimension_numbers<[1], [1], [0], [0], [0, 0, 1, 0], [], []>} : vector<16x8xbf16>, vector<16x8xbf16>, vector<16x16xf32> -> vector<16x16xf32>
    "tpu.trace_stop"() : () -> ()
    %cst_89 = arith.constant 0.353553385 : f32
    %240 = vector.broadcast %cst_89 : f32 to vector<16x16xf32>
    %241 = arith.mulf %239, %240 : vector<16x16xf32>
    %242 = arith.addf %241, %0 : vector<16x16xf32>
    %cst_90 = arith.constant dense<0xFF800000> : vector<16xf32>
    %243 = vector.multi_reduction <maximumf>, %242, %cst_90 [1] : vector<16x16xf32> to vector<16xf32>
    %244 = vector.shape_cast %243 : vector<16xf32> to vector<16x1xf32>
    %245 = vector.broadcast %244 : vector<16x1xf32> to vector<16x16xf32>
    %246 = arith.subf %242, %245 : vector<16x16xf32>
    %247 = math.exp %246 : vector<16x16xf32>
    %cst_91 = arith.constant dense<0.000000e+00> : vector<16xf32>
    %248 = vector.multi_reduction <add>, %247, %cst_91 [1] : vector<16x16xf32> to vector<16xf32>
    %249 = vector.shape_cast %248 : vector<16xf32> to vector<16x1xf32>
    %250 = vector.broadcast %249 : vector<16x1xf32> to vector<16x16xf32>
    %251 = arith.divf %247, %250 : vector<16x16xf32>
    %252 = arith.truncf %251 : vector<16x16xf32> to vector<16x16xbf16>
    %cst_92 = arith.constant dense<0.000000e+00> : vector<16x8xf32>
    %253 = tpu.matmul %252, %238, %cst_92 {dimension_numbers = #tpu.dot_dimension_numbers<[1], [0], [0], [1], [0, 0, 1, 1], [], []>} : vector<16x16xbf16>, vector<16x8xbf16>, vector<16x8xf32> -> vector<16x8xf32>
    %254 = arith.truncf %253 : vector<16x8xf32> to vector<16x8xbf16>
    %255 = vector.extract_strided_slice %198 {offsets = [8, 0], sizes = [8, 32], strides = [1, 1]} : vector<32x32xbf16> to vector<8x32xbf16>
    %cst_93 = arith.constant dense<0.000000e+00> : vector<16x32xf32>
    %256 = tpu.matmul %254, %255, %cst_93 {dimension_numbers = #tpu.dot_dimension_numbers<[1], [0], [0], [1], [0, 0, 1, 1], [], []>} : vector<16x8xbf16>, vector<8x32xbf16>, vector<16x32xf32> -> vector<16x32xf32>
    %257 = arith.addf %232, %256 : vector<16x32xf32>
    %258 = vector.extract_strided_slice %206 {offsets = [0, 16], sizes = [16, 8], strides = [1, 1]} : vector<16x96xf32> to vector<16x8xf32>
    %259 = arith.truncf %258 : vector<16x8xf32> to vector<16x8xbf16>
    %260 = vector.extract_strided_slice %206 {offsets = [0, 48], sizes = [16, 8], strides = [1, 1]} : vector<16x96xf32> to vector<16x8xf32>
    %261 = arith.truncf %260 : vector<16x8xf32> to vector<16x8xbf16>
    %262 = vector.extract_strided_slice %206 {offsets = [0, 80], sizes = [16, 8], strides = [1, 1]} : vector<16x96xf32> to vector<16x8xf32>
    %263 = arith.truncf %262 : vector<16x8xf32> to vector<16x8xbf16>
    "tpu.trace_start"() <{level = 10 : i32, message = "qd,kd->qk"}> : () -> ()
    %cst_94 = arith.constant dense<0.000000e+00> : vector<16x16xf32>
    %264 = tpu.matmul %259, %261, %cst_94 {dimension_numbers = #tpu.dot_dimension_numbers<[1], [1], [0], [0], [0, 0, 1, 0], [], []>} : vector<16x8xbf16>, vector<16x8xbf16>, vector<16x16xf32> -> vector<16x16xf32>
    "tpu.trace_stop"() : () -> ()
    %cst_95 = arith.constant 0.353553385 : f32
    %265 = vector.broadcast %cst_95 : f32 to vector<16x16xf32>
    %266 = arith.mulf %264, %265 : vector<16x16xf32>
    %267 = arith.addf %266, %0 : vector<16x16xf32>
    %cst_96 = arith.constant dense<0xFF800000> : vector<16xf32>
    %268 = vector.multi_reduction <maximumf>, %267, %cst_96 [1] : vector<16x16xf32> to vector<16xf32>
    %269 = vector.shape_cast %268 : vector<16xf32> to vector<16x1xf32>
    %270 = vector.broadcast %269 : vector<16x1xf32> to vector<16x16xf32>
    %271 = arith.subf %267, %270 : vector<16x16xf32>
    %272 = math.exp %271 : vector<16x16xf32>
    %cst_97 = arith.constant dense<0.000000e+00> : vector<16xf32>
    %273 = vector.multi_reduction <add>, %272, %cst_97 [1] : vector<16x16xf32> to vector<16xf32>
    %274 = vector.shape_cast %273 : vector<16xf32> to vector<16x1xf32>
    %275 = vector.broadcast %274 : vector<16x1xf32> to vector<16x16xf32>
    %276 = arith.divf %272, %275 : vector<16x16xf32>
    %277 = arith.truncf %276 : vector<16x16xf32> to vector<16x16xbf16>
    %cst_98 = arith.constant dense<0.000000e+00> : vector<16x8xf32>
    %278 = tpu.matmul %277, %263, %cst_98 {dimension_numbers = #tpu.dot_dimension_numbers<[1], [0], [0], [1], [0, 0, 1, 1], [], []>} : vector<16x16xbf16>, vector<16x8xbf16>, vector<16x8xf32> -> vector<16x8xf32>
    %279 = arith.truncf %278 : vector<16x8xf32> to vector<16x8xbf16>
    %280 = vector.extract_strided_slice %198 {offsets = [16, 0], sizes = [8, 32], strides = [1, 1]} : vector<32x32xbf16> to vector<8x32xbf16>
    %cst_99 = arith.constant dense<0.000000e+00> : vector<16x32xf32>
    %281 = tpu.matmul %279, %280, %cst_99 {dimension_numbers = #tpu.dot_dimension_numbers<[1], [0], [0], [1], [0, 0, 1, 1], [], []>} : vector<16x8xbf16>, vector<8x32xbf16>, vector<16x32xf32> -> vector<16x32xf32>
    %282 = arith.addf %257, %281 : vector<16x32xf32>
    %283 = vector.extract_strided_slice %206 {offsets = [0, 24], sizes = [16, 8], strides = [1, 1]} : vector<16x96xf32> to vector<16x8xf32>
    %284 = arith.truncf %283 : vector<16x8xf32> to vector<16x8xbf16>
    %285 = vector.extract_strided_slice %206 {offsets = [0, 56], sizes = [16, 8], strides = [1, 1]} : vector<16x96xf32> to vector<16x8xf32>
    %286 = arith.truncf %285 : vector<16x8xf32> to vector<16x8xbf16>
    %287 = vector.extract_strided_slice %206 {offsets = [0, 88], sizes = [16, 8], strides = [1, 1]} : vector<16x96xf32> to vector<16x8xf32>
    %288 = arith.truncf %287 : vector<16x8xf32> to vector<16x8xbf16>
    "tpu.trace_start"() <{level = 10 : i32, message = "qd,kd->qk"}> : () -> ()
    %cst_100 = arith.constant dense<0.000000e+00> : vector<16x16xf32>
    %289 = tpu.matmul %284, %286, %cst_100 {dimension_numbers = #tpu.dot_dimension_numbers<[1], [1], [0], [0], [0, 0, 1, 0], [], []>} : vector<16x8xbf16>, vector<16x8xbf16>, vector<16x16xf32> -> vector<16x16xf32>
    "tpu.trace_stop"() : () -> ()
    %cst_101 = arith.constant 0.353553385 : f32
    %290 = vector.broadcast %cst_101 : f32 to vector<16x16xf32>
    %291 = arith.mulf %289, %290 : vector<16x16xf32>
    %292 = arith.addf %291, %0 : vector<16x16xf32>
    %cst_102 = arith.constant dense<0xFF800000> : vector<16xf32>
    %293 = vector.multi_reduction <maximumf>, %292, %cst_102 [1] : vector<16x16xf32> to vector<16xf32>
    %294 = vector.shape_cast %293 : vector<16xf32> to vector<16x1xf32>
    %295 = vector.broadcast %294 : vector<16x1xf32> to vector<16x16xf32>
    %296 = arith.subf %292, %295 : vector<16x16xf32>
    %297 = math.exp %296 : vector<16x16xf32>
    %cst_103 = arith.constant dense<0.000000e+00> : vector<16xf32>
    %298 = vector.multi_reduction <add>, %297, %cst_103 [1] : vector<16x16xf32> to vector<16xf32>
    %299 = vector.shape_cast %298 : vector<16xf32> to vector<16x1xf32>
    %300 = vector.broadcast %299 : vector<16x1xf32> to vector<16x16xf32>
    %301 = arith.divf %297, %300 : vector<16x16xf32>
    %302 = arith.truncf %301 : vector<16x16xf32> to vector<16x16xbf16>
    %cst_104 = arith.constant dense<0.000000e+00> : vector<16x8xf32>
    %303 = tpu.matmul %302, %288, %cst_104 {dimension_numbers = #tpu.dot_dimension_numbers<[1], [0], [0], [1], [0, 0, 1, 1], [], []>} : vector<16x16xbf16>, vector<16x8xbf16>, vector<16x8xf32> -> vector<16x8xf32>
    %304 = arith.truncf %303 : vector<16x8xf32> to vector<16x8xbf16>
    %305 = vector.extract_strided_slice %198 {offsets = [24, 0], sizes = [8, 32], strides = [1, 1]} : vector<32x32xbf16> to vector<8x32xbf16>
    %cst_105 = arith.constant dense<0.000000e+00> : vector<16x32xf32>
    %306 = tpu.matmul %304, %305, %cst_105 {dimension_numbers = #tpu.dot_dimension_numbers<[1], [0], [0], [1], [0, 0, 1, 1], [], []>} : vector<16x8xbf16>, vector<8x32xbf16>, vector<16x32xf32> -> vector<16x32xf32>
    %307 = arith.addf %282, %306 : vector<16x32xf32>
    %308 = vector.broadcast %191 : vector<1x32xf32> to vector<16x32xf32>
    %309 = arith.addf %307, %308 : vector<16x32xf32>
    %310 = arith.addf %188, %309 : vector<16x32xf32>
    %cst_106 = arith.constant dense<0.000000e+00> : vector<16xf32>
    %311 = vector.multi_reduction <add>, %310, %cst_106 [1] : vector<16x32xf32> to vector<16xf32>
    %312 = vector.shape_cast %311 : vector<16xf32> to vector<16x1xf32>
    %cst_107 = arith.constant 3.200000e+01 : f32
    %313 = vector.broadcast %cst_107 : f32 to vector<16x1xf32>
    %314 = arith.divf %312, %313 : vector<16x1xf32>
    %315 = vector.broadcast %314 : vector<16x1xf32> to vector<16x32xf32>
    %316 = arith.subf %310, %315 : vector<16x32xf32>
    %317 = arith.mulf %316, %316 : vector<16x32xf32>
    %cst_108 = arith.constant dense<0.000000e+00> : vector<16xf32>
    %318 = vector.multi_reduction <add>, %317, %cst_108 [1] : vector<16x32xf32> to vector<16xf32>
    %319 = vector.shape_cast %318 : vector<16xf32> to vector<16x1xf32>
    %cst_109 = arith.constant 3.200000e+01 : f32
    %320 = vector.broadcast %cst_109 : f32 to vector<16x1xf32>
    %321 = arith.divf %319, %320 : vector<16x1xf32>
    %cst_110 = arith.constant 9.99999974E-6 : f32
    %322 = vector.broadcast %cst_110 : f32 to vector<16x1xf32>
    %323 = arith.addf %321, %322 : vector<16x1xf32>
    %324 = math.rsqrt %323 : vector<16x1xf32>
    %325 = vector.broadcast %324 : vector<16x1xf32> to vector<16x32xf32>
    %326 = arith.mulf %316, %325 : vector<16x32xf32>
    %327 = vector.broadcast %192 : vector<1x32xf32> to vector<16x32xf32>
    %328 = arith.mulf %326, %327 : vector<16x32xf32>
    %329 = vector.broadcast %193 : vector<1x32xf32> to vector<16x32xf32>
    %330 = arith.addf %328, %329 : vector<16x32xf32>
    %331 = arith.truncf %330 : vector<16x32xf32> to vector<16x32xbf16>
    %c1_111 = arith.constant 1 : index
    %c0_112 = arith.constant 0 : index
    %c0_113 = arith.constant 0 : index
    %332 = vector.load %arg9[%c1_111, %c0_112, %c0_113] : memref<2x32x2048xbf16, #tpu.memory_space<vmem>>, vector<1x32x2048xbf16>
    %333 = vector.shape_cast %332 : vector<1x32x2048xbf16> to vector<32x2048xbf16>
    %cst_114 = arith.constant dense<0.000000e+00> : vector<16x2048xf32>
    %334 = tpu.matmul %331, %333, %cst_114 {dimension_numbers = #tpu.dot_dimension_numbers<[1], [0], [0], [1], [0, 0, 1, 1], [], []>} : vector<16x32xbf16>, vector<32x2048xbf16>, vector<16x2048xf32> -> vector<16x2048xf32>
    %c1_115 = arith.constant 1 : index
    %c0_116 = arith.constant 0 : index
    %c0_117 = arith.constant 0 : index
    %335 = vector.load %arg10[%c1_115, %c0_116, %c0_117] : memref<2x1x2048xf32, #tpu.memory_space<vmem>>, vector<1x1x2048xf32>
    %336 = vector.shape_cast %335 : vector<1x1x2048xf32> to vector<1x2048xf32>
    %337 = vector.broadcast %336 : vector<1x2048xf32> to vector<16x2048xf32>
    %338 = arith.addf %334, %337 : vector<16x2048xf32>
    %cst_118 = arith.constant 0.000000e+00 : f32
    %339 = vector.broadcast %cst_118 : f32 to vector<16x2048xf32>
    %340 = arith.maximumf %338, %339 : vector<16x2048xf32>
    %341 = arith.truncf %340 : vector<16x2048xf32> to vector<16x2048xbf16>
    %c1_119 = arith.constant 1 : index
    %c0_120 = arith.constant 0 : index
    %c0_121 = arith.constant 0 : index
    %342 = vector.load %arg11[%c1_119, %c0_120, %c0_121] : memref<2x2048x32xbf16, #tpu.memory_space<vmem>>, vector<1x2048x32xbf16>
    %343 = vector.shape_cast %342 : vector<1x2048x32xbf16> to vector<2048x32xbf16>
    %cst_122 = arith.constant dense<0.000000e+00> : vector<16x32xf32>
    %344 = tpu.matmul %341, %343, %cst_122 {dimension_numbers = #tpu.dot_dimension_numbers<[1], [0], [0], [1], [0, 0, 1, 1], [], []>} : vector<16x2048xbf16>, vector<2048x32xbf16>, vector<16x32xf32> -> vector<16x32xf32>
    %345 = vector.broadcast %194 : vector<1x32xf32> to vector<16x32xf32>
    %346 = arith.addf %344, %345 : vector<16x32xf32>
    %347 = arith.addf %330, %346 : vector<16x32xf32>
    %cst_123 = arith.constant dense<0.000000e+00> : vector<16xf32>
    %348 = vector.multi_reduction <add>, %347, %cst_123 [1] : vector<16x32xf32> to vector<16xf32>
    %349 = vector.shape_cast %348 : vector<16xf32> to vector<16x1xf32>
    %cst_124 = arith.constant 3.200000e+01 : f32
    %350 = vector.broadcast %cst_124 : f32 to vector<16x1xf32>
    %351 = arith.divf %349, %350 : vector<16x1xf32>
    %352 = vector.broadcast %351 : vector<16x1xf32> to vector<16x32xf32>
    %353 = arith.subf %347, %352 : vector<16x32xf32>
    %354 = arith.mulf %353, %353 : vector<16x32xf32>
    %cst_125 = arith.constant dense<0.000000e+00> : vector<16xf32>
    %355 = vector.multi_reduction <add>, %354, %cst_125 [1] : vector<16x32xf32> to vector<16xf32>
    %356 = vector.shape_cast %355 : vector<16xf32> to vector<16x1xf32>
    %cst_126 = arith.constant 3.200000e+01 : f32
    %357 = vector.broadcast %cst_126 : f32 to vector<16x1xf32>
    %358 = arith.divf %356, %357 : vector<16x1xf32>
    %cst_127 = arith.constant 9.99999974E-6 : f32
    %359 = vector.broadcast %cst_127 : f32 to vector<16x1xf32>
    %360 = arith.addf %358, %359 : vector<16x1xf32>
    %361 = math.rsqrt %360 : vector<16x1xf32>
    %362 = vector.broadcast %361 : vector<16x1xf32> to vector<16x32xf32>
    %363 = arith.mulf %353, %362 : vector<16x32xf32>
    %364 = vector.broadcast %195 : vector<1x32xf32> to vector<16x32xf32>
    %365 = arith.mulf %363, %364 : vector<16x32xf32>
    %366 = vector.broadcast %196 : vector<1x32xf32> to vector<16x32xf32>
    %367 = arith.addf %365, %366 : vector<16x32xf32>
    %368 = vector.extract_strided_slice %367 {offsets = [7, 0], sizes = [1, 32], strides = [1, 1]} : vector<16x32xf32> to vector<1x32xf32>
    %369 = vector.extract_strided_slice %367 {offsets = [15, 0], sizes = [1, 32], strides = [1, 1]} : vector<16x32xf32> to vector<1x32xf32>
    %370 = tpu.concatenate %368, %369 in 0 : vector<1x32xf32>, vector<1x32xf32> -> vector<2x32xf32>
    %371 = arith.truncf %370 : vector<2x32xf32> to vector<2x32xbf16>
    %c0_128 = arith.constant 0 : index
    %c0_129 = arith.constant 0 : index
    %372 = vector.load %arg13[%c0_128, %c0_129] : memref<32x3xbf16, #tpu.memory_space<vmem>>, vector<32x3xbf16>
    %cst_130 = arith.constant dense<0.000000e+00> : vector<2x3xf32>
    %373 = tpu.matmul %371, %372, %cst_130 {dimension_numbers = #tpu.dot_dimension_numbers<[1], [0], [0], [1], [0, 0, 1, 1], [], []>} : vector<2x32xbf16>, vector<32x3xbf16>, vector<2x3xf32> -> vector<2x3xf32>
    %c0_131 = arith.constant 0 : index
    %c0_132 = arith.constant 0 : index
    %374 = vector.load %arg14[%c0_131, %c0_132] : memref<1x3xf32, #tpu.memory_space<vmem>>, vector<1x3xf32>
    %375 = vector.broadcast %374 : vector<1x3xf32> to vector<2x3xf32>
    %376 = arith.addf %373, %375 : vector<2x3xf32>
    %c0_133 = arith.constant 0 : index
    %c0_134 = arith.constant 0 : index
    %377 = vector.load %arg15[%c0_133, %c0_134] : memref<2x3xf32, #tpu.memory_space<vmem>>, vector<2x3xf32>
    tpu.vector_store %arg15[%c0_133, %c0_134], %376 {strides = array<i32>} : memref<2x3xf32, #tpu.memory_space<vmem>>, vector<2x3xf32>,
    return
  }
  func.func @transform_0(%arg0: i32) -> (i32, i32) {
    %c0_i32 = arith.constant 0 : i32
    %c0_i32_0 = arith.constant 0 : i32
    %c0_i32_1 = arith.constant 0 : i32
    return %c0_i32, %c0_i32_0 : i32, i32
  }
  func.func @transform_1(%arg0: i32) -> (i32, i32) {
    %c0_i32 = arith.constant 0 : i32
    %c0_i32_0 = arith.constant 0 : i32
    %c0_i32_1 = arith.constant 0 : i32
    return %c0_i32, %c0_i32_0 : i32, i32
  }
  func.func @transform_2(%arg0: i32) -> (i32, i32) {
    %c0_i32 = arith.constant 0 : i32
    %c0_i32_0 = arith.constant 0 : i32
    %c0_i32_1 = arith.constant 0 : i32
    return %c0_i32, %c0_i32_0 : i32, i32
  }
  func.func @transform_3(%arg0: i32) -> (i32, i32) {
    %c0_i32 = arith.constant 0 : i32
    %c0_i32_0 = arith.constant 0 : i32
    %c0_i32_1 = arith.constant 0 : i32
    return %c0_i32, %c0_i32_0 : i32, i32
  }
  func.func @transform_4(%arg0: i32) -> (i32, i32) {
    %c0_i32 = arith.constant 0 : i32
    %c0_i32_0 = arith.constant 0 : i32
    %c0_i32_1 = arith.constant 0 : i32
    return %c0_i32, %c0_i32_0 : i32, i32
  }
  func.func @transform_5(%arg0: i32) -> (i32, i32, i32) {
    %c0_i32 = arith.constant 0 : i32
    %c0_i32_0 = arith.constant 0 : i32
    %c0_i32_1 = arith.constant 0 : i32
    %c0_i32_2 = arith.constant 0 : i32
    return %c0_i32, %c0_i32_0, %c0_i32_1 : i32, i32, i32
  }
  func.func @transform_6(%arg0: i32) -> (i32, i32, i32) {
    %c0_i32 = arith.constant 0 : i32
    %c0_i32_0 = arith.constant 0 : i32
    %c0_i32_1 = arith.constant 0 : i32
    %c0_i32_2 = arith.constant 0 : i32
    return %c0_i32, %c0_i32_0, %c0_i32_1 : i32, i32, i32
  }
  func.func @transform_7(%arg0: i32) -> (i32, i32, i32) {
    %c0_i32 = arith.constant 0 : i32
    %c0_i32_0 = arith.constant 0 : i32
    %c0_i32_1 = arith.constant 0 : i32
    %c0_i32_2 = arith.constant 0 : i32
    return %c0_i32, %c0_i32_0, %c0_i32_1 : i32, i32, i32
  }
  func.func @transform_8(%arg0: i32) -> (i32, i32, i32) {
    %c0_i32 = arith.constant 0 : i32
    %c0_i32_0 = arith.constant 0 : i32
    %c0_i32_1 = arith.constant 0 : i32
    %c0_i32_2 = arith.constant 0 : i32
    return %c0_i32, %c0_i32_0, %c0_i32_1 : i32, i32, i32
  }
  func.func @transform_9(%arg0: i32) -> (i32, i32, i32) {
    %c0_i32 = arith.constant 0 : i32
    %c0_i32_0 = arith.constant 0 : i32
    %c0_i32_1 = arith.constant 0 : i32
    %c0_i32_2 = arith.constant 0 : i32
    return %c0_i32, %c0_i32_0, %c0_i32_1 : i32, i32, i32
  }
  func.func @transform_10(%arg0: i32) -> (i32, i32, i32) {
    %c0_i32 = arith.constant 0 : i32
    %c0_i32_0 = arith.constant 0 : i32
    %c0_i32_1 = arith.constant 0 : i32
    %c0_i32_2 = arith.constant 0 : i32
    return %c0_i32, %c0_i32_0, %c0_i32_1 : i32, i32, i32
  }
  func.func @transform_11(%arg0: i32) -> (i32, i32, i32) {
    %c0_i32 = arith.constant 0 : i32
    %c0_i32_0 = arith.constant 0 : i32
    %c0_i32_1 = arith.constant 0 : i32
    %c0_i32_2 = arith.constant 0 : i32
    return %c0_i32, %c0_i32_0, %c0_i32_1 : i32, i32, i32
  }
  func.func @transform_12(%arg0: i32) -> (i32, i32) {
    %c0_i32 = arith.constant 0 : i32
    %c0_i32_0 = arith.constant 0 : i32
    %c0_i32_1 = arith.constant 0 : i32
    return %c0_i32, %c0_i32_0 : i32, i32
  }
  func.func @transform_13(%arg0: i32) -> (i32, i32) {
    %c0_i32 = arith.constant 0 : i32
    %c0_i32_0 = arith.constant 0 : i32
    %c0_i32_1 = arith.constant 0 : i32
    return %c0_i32, %c0_i32_0 : i32, i32
  }
  func.func @transform_14(%arg0: i32) -> (i32, i32) {
    %c0_i32 = arith.constant 0 : i32
    %c0_i32_0 = arith.constant 0 : i32
    %c0_i32_1 = arith.constant 0 : i32
    return %c0_i32, %c0_i32_0 : i32, i32
  }
}

</mosaic_0001>

<bundles_post_ra>
// kernel: tpu_custom_call.1
= control target key start
LH: loop header
LB: loop body
LE: loop exit
PB: predicated region body
PF: predicated region fallthrough
CT: control target
= control target key end

     0   :  { %v7632_v1 = vmov 0.0   ;;  %vm69_vm0 = vcmask 130048   ;;  %vm7633_vm1 = vmmov 0   ;;  %s9318_s0 = inlined_call_operand.vmem [shape: f32[16,16], index: 0, kind: input, shape index: {}]   ;;  %s9319_s1 = inlined_call_operand.vmem [shape: f32[16,32], index: 1, kind: input, shape index: {}]   ;;  %s9320_s2 = inlined_call_operand.vmem [shape: f32[16,16], index: 2, kind: input, shape index: {}]   ;;  %s9321_s3 = inlined_call_operand.vmem [shape: bf16[16,32], index: 3, kind: input, shape index: {}]   ;;  %s9322_s4 = inlined_call_operand.vmem [shape: f32[1,32], index: 4, kind: input, shape index: {}]   ;;  %s9323_s5 = inlined_call_operand.vmem [shape: bf16[2,32,96], index: 5, kind: input, shape index: {}]   ;;  %s9324_s6 = inlined_call_operand.vmem [shape: f32[2,1,96], index: 6, kind: input, shape index: {}]   ;;  %s9325_s7 = inlined_call_operand.vmem [shape: bf16[2,32,32], index: 7, kind: input, shape index: {}]   ;;  %s9326_s8 = inlined_call_operand.vmem [shape: bf16[2,32,2048], index: 8, kind: input, shape index: {}]   ;;  %s9327_s9 = inlined_call_operand.vmem [shape: f32[2,1,2048], index: 9, kind: input, shape index: {}]   ;;  %s9328_s10 = inlined_call_operand.vmem [shape: bf16[2,2048,32], index: 10, kind: input, shape index: {}]   ;;  %s9329_s11 = inlined_call_operand.vmem [shape: f32[2,6,32], index: 11, kind: input, shape index: {}]   ;;  %s9330_s12 = inlined_call_operand.vmem [shape: bf16[32,3], index: 12, kind: input, shape index: {}]   ;;  %s9331_s13 = inlined_call_operand.vmem [shape: f32[1,3], index: 13, kind: input, shape index: {}]   ;;  %s9332_s14 = inlined_call_operand.hbm [shape: f32[2,3], index: 14, kind: output, shape index: {}]  }
   0x1   :  { %v7261_v0 = vld [vmem:[%s9321_s3] sm:$0xff]   ;;  %7072 = vmatprep.subr.bf16.mxu0 %v7632_v1  ;;  %v52_v3 = vld [vmem:[%s9318_s0 + $0x8] sm:$0xff]  ;;  %7078 = vmatprep.subr.bf16.mxu1 %v7632_v1 }
   0x2   :  { %v51_v2 = vld [vmem:[%s9318_s0] sm:$0xff]  ;;  %7073 = vmatpush3.bf16.msra.mxu0 %v7261_v0  ;;  %7074 = vmatprep.mubr.msk.bf16.mxu0 %vm7633_vm1, %v7632_v1  ;;  %v7263_v6 = vld [vmem:[%s9323_s5 + $0x8] sm:$0xff]  }
   0x3   :  { %v53_v4 = vpack.c.bf16 %v52_v3, %v51_v2  ;;  %7082 = vmatprep.mubr.msk.bf16.mxu1 %vm7633_vm1, %v7632_v1  ;;  %7086 = vmatprep.subr.bf16.mxu0 %v7632_v1  ;;  %v7262_v5 = vld [vmem:[%s9323_s5] sm:$0xff]  }
   0x4   :  { %7079 = vmatpush3.bf16.msra.mxu1 %v7262_v5 }
   0x5   :  { %7075 = vmatmul.mubr.msk.bf16.vlgmr.msra.gmra.mrb[0].mxu0 %vm69_vm0, %v53_v4  ;;  %7080 = vmatprep.subr.bf16.mxu1 %v7632_v1 }
   0x6   :  { %7088 = vmatprep.mubr.msk.bf16.mxu0 %vm7633_vm1, %v7632_v1 }
   0x8   :  { %7081 = vmatpush3.bf16.msra.mxu1 %v7263_v6 }
   0x9   :  { %7092 = vmatprep.subr.bf16.mxu1 %v7632_v1 }
   0xa   :  { %19 = vsyncpa [#allocation3], 0  ;;  %v5986_v7 = vld [vmem:[%s9322_s4] ss:$0 sm:$0xff]  ;;  %v115_v13 = vld [vmem:[%s9319_s1 + $0x8] sm:$0xff]  ;;  %vm147_vm2 = vcmask 261120  }
   0xb   :  { %v114_v11 = vld [vmem:[%s9319_s1] sm:$0xff]  ;;  %s7634_s1 = smov 120   ;;  %s7635_s28 = smov 96   ;;  %vm196_vm3 = vcmask 64512   ;;  %v7797_v37 = vld [vmem:[%s9320_s2 + $0x8] sm:$0xff]  ;;  %vm448_vm4 = vcmask 1043456  }
   0xc   :  { %v5989_v19 = vld [vmem:[%s9324_s6] ss:$0 sm:$0xff]  ;;  %s7636_s29 = smov 88   ;;  %s7637_s18 = smov 56   ;;  %vm5901_vm5 = vcmask 1040384   ;;  %vm5970_vm6 = vcmask 17408  }
   0xd   :  { %v7792_v33 = vld [vmem:[%s9320_s2] sm:$0xff]  ;;  %s7638_s0 = smov 64   ;;  %s7639_s3 = smov 80  }
   0xe   :  { %s7640_s19 = smov 112   ;;  %s7641_s24 = smov 72  }
   0xf   :  { %s7642_s25 = smov 48   ;;  %s7643_s26 = smov 104  }
  0x10   :  { %s9333_s30 = smov 40   ;;  %s7646_s22 = smov [#allocation2]  }
  0x11   :  { %s5978_s23 = sshll.u32 %s7646_s22, 4  ;;  %s5979_s23 = int_to_ptr.vmem [resolvable:$true] %s5978_s23 }
  0x12   :  { %p7613_p1 = scmp.lt.s32.totalorder %s5979_s23, %s5979_s23 }
  0xd8   :  { %v107_v8 = vpop.f32.mrb[0].mxu0 }
  0xd9   :  { %v108_v9 = vadd.f32 %v5986_v7, %v107_v8  ;;  %v7076_v10 = vpop.f32.mrb[1].mxu0 }
  0xda   :  { %v110_v12 = vpop.f32.mrb[2].mxu0 }
  0xdb   :  { %v111_v14 = vadd.f32 %v5986_v7, %v110_v12  ;;  %v7077_v15 = vpop.f32.mrb[3].mxu0  ;;  %v7758_v16 = vadd.f32 %v114_v11, %v108_v9 }
  0xdd   :  { %v7760_v17 = vadd.f32 %v115_v13, %v111_v14 }
  0xdf   :  { %v123_v18 = vpack.c.bf16 %v7760_v17, %v7758_v16 }
  0xe1   :  { %7083 = vmatmul.mubr.msk.bf16.vlgmr.msra.gmra.mrb[0].mxu1 %vm147_vm2, %v123_v18 }
  0xe2   :  { %7094 = vmatprep.mubr.msk.bf16.mxu1 %vm7633_vm1, %v7632_v1 }
 0x1b4   :  { %v185_v20 = vpop.f32.mrb[0].mxu1 }
 0x1b5   :  { %v7084_v21 = vpop.f32.mrb[1].mxu1  ;;  %v186_v23 = vadd.f32 %v5989_v19, %v185_v20 }
 0x1b6   :  { %v188_v22 = vpop.f32.mrb[2].mxu1 }
 0x1b7   :  { %v189_v24 = vadd.f32 %v5989_v19, %v188_v22  ;;  %v7085_v25 = vpop.f32.mrb[3].mxu1 }
 0x1b9   :  { %v7770_v26 = vpack.c.bf16 %v189_v24, %v186_v23 }
 0x1bb   :  { %319 = vrot.lane.b32.xlu1 %v7770_v26, %s7634_s1  ;;  %194 = vrot.lane.b32.xlu0 %v7770_v26, %s7635_s28 }
 0x1bf   :  { %321 = vrot.lane.b32.xlu0 %v7770_v26, %s7636_s29 }
 0x22d   :  { %v195_v27 = vpop.permute.xlu0 %194  ;;  %v320_v31 = vpop.permute.xlu1 %319 }
 0x22e   :  { %v201_v28 = vsel %vm196_vm3, %v195_v27, 0 }
 0x22f   :  { %7087 = vmatpush3.bf16.xpose.msra.mxu0 %v201_v28 }
 0x230   :  { %7098 = vmatprep.subr.bf16.mxu0 %v7632_v1 }
 0x231   :  { %v322_v29 = vpop.permute.xlu0 %321 }
 0x232   :  { %v327_v30 = vsel %vm196_vm3, %v322_v29, 0 }
 0x236   :  { %7089 = vmatmul.mubr.msk.bf16.vlgmr.msra.gmra.mrb[4].mxu0 %vm196_vm3, %v7770_v26 }
 0x237   :  { %7099 = vmatpush3.bf16.xpose.msra.mxu0 %v327_v30  ;;  %7100 = vmatprep.mubr.msk.bf16.mxu0 %vm7633_vm1, %v7632_v1  ;;  %v119_v30 = vld [vmem:[%s9325_s7] sm:$0xf] }
 0x238   :  { %7110 = vmatprep.subr.bf16.mxu0 %v7632_v1 }
 0x23e   :  { %7101 = vmatmul.mubr.msk.bf16.vlgmr.msra.gmra.mrb[8].mxu0 %vm196_vm3, %v320_v31  ;;  %v497_v31 = vsel %vm448_vm4, %v119_v30, 0  ;;  %v121_v30 = vld [vmem:[%s9325_s7 + $0x8] sm:$0xf] }
 0x23f   :  { %7112 = vmatprep.mubr.msk.bf16.mxu0 %vm7633_vm1, %v7632_v1 }
 0x309   :  { %v237_v32 = vpop.f32.mrb[4].mxu0 }
 0x30a   :  { %v244_v34 = vmul.f32 0.35355338, %v237_v32  ;;  %v7090_v35 = vpop.f32.mrb[5].mxu0  ;;  %v120_v32 = vld [vmem:[%s9325_s7 + $0x4] sm:$0xf] }
 0x30b   :  { %v240_v36 = vpop.f32.mrb[6].mxu0 }
 0x30c   :  { %v245_v38 = vmul.f32 0.35355338, %v240_v36  ;;  %v7091_v39 = vpop.f32.mrb[7].mxu0  ;;  %v246_v40 = vadd.f32 %v244_v34, %v7792_v33  ;;  %v450_v34 = vsel %vm448_vm4, %v120_v32, 0 }
 0x30d   :  { %7111 = vmatpush3.bf16.msra.mxu0 %v450_v34 }
 0x30e   :  { %v248_v41 = vsel %vm69_vm0, %v246_v40, -inf  ;;  %v247_v42 = vadd.f32 %v245_v38, %v7797_v37  ;;  %7122 = vmatprep.subr.bf16.mxu0 %v7632_v1 }
 0x30f   :  { %249 = vmax.xlane.f32.xlu1 %v248_v41 }
 0x310   :  { %v251_v43 = vsel %vm69_vm0, %v247_v42, -inf }
 0x311   :  { %v363_v44 = vpop.f32.mrb[8].mxu0  ;;  %252 = vmax.xlane.f32.xlu0 %v251_v43 }
 0x312   :  { %v370_v45 = vmul.f32 0.35355338, %v363_v44  ;;  %v7102_v46 = vpop.f32.mrb[9].mxu0 }
 0x313   :  { %v366_v47 = vpop.f32.mrb[10].mxu0 }
 0x314   :  { %v371_v48 = vmul.f32 0.35355338, %v366_v47  ;;  %v7103_v49 = vpop.f32.mrb[11].mxu0  ;;  %v372_v50 = vadd.f32 %v370_v45, %v7792_v33 }
 0x316   :  { %v374_v51 = vsel %vm69_vm0, %v372_v50, -inf  ;;  %v373_v52 = vadd.f32 %v371_v48, %v7797_v37 }
 0x317   :  { %375 = vmax.xlane.f32.xlu0 %v374_v51 }
 0x318   :  { %v377_v53 = vsel %vm69_vm0, %v373_v52, -inf }
 0x319   :  { %378 = vmax.xlane.f32.xlu1 %v377_v53 }
 0x39c   :  { %v250_v54 = vpop.xlane.xlu1 %249 }
 0x39d   :  { %v254_v55 = vsub.f32 %v246_v40, %v250_v54 }
 0x39e   :  { %v253_v56 = vpop.xlane.xlu0 %252 }
 0x39f   :  { %v256_v57 = vmul.f32 1.442695, %v254_v55  ;;  %v255_v58 = vsub.f32 %v247_v42, %v253_v56 }
 0x3a1   :  { %7524 = vpow2.f32 %v256_v57  ;;  %v258_v59 = vmul.f32 1.442695, %v255_v58 }
 0x3a3   :  { %7526 = vpow2.f32 %v258_v59 }
 0x3a4   :  { %v376_v60 = vpop.xlane.xlu0 %375 }
 0x3a5   :  { %v380_v61 = vsub.f32 %v372_v50, %v376_v60 }
 0x3a6   :  { %v379_v62 = vpop.xlane.xlu1 %378 }
 0x3a7   :  { %v382_v63 = vmul.f32 1.442695, %v380_v61  ;;  %v381_v0 = vsub.f32 %v373_v52, %v379_v62 }
 0x3a9   :  { %7528 = vpow2.f32 %v382_v63  ;;  %v384_v2 = vmul.f32 1.442695, %v381_v0 }
 0x3ab   :  { %v7525_v3 = vpop.eup %7524  ;;  %7530 = vpow2.f32 %v384_v2 }
 0x3ac   :  { %v260_v4 = vsel %vm69_vm0, %v7525_v3, 0.0 }
 0x3ad   :  { %v7527_v5 = vpop.eup %7526  ;;  %261 = vadd.xlane.f32.xlu0 %v260_v4 }
 0x3ae   :  { %v263_v6 = vsel %vm69_vm0, %v7527_v5, 0.0 }
 0x3af   :  { %264 = vadd.xlane.f32.xlu1 %v263_v6 }
 0x3b3   :  { %v7529_v7 = vpop.eup %7528 }
 0x3b4   :  { %v386_v8 = vsel %vm69_vm0, %v7529_v7, 0.0 }
 0x3b5   :  { %v7531_v9 = vpop.eup %7530  ;;  %387 = vadd.xlane.f32.xlu0 %v386_v8 }
 0x3b6   :  { %v389_v10 = vsel %vm69_vm0, %v7531_v9, 0.0 }
 0x3b7   :  { %390 = vadd.xlane.f32.xlu1 %v389_v10 }
 0x3c8   :  { %397 = vrot.lane.b32.xlu1 %v7770_v26, %s7637_s18 }
 0x3cb   :  { %271 = vrot.lane.b32.xlu0 %v7770_v26, %s7638_s0 }
 0x3cc   :  { %542 = vrot.lane.b32.xlu1 %v7770_v26, %s7639_s3 }
 0x3cf   :  { %540 = vrot.lane.b32.xlu0 %v7770_v26, %s7640_s19 }
 0x43a   :  { %v262_v11 = vpop.xlane.xlu0 %261 }
 0x43b   :  { %7532 = vrcp.f32 %v262_v11 }
 0x43c   :  { %v265_v12 = vpop.xlane.xlu1 %264 }
 0x43d   :  { %7534 = vrcp.f32 %v265_v12 }
 0x442   :  { %v388_v13 = vpop.xlane.xlu0 %387 }
 0x443   :  { %7536 = vrcp.f32 %v388_v13 }
 0x444   :  { %v391_v14 = vpop.xlane.xlu1 %390 }
 0x445   :  { %v7533_v15 = vpop.eup %7532  ;;  %7538 = vrcp.f32 %v391_v14 }
 0x446   :  { %v272_v18 = vpop.permute.xlu0 %271  ;;  %v267_v20 = vmul.f32 %v7533_v15, %v7525_v3 }
 0x447   :  { %v7535_v19 = vpop.eup %7534  ;;  %7093 = vmatpush3.bf16.msra.mxu1 %v272_v18 }
 0x448   :  { %v269_v21 = vmul.f32 %v7535_v19, %v7527_v5  ;;  %7104 = vmatprep.subr.bf16.mxu1 %v7632_v1  ;;  %v398_v23 = vpop.permute.xlu1 %397 }
 0x44a   :  { %v270_v22 = vpack.c.bf16 %v269_v21, %v267_v20  ;;  %v541_v48 = vpop.permute.xlu0 %540 }
 0x44c   :  { %7095 = vmatmul.mubr.msk.bf16.vlgmr.msra.gmra.mrb[4].mxu1 %vm69_vm0, %v270_v22  ;;  %v543_v43 = vpop.permute.xlu1 %542 }
 0x44d   :  { %v7537_v24 = vpop.eup %7536  ;;  %7105 = vmatpush3.bf16.msra.mxu1 %v398_v23  ;;  %7106 = vmatprep.mubr.msk.bf16.mxu1 %vm7633_vm1, %v7632_v1  ;;  %v548_v47 = vsel %vm196_vm3, %v543_v43, 0 }
 0x44e   :  { %7116 = vmatprep.subr.bf16.mxu1 %v7632_v1  ;;  %v393_v27 = vmul.f32 %v7537_v24, %v7529_v7 }
 0x44f   :  { %v7539_v25 = vpop.eup %7538 }
 0x450   :  { %v395_v28 = vmul.f32 %v7539_v25, %v7531_v9 }
 0x452   :  { %v396_v29 = vpack.c.bf16 %v395_v28, %v393_v27 }
 0x454   :  { %7107 = vmatmul.mubr.msk.bf16.vlgmr.msra.gmra.mrb[8].mxu1 %vm69_vm0, %v396_v29 }
 0x455   :  { %7118 = vmatprep.mubr.msk.bf16.mxu1 %vm7633_vm1, %v7632_v1  ;;  %7117 = vmatpush3.bf16.msra.mxu1 %v497_v31  ;;  %v670_v31 = vsel %vm448_vm4, %v121_v30, 0 }
 0x456   :  { %7128 = vmatprep.subr.bf16.mxu1 %v7632_v1 }
 0x51f   :  { %v311_v35 = vpop.f32.mrb[4].mxu1 }
 0x520   :  { %v7096_v36 = vpop.f32.mrb[5].mxu1 }
 0x521   :  { %v314_v38 = vpop.f32.mrb[6].mxu1 }
 0x522   :  { %v318_v39 = vpack.c.bf16 %v314_v38, %v311_v35  ;;  %v7097_v40 = vpop.f32.mrb[7].mxu1 }
 0x524   :  { %7119 = vmatmul.mubr.msk.bf16.vlgmr.msra.gmra.mrb[12].mxu1 %vm196_vm3, %v318_v39 }
 0x525   :  { %7130 = vmatprep.mubr.msk.bf16.mxu1 %vm7633_vm1, %v7632_v1 }
 0x527   :  { %v437_v41 = vpop.f32.mrb[8].mxu1 }
 0x528   :  { %v7108_v42 = vpop.f32.mrb[9].mxu1 }
 0x529   :  { %v440_v44 = vpop.f32.mrb[10].mxu1 }
 0x52a   :  { %v444_v45 = vpack.c.bf16 %v440_v44, %v437_v41  ;;  %v7109_v46 = vpop.f32.mrb[11].mxu1 }
 0x52c   :  { %7113 = vmatmul.mubr.msk.bf16.vlgmr.msra.gmra.mrb[12].mxu0 %vm196_vm3, %v444_v45 }
 0x52d   :  { %7123 = vmatpush3.bf16.xpose.msra.mxu0 %v548_v47  ;;  %7124 = vmatprep.mubr.msk.bf16.mxu0 %vm7633_vm1, %v7632_v1 }
 0x52e   :  { %7134 = vmatprep.subr.bf16.mxu0 %v7632_v1 }
 0x534   :  { %7125 = vmatmul.mubr.msk.bf16.vlgmr.msra.gmra.mrb[16].mxu0 %vm196_vm3, %v541_v48 }
 0x535   :  { %7136 = vmatprep.mubr.msk.bf16.mxu0 %vm7633_vm1, %v7632_v1  ;;  %7135 = vmatpush3.bf16.msra.mxu0 %v670_v31 }
 0x536   :  { %7146 = vmatprep.subr.bf16.mxu0 %v7632_v1 }
 0x5f7   :  { %v533_v49 = vpop.f32.mrb[12].mxu1 }
 0x5f8   :  { %v7120_v50 = vpop.f32.mrb[13].mxu1 }
 0x5f9   :  { %v536_v51 = vpop.f32.mrb[14].mxu1 }
 0x5fa   :  { %v7121_v52 = vpop.f32.mrb[15].mxu1 }
 0x5ff   :  { %v486_v53 = vpop.f32.mrb[12].mxu0 }
 0x600   :  { %v7848_v54 = vadd.f32 %v533_v49, %v486_v53  ;;  %v7114_v55 = vpop.f32.mrb[13].mxu0 }
 0x601   :  { %v489_v56 = vpop.f32.mrb[14].mxu0 }
 0x602   :  { %v7850_v57 = vadd.f32 %v536_v51, %v489_v56  ;;  %v7115_v58 = vpop.f32.mrb[15].mxu0 }
 0x607   :  { %v584_v59 = vpop.f32.mrb[16].mxu0 }
 0x608   :  { %v591_v60 = vmul.f32 0.35355338, %v584_v59  ;;  %v7126_v61 = vpop.f32.mrb[17].mxu0 }
 0x609   :  { %v587_v62 = vpop.f32.mrb[18].mxu0 }
 0x60a   :  { %v592_v63 = vmul.f32 0.35355338, %v587_v62  ;;  %v7127_v0 = vpop.f32.mrb[19].mxu0  ;;  %v593_v2 = vadd.f32 %v591_v60, %v7792_v33 }
 0x60c   :  { %v595_v3 = vsel %vm69_vm0, %v593_v2, -inf  ;;  %v594_v4 = vadd.f32 %v592_v63, %v7797_v37 }
 0x60d   :  { %596 = vmax.xlane.f32.xlu1 %v595_v3 }
 0x60e   :  { %v598_v5 = vsel %vm69_vm0, %v594_v4, -inf }
 0x60f   :  { %599 = vmax.xlane.f32.xlu0 %v598_v5 }
 0x69a   :  { %v597_v6 = vpop.xlane.xlu1 %596 }
 0x69b   :  { %v601_v7 = vsub.f32 %v593_v2, %v597_v6 }
 0x69c   :  { %v600_v8 = vpop.xlane.xlu0 %599 }
 0x69d   :  { %v603_v9 = vmul.f32 1.442695, %v601_v7  ;;  %v602_v10 = vsub.f32 %v594_v4, %v600_v8 }
 0x69f   :  { %7540 = vpow2.f32 %v603_v9  ;;  %v605_v11 = vmul.f32 1.442695, %v602_v10 }
 0x6a1   :  { %7542 = vpow2.f32 %v605_v11 }
 0x6a9   :  { %v7541_v12 = vpop.eup %7540 }
 0x6aa   :  { %v607_v13 = vsel %vm69_vm0, %v7541_v12, 0.0 }
 0x6ab   :  { %v7543_v14 = vpop.eup %7542  ;;  %608 = vadd.xlane.f32.xlu0 %v607_v13 }
 0x6ac   :  { %v610_v15 = vsel %vm69_vm0, %v7543_v14, 0.0 }
 0x6ad   :  { %611 = vadd.xlane.f32.xlu1 %v610_v15 }
 0x6be   :  { %717 = vrot.lane.b32.xlu1 %v7770_v26, %s7641_s24 }
 0x6c1   :  { %618 = vrot.lane.b32.xlu0 %v7770_v26, %s7642_s25 }
 0x6c2   :  { %715 = vrot.lane.b32.xlu1 %v7770_v26, %s7643_s26 }
 0x738   :  { %v609_v18 = vpop.xlane.xlu0 %608 }
 0x739   :  { %7544 = vrcp.f32 %v609_v18 }
 0x73a   :  { %v612_v19 = vpop.xlane.xlu1 %611 }
 0x73b   :  { %7546 = vrcp.f32 %v612_v19  ;;  %v7905_v19 = vld [vmem:[%s9329_s11] sm:$0x3f] }
 0x73c   :  { %v619_v20 = vpop.permute.xlu0 %618 }
 0x73d   :  { %7129 = vmatpush3.bf16.msra.mxu1 %v619_v20 }
 0x73e   :  { %7140 = vmatprep.subr.bf16.mxu1 %v7632_v1  ;;  %v718_v25 = vpop.permute.xlu1 %717 }
 0x73f   :  { %v723_v28 = vsel %vm196_vm3, %v718_v25, 0 }
 0x742   :  { %v716_v29 = vpop.permute.xlu1 %715 }
 0x743   :  { %v7545_v21 = vpop.eup %7544 }
 0x744   :  { %v614_v23 = vmul.f32 %v7545_v21, %v7541_v12 }
 0x745   :  { %v7547_v22 = vpop.eup %7546 }
 0x746   :  { %v616_v24 = vmul.f32 %v7547_v22, %v7543_v14  ;;  %v890_v14 = vlaneseq }
 0x748   :  { %v617_v27 = vpack.c.bf16 %v616_v24, %v614_v23  ;;  %v7897_v15 = vshrl.u32 %v890_v14, 7 }
 0x74a   :  { %7131 = vmatmul.mubr.msk.bf16.vlgmr.msra.gmra.mrb[16].mxu1 %vm69_vm0, %v617_v27  ;;  %v7900_v18 = vsub.s32 0, %v7897_v15 }
 0x74b   :  { %7141 = vmatpush3.bf16.xpose.msra.mxu1 %v723_v28  ;;  %7142 = vmatprep.mubr.msk.bf16.mxu1 %vm7633_vm1, %v7632_v1 }
 0x74c   :  { %7152 = vmatprep.subr.bf16.mxu1 %v7632_v1  ;;  %v893_v20 = vrot.slane %v7905_v19, %v7900_v18 }
 0x752   :  { %7143 = vmatmul.mubr.msk.bf16.vlgmr.msra.gmra.mrb[20].mxu1 %vm196_vm3, %v716_v29 }
 0x753   :  { %7154 = vmatprep.mubr.msk.bf16.mxu1 %vm7633_vm1, %v7632_v1 }
 0x81d   :  { %v658_v32 = vpop.f32.mrb[16].mxu1 }
 0x81e   :  { %v7132_v34 = vpop.f32.mrb[17].mxu1 }
 0x81f   :  { %v661_v35 = vpop.f32.mrb[18].mxu1 }
 0x820   :  { %v665_v36 = vpack.c.bf16 %v661_v35, %v658_v32  ;;  %v7133_v38 = vpop.f32.mrb[19].mxu1 }
 0x822   :  { %7137 = vmatmul.mubr.msk.bf16.vlgmr.msra.gmra.mrb[20].mxu0 %vm196_vm3, %v665_v36 }
 0x823   :  { %7148 = vmatprep.mubr.msk.bf16.mxu0 %vm7633_vm1, %v7632_v1 }
 0x825   :  { %v759_v39 = vpop.f32.mrb[20].mxu1 }
 0x826   :  { %v766_v40 = vmul.f32 0.35355338, %v759_v39  ;;  %v7144_v41 = vpop.f32.mrb[21].mxu1 }
 0x827   :  { %v762_v42 = vpop.f32.mrb[22].mxu1 }
 0x828   :  { %v767_v43 = vmul.f32 0.35355338, %v762_v42  ;;  %v7145_v44 = vpop.f32.mrb[23].mxu1  ;;  %v768_v45 = vadd.f32 %v766_v40, %v7792_v33 }
 0x82a   :  { %v770_v46 = vsel %vm69_vm0, %v768_v45, -inf  ;;  %v769_v47 = vadd.f32 %v767_v43, %v7797_v37 }
 0x82b   :  { %771 = vmax.xlane.f32.xlu0 %v770_v46  ;;  %v939_v46 = vld [vmem:[%s9326_s8 + $0x8] sm:$0xff] }
 0x82c   :  { %v773_v48 = vsel %vm69_vm0, %v769_v47, -inf }
 0x82d   :  { %774 = vmax.xlane.f32.xlu1 %v773_v48  ;;  %v947_v48 = vld [vmem:[%s9326_s8 + $0x48] sm:$0xff] }
 0x83e   :  { %793 = vrot.lane.b32.xlu1 %v7770_v26, %s9333_s30 }
 0x8b8   :  { %v772_v49 = vpop.xlane.xlu0 %771 }
 0x8b9   :  { %v776_v50 = vsub.f32 %v768_v45, %v772_v49  ;;  %v946_v45 = vld [vmem:[%s9326_s8 + $0x40] sm:$0xff] }
 0x8ba   :  { %v775_v51 = vpop.xlane.xlu1 %774 }
 0x8bb   :  { %v778_v52 = vmul.f32 1.442695, %v776_v50  ;;  %v777_v53 = vsub.f32 %v769_v47, %v775_v51  ;;  %v6007_v50 = vcombine.low %v939_v46, %v947_v48  ;;  %v6008_v51 = vcombine.high %v939_v46, %v947_v48 }
 0x8bd   :  { %7548 = vpow2.f32 %v778_v52  ;;  %v780_v55 = vmul.f32 1.442695, %v777_v53  ;;  %v954_v52 = vld [vmem:[%s9326_s8 + $0x80] sm:$0xff] }
 0x8be   :  { %v794_v33 = vpop.permute.xlu1 %793  ;;  %v962_v53 = vld [vmem:[%s9326_s8 + $0xc0] sm:$0xff] }
 0x8bf   :  { %7550 = vpow2.f32 %v780_v55  ;;  %7147 = vmatpush3.bf16.msra.mxu0 %v794_v33  ;;  %v955_v55 = vld [vmem:[%s9326_s8 + $0x88] sm:$0xff]  ;;  %v6022_v33 = vcombine.high %v954_v52, %v962_v53 }
 0x8c7   :  { %v7549_v56 = vpop.eup %7548 }
 0x8c8   :  { %v782_v37 = vsel %vm69_vm0, %v7549_v56, 0.0 }
 0x8c9   :  { %v7551_v58 = vpop.eup %7550  ;;  %783 = vadd.xlane.f32.xlu0 %v782_v37  ;;  %v6021_v37 = vcombine.low %v954_v52, %v962_v53  ;;  %v953_v52 = vld [vmem:[%s9326_s8 + $0x78] sm:$0xff] }
 0x8ca   :  { %v785_v59 = vsel %vm69_vm0, %v7551_v58, 0.0 }
 0x8cd   :  { %786 = vadd.xlane.f32.xlu0 %v785_v59 }
 0x8f5   :  { %v706_v60 = vpop.f32.mrb[20].mxu0 }
 0x8f6   :  { %v713_v26 = vadd.f32 %v706_v60, %v7848_v54  ;;  %v7138_v61 = vpop.f32.mrb[21].mxu0  ;;  %v122_v54 = vld [vmem:[%s9325_s7 + $0xc] sm:$0xf]  ;;  %v940_v60 = vld [vmem:[%s9326_s8 + $0x10] sm:$0xff] }
 0x8f7   :  { %v709_v62 = vpop.f32.mrb[22].mxu0  ;;  %v845_v9 = vsel %vm448_vm4, %v122_v54, 0  ;;  %v941_v61 = vld [vmem:[%s9326_s8 + $0x18] sm:$0xff] }
 0x8f8   :  { %v714_v63 = vadd.f32 %v709_v62, %v7850_v57  ;;  %v7139_v0 = vpop.f32.mrb[23].mxu0  ;;  %7153 = vmatpush3.bf16.msra.mxu1 %v845_v9  ;;  %v7645_v62 = vmov 0  }
 0x8f9   :  { %1260 = vmatprep.subr.bf16.mxu1 %v6008_v51  ;;  %v949_v0 = vld [vmem:[%s9326_s8 + $0x58] sm:$0xff] }
 0x8fa   :  { %v945_v51 = vld [vmem:[%s9326_s8 + $0x38] sm:$0xff] }
 0x956   :  { %v784_v2 = vpop.xlane.xlu0 %783 }
 0x957   :  { %7552 = vrcp.f32 %v784_v2 }
 0x95a   :  { %v787_v3 = vpop.xlane.xlu0 %786 }
 0x95b   :  { %7554 = vrcp.f32 %v787_v3  ;;  %v6011_v3 = vcombine.low %v941_v61, %v949_v0 }
 0x961   :  { %v7553_v4 = vpop.eup %7552 }
 0x962   :  { %v789_v6 = vmul.f32 %v7553_v4, %v7549_v56  ;;  %v963_v56 = vld [vmem:[%s9326_s8 + $0xc8] sm:$0xff]  ;;  %v6012_v4 = vcombine.high %v941_v61, %v949_v0  ;;  %v6019_v61 = vcombine.low %v945_v51, %v953_v52 }
 0x963   :  { %v6024_v59 = vcombine.high %v955_v55, %v963_v56 }
 0x965   :  { %v7555_v5 = vpop.eup %7554 }
 0x966   :  { %v791_v7 = vmul.f32 %v7555_v5, %v7551_v58  ;;  %v6023_v58 = vcombine.low %v955_v55, %v963_v56  ;;  %v6020_v56 = vcombine.high %v945_v51, %v953_v52  ;;  %v8166_v51 = vsub.s32 4, %v7897_v15 }
 0x967   :  { %v8169_v52 = vsub.s32 6, %v7897_v15 }
 0x968   :  { %v792_v8 = vpack.c.bf16 %v791_v7, %v789_v6 }
 0x96a   :  { %7149 = vmatmul.mubr.msk.bf16.vlgmr.msra.gmra.mrb[24].mxu0 %vm69_vm0, %v792_v8 }
 0x96b   :  { %1249 = vmatprep.mubr.bf16.mxu0 %v7645_v62 }
 0xa3d   :  { %v833_v57 = vpop.f32.mrb[24].mxu0 }
 0xa3e   :  { %v7150_v10 = vpop.f32.mrb[25].mxu0 }
 0xa3f   :  { %v836_v11 = vpop.f32.mrb[26].mxu0 }
 0xa40   :  { %v840_v12 = vpack.c.bf16 %v836_v11, %v833_v57  ;;  %v7151_v13 = vpop.f32.mrb[27].mxu0  ;;  %v7954_v57 = vsub.s32 1, %v7897_v15 }
 0xa42   :  { %7155 = vmatmul.mubr.msk.bf16.vlgmr.msra.gmra.mrb[24].mxu1 %vm196_vm3, %v840_v12  ;;  %v928_v11 = vrot.slane %v7905_v19, %v7954_v57  ;;  %v7959_v12 = vsub.s32 2, %v7897_v15 }
 0xa43   :  { %1261 = vmatpush1.bf16.msra.mxu1 %v6007_v50  ;;  %1292 = vmatprep.mubr.bf16.mxu1 %v7645_v62  ;;  %v952_v50 = vld [vmem:[%s9326_s8 + $0x70] sm:$0xff] }
 0xa44   :  { %1262 = vmatprep.subr.bf16.mxu1 %v6024_v59  ;;  %v961_v59 = vld [vmem:[%s9326_s8 + $0xb8] sm:$0xff] }
 0xa47   :  { %1263 = vmatpush1.bf16.msra.mxu1 %v6023_v58  ;;  %v968_v58 = vld [vmem:[%s9326_s8 + $0xf0] sm:$0xff] }
 0xa48   :  { %1346 = vmatprep.subr.bf16.mxu1 %v6012_v4  ;;  %v7264_v4 = vld [vmem:[%s9328_s10 + $0x40] sm:$0xff]  }
 0xb15   :  { %v881_v21 = vpop.f32.mrb[24].mxu1 }
 0xb16   :  { %v888_v22 = vadd.f32 %v881_v21, %v713_v26  ;;  %v7156_v23 = vpop.f32.mrb[25].mxu1  ;;  %v948_v26 = vld [vmem:[%s9326_s8 + $0x50] sm:$0xff] }
 0xb17   :  { %v884_v24 = vpop.f32.mrb[26].mxu1  ;;  %v6009_v2 = vcombine.low %v940_v60, %v948_v26 }
 0xb18   :  { %v894_v25 = vadd.f32 %v893_v20, %v888_v22  ;;  %v889_v27 = vadd.f32 %v884_v24, %v714_v63  ;;  %v7157_v28 = vpop.f32.mrb[27].mxu1  ;;  %v6010_v63 = vcombine.high %v940_v60, %v948_v26  ;;  %v956_v24 = vld [vmem:[%s9326_s8 + $0x90] sm:$0xff]  ;;  %v969_v60 = vld [vmem:[%s9326_s8 + $0xf8] sm:$0xff] }
 0xb19   :  { %v965_v28 = vld [vmem:[%s9326_s8 + $0xd8] sm:$0xff]  ;;  %v6036_v0 = vcombine.high %v961_v59, %v969_v60 }
 0xb1a   :  { %v895_v29 = vadd.f32 %v893_v20, %v889_v27  ;;  %v896_v30 = vadd.f32 %v894_v25, %v7758_v16  ;;  %v934_v20 = vrot.slane %v7905_v19, %v7959_v12  ;;  %v964_v25 = vld [vmem:[%s9326_s8 + $0xd0] sm:$0xff]  ;;  %v957_v27 = vld [vmem:[%s9326_s8 + $0x98] sm:$0xff] }
 0xb1c   :  { %v898_v31 = vsel %vm147_vm2, %v896_v30, 0.0  ;;  %v897_v32 = vadd.f32 %v895_v29, %v7760_v17  ;;  %v938_v17 = vld [vmem:[%s9326_s8] sm:$0xff] }
 0xb1d   :  { %899 = vadd.xlane.f32.xlu0 %v898_v31  ;;  %v6006_v47 = vcombine.high %v938_v17, %v946_v45  ;;  %v6005_v49 = vcombine.low %v938_v17, %v946_v45  ;;  %v6026_v31 = vcombine.high %v956_v24, %v964_v25  ;;  %v967_v17 = vld [vmem:[%s9326_s8 + $0xe8] sm:$0xff] }
 0xb1e   :  { %v901_v34 = vsel %vm147_vm2, %v897_v32, 0.0 }
 0xb1f   :  { %1217 = vmatprep.subr.bf16.mxu0 %v6006_v47 }
 0xb20   :  { %1218 = vmatpush1.bf16.msra.mxu0 %v6005_v49  ;;  %v944_v49 = vld [vmem:[%s9326_s8 + $0x30] sm:$0xff] }
 0xb21   :  { %902 = vadd.xlane.f32.xlu0 %v901_v34  ;;  %1219 = vmatprep.subr.bf16.mxu0 %v6022_v33  ;;  %v942_v34 = vld [vmem:[%s9326_s8 + $0x20] sm:$0xff]  ;;  %v6018_v33 = vcombine.high %v944_v49, %v952_v50  ;;  %v6017_v26 = vcombine.low %v944_v49, %v952_v50 }
 0xb24   :  { %1220 = vmatpush1.bf16.msra.mxu0 %v6021_v37  ;;  %v960_v37 = vld [vmem:[%s9326_s8 + $0xb0] sm:$0xff] }
 0xb25   :  { %1303 = vmatprep.subr.bf16.mxu0 %v6010_v63  ;;  %v6034_v63 = vcombine.high %v960_v37, %v968_v58 }
 0xbaa   :  { %v900_v35 = vpop.xlane.xlu0 %899 }
 0xbab   :  { %v905_v36 = vmul.f32 0.03125, %v900_v35  ;;  %v950_v35 = vld [vmem:[%s9326_s8 + $0x60] sm:$0xff] }
 0xbac   :  { %v6013_v45 = vcombine.low %v942_v34, %v950_v35 }
 0xbad   :  { %v907_v38 = vsub.f32 %v896_v30, %v905_v36  ;;  %v943_v36 = vld [vmem:[%s9326_s8 + $0x28] sm:$0xff] }
 0xbae   :  { %v903_v39 = vpop.xlane.xlu0 %902 }
 0xbaf   :  { %v906_v40 = vmul.f32 0.03125, %v903_v39  ;;  %v909_v41 = vmul.f32 %v907_v38, %v907_v38  ;;  %v6025_v39 = vcombine.low %v956_v24, %v964_v25  ;;  %v7279_v24 = vld [vmem:[%s9328_s10 + $0x98] sm:$0xff]   ;;  %v7280_v25 = vld [vmem:[%s9328_s10 + $0x60] sm:$0xff]  }
 0xbb1   :  { %v908_v42 = vsub.f32 %v897_v32, %v906_v40  ;;  %v911_v43 = vsel %vm147_vm2, %v909_v41, 0.0  ;;  %v6028_v32 = vcombine.high %v957_v27, %v965_v28  ;;  %v6027_v40 = vcombine.low %v957_v27, %v965_v28  ;;  %v7281_v27 = vld [vmem:[%s9328_s10 + $0xe0] sm:$0xff]  }
 0xbb2   :  { %912 = vadd.xlane.f32.xlu0 %v911_v43  ;;  %v6014_v41 = vcombine.high %v942_v34, %v950_v35  ;;  %v958_v43 = vld [vmem:[%s9326_s8 + $0xa0] sm:$0xff]  ;;  %v7286_v34 = vld [vmem:[%s9328_s10 + $0x28] sm:$0xff]  }
 0xbb3   :  { %v910_v44 = vmul.f32 %v908_v42, %v908_v42  ;;  %v7282_v28 = vld [vmem:[%s9328_s10 + $0x20] sm:$0xff]   ;;  %v7287_v35 = vld [vmem:[%s9328_s10 + $0xa8] sm:$0xff]  }
 0xbb5   :  { %v914_v16 = vsel %vm147_vm2, %v910_v44, 0.0  ;;  %v966_v44 = vld [vmem:[%s9326_s8 + $0xe0] sm:$0xff] }
 0xbb6   :  { %915 = vadd.xlane.f32.xlu0 %v914_v16  ;;  %v959_v16 = vld [vmem:[%s9326_s8 + $0xa8] sm:$0xff]  ;;  %v6030_v47 = vcombine.high %v958_v43, %v966_v44  ;;  %v6029_v53 = vcombine.low %v958_v43, %v966_v44  ;;  %v7294_v43 = vld [vmem:[%s9328_s10 + $0x38] sm:$0xff]  }
 0xbb7   :  { %v6032_v48 = vcombine.high %v959_v16, %v967_v17  ;;  %v6031_v55 = vcombine.low %v959_v16, %v967_v17  ;;  %v7295_v44 = vld [vmem:[%s9328_s10 + $0xb8] sm:$0xff]   ;;  %v7296_v16 = vld [vmem:[%s9328_s10 + $0x140] sm:$0xff]  }
 0xbb8   :  { %v7297_v17 = vld [vmem:[%s9328_s10 + $0x1c0] sm:$0xff]  }
 0xc3f   :  { %v913_v5 = vpop.xlane.xlu0 %912 }
 0xc40   :  { %v917_v6 = vmul.f32 0.03125, %v913_v5  ;;  %v7265_v5 = vld [vmem:[%s9328_s10 + $0xc0] sm:$0xff]  }
 0xc42   :  { %v919_v7 = vadd.f32 1e-05, %v917_v6  ;;  %v7266_v6 = vld [vmem:[%s9328_s10] sm:$0xff]  }
 0xc43   :  { %v916_v8 = vpop.xlane.xlu0 %915 }
 0xc44   :  { %7556 = vrsqrt.f32 %v919_v7  ;;  %v918_v54 = vmul.f32 0.03125, %v916_v8  ;;  %v7267_v7 = vld [vmem:[%s9328_s10 + $0x80] sm:$0xff]   ;;  %v7268_v8 = vld [vmem:[%s9328_s10 + $0x48] sm:$0xff]  }
 0xc46   :  { %v920_v9 = vadd.f32 1e-05, %v918_v54  ;;  %v7269_v54 = vld [vmem:[%s9328_s10 + $0xc8] sm:$0xff]  }
 0xc48   :  { %7558 = vrsqrt.f32 %v920_v9  ;;  %v7270_v9 = vld [vmem:[%s9328_s10 + $0x8] sm:$0xff]  }
 0xc4e   :  { %v7557_v10 = vpop.eup %7556 }
 0xc4f   :  { %v923_v13 = vmul.f32 %v7557_v10, %v907_v38  ;;  %v951_v38 = vld [vmem:[%s9326_s8 + $0x68] sm:$0xff] }
 0xc50   :  { %v6015_v46 = vcombine.low %v943_v36, %v951_v38  ;;  %v7271_v10 = vld [vmem:[%s9328_s10 + $0x88] sm:$0xff]  }
 0xc51   :  { %v929_v21 = vmul.f32 %v928_v11, %v923_v13  ;;  %v7273_v13 = vld [vmem:[%s9328_s10 + $0xd0] sm:$0xff]  }
 0xc52   :  { %v7559_v14 = vpop.eup %7558 }
 0xc53   :  { %v924_v22 = vmul.f32 %v7559_v14, %v908_v42  ;;  %v7975_v19 = vadd.f32 %v934_v20, %v929_v21  ;;  %v6016_v42 = vcombine.high %v943_v36, %v951_v38  ;;  %v7274_v14 = vld [vmem:[%s9328_s10 + $0x10] sm:$0xff]   ;;  %v7276_v21 = vld [vmem:[%s9328_s10 + $0x58] sm:$0xff]  }
 0xc54   :  { %v7288_v36 = vld [vmem:[%s9328_s10 + $0x70] sm:$0xff]  }
 0xc55   :  { %v930_v23 = vmul.f32 %v928_v11, %v924_v22  ;;  %v7272_v11 = vld [vmem:[%s9328_s10 + $0x50] sm:$0xff]   ;;  %v7277_v22 = vld [vmem:[%s9328_s10 + $0xd8] sm:$0xff]  }
 0xc56   :  { %v7289_v38 = vld [vmem:[%s9328_s10 + $0xf0] sm:$0xff]  }
 0xc57   :  { %v7977_v29 = vadd.f32 %v934_v20, %v930_v23  ;;  %v7275_v20 = vld [vmem:[%s9328_s10 + $0x90] sm:$0xff]   ;;  %v7278_v23 = vld [vmem:[%s9328_s10 + $0x18] sm:$0xff]  }
 0xc59   :  { %v7981_v30 = vpack.c.bf16 %v7977_v29, %v7975_v19 }
 0xc5b   :  { %6037 = vmatmul.mubr.msk.bf16.vlgmr.msra.gmra.mrb[28].mxu0 %vm147_vm2, %v7981_v30  ;;  %6038 = vmatmul.mubr.msk.bf16.vlgmr.msra.gmra.mrb[28].mxu1 %vm147_vm2, %v7981_v30 }
 0xc5c   :  { %1304 = vmatpush1.bf16.msra.mxu0 %v6009_v2  ;;  %1347 = vmatpush1.bf16.msra.mxu1 %v6011_v3  ;;  %v6033_v2 = vcombine.low %v960_v37, %v968_v58  ;;  %v6035_v3 = vcombine.low %v961_v59, %v969_v60 }
 0xc5d   :  { %1305 = vmatprep.subr.bf16.mxu0 %v6026_v31  ;;  %1348 = vmatprep.subr.bf16.mxu1 %v6028_v32  ;;  %v7284_v31 = vld [vmem:[%s9328_s10 + $0x68] sm:$0xff]  }
 0xc5e   :  { %1335 = vmatprep.mubr.bf16.mxu0 %v7645_v62  ;;  %1378 = vmatprep.mubr.bf16.mxu1 %v7645_v62  ;;  %v7285_v32 = vld [vmem:[%s9328_s10 + $0xe8] sm:$0xff]  }
 0xc60   :  { %1306 = vmatpush1.bf16.msra.mxu0 %v6025_v39  ;;  %1349 = vmatpush1.bf16.msra.mxu1 %v6027_v40  ;;  %v7290_v39 = vld [vmem:[%s9328_s10 + $0x30] sm:$0xff]  }
 0xc61   :  { %1389 = vmatprep.subr.bf16.mxu0 %v6014_v41  ;;  %1432 = vmatprep.subr.bf16.mxu1 %v6016_v42  ;;  %v7291_v40 = vld [vmem:[%s9328_s10 + $0xb0] sm:$0xff]   ;;  %v7292_v41 = vld [vmem:[%s9328_s10 + $0x78] sm:$0xff]  }
 0xc62   :  { %v7293_v42 = vld [vmem:[%s9328_s10 + $0xf8] sm:$0xff]  }
 0xc63   :  { %6039 = vmatmul.mubr.msk.bf16.vlgmr.msra.gmra.mrb[32].mxu0 %vm147_vm2, %v7981_v30  ;;  %6040 = vmatmul.mubr.msk.bf16.vlgmr.msra.gmra.mrb[32].mxu1 %vm147_vm2, %v7981_v30 }
 0xc64   :  { %1390 = vmatpush1.bf16.msra.mxu0 %v6013_v45  ;;  %1433 = vmatpush1.bf16.msra.mxu1 %v6015_v46  ;;  %v970_v45 = vld [vmem:[%s9327_s9] sm:$0xff]  ;;  %v8159_v46 = vsub.s32 3, %v7897_v15 }
 0xc65   :  { %1391 = vmatprep.subr.bf16.mxu0 %v6030_v47  ;;  %1434 = vmatprep.subr.bf16.mxu1 %v6032_v48  ;;  %v977_v47 = vrot.slane %v970_v45, %v7900_v18  ;;  %v985_v48 = vrot.slane %v970_v45, %v7959_v12  ;;  %v981_v49 = vrot.slane %v970_v45, %v7954_v57 }
 0xc66   :  { %1421 = vmatprep.mubr.bf16.mxu0 %v7645_v62  ;;  %1464 = vmatprep.mubr.bf16.mxu1 %v7645_v62  ;;  %v989_v50 = vrot.slane %v970_v45, %v8159_v46 }
 0xc68   :  { %1392 = vmatpush1.bf16.msra.mxu0 %v6029_v53  ;;  %1435 = vmatpush1.bf16.msra.mxu1 %v6031_v55 }
 0xc69   :  { %1475 = vmatprep.subr.bf16.mxu0 %v6018_v33  ;;  %1518 = vmatprep.subr.bf16.mxu1 %v6020_v56  ;;  %v8172_v33 = vsub.s32 5, %v7897_v15  ;;  %v8175_v56 = vsub.s32 7, %v7897_v15 }
 0xc6b   :  { %6041 = vmatmul.mubr.msk.bf16.vlgmr.msra.gmra.mrb[36].mxu0 %vm147_vm2, %v7981_v30  ;;  %6042 = vmatmul.mubr.msk.bf16.vlgmr.msra.gmra.mrb[36].mxu1 %vm147_vm2, %v7981_v30  ;;  %v997_v15 = vrot.slane %v970_v45, %v8172_v33 }
 0xc6c   :  { %1476 = vmatpush1.bf16.msra.mxu0 %v6017_v26  ;;  %1519 = vmatpush1.bf16.msra.mxu1 %v6019_v61 }
 0xc6d   :  { %1477 = vmatprep.subr.bf16.mxu0 %v6034_v63  ;;  %1520 = vmatprep.subr.bf16.mxu1 %v6036_v0 }
 0xc6e   :  { %1507 = vmatprep.mubr.bf16.mxu0 %v7645_v62  ;;  %1550 = vmatprep.mubr.bf16.mxu1 %v7645_v62 }
 0xc70   :  { %1478 = vmatpush1.bf16.msra.mxu0 %v6033_v2  ;;  %1521 = vmatpush1.bf16.msra.mxu1 %v6035_v3 }
 0xc71   :  { %6690 = vmatprep.subr.bf16.mxu0 %v7264_v4  ;;  %6712 = vmatprep.subr.bf16.mxu1 %v7265_v5 }
 0xc73   :  { %6043 = vmatmul.mubr.msk.bf16.vlgmr.msra.gmra.mrb[40].mxu0 %vm147_vm2, %v7981_v30  ;;  %6044 = vmatmul.mubr.msk.bf16.vlgmr.msra.gmra.mrb[40].mxu1 %vm147_vm2, %v7981_v30  ;;  %v7283_v30 = vld [vmem:[%s9328_s10 + $0xa0] sm:$0xff]  }
 0xc74   :  { %6691 = vmatpush3.bf16.msra.mxu0 %v7266_v6  ;;  %6713 = vmatpush3.bf16.msra.mxu1 %v7267_v7  ;;  %v993_v6 = vrot.slane %v970_v45, %v8166_v51  ;;  %v1001_v7 = vrot.slane %v970_v45, %v8169_v52 }
 0xc75   :  { %6692 = vmatprep.subr.bf16.mxu0 %v7268_v8  ;;  %6714 = vmatprep.subr.bf16.mxu1 %v7269_v54 }
 0xc78   :  { %6693 = vmatpush3.bf16.msra.mxu0 %v7270_v9  ;;  %6715 = vmatpush3.bf16.msra.mxu1 %v7271_v10  ;;  %v1005_v9 = vrot.slane %v970_v45, %v8175_v56 }
 0xc79   :  { %6694 = vmatprep.subr.bf16.mxu0 %v7272_v11  ;;  %6716 = vmatprep.subr.bf16.mxu1 %v7273_v13 }
 0xc7c   :  { %6695 = vmatpush3.bf16.msra.mxu0 %v7274_v14  ;;  %6717 = vmatpush3.bf16.msra.mxu1 %v7275_v20 }
 0xc7d   :  { %6696 = vmatprep.subr.bf16.mxu0 %v7276_v21  ;;  %6718 = vmatprep.subr.bf16.mxu1 %v7277_v22 }
 0xc80   :  { %6697 = vmatpush3.bf16.msra.mxu0 %v7278_v23  ;;  %6719 = vmatpush3.bf16.msra.mxu1 %v7279_v24  ;;  %v8184_v24 = vld [vmem:[%s9327_s9 + $0x8] sm:$0xff] }
 0xc81   :  { %6698 = vmatprep.subr.bf16.mxu0 %v7280_v25  ;;  %6720 = vmatprep.subr.bf16.mxu1 %v7281_v27 }
 0xc84   :  { %6699 = vmatpush3.bf16.msra.mxu0 %v7282_v28  ;;  %6721 = vmatpush3.bf16.msra.mxu1 %v7283_v30 }
 0xc85   :  { %6700 = vmatprep.subr.bf16.mxu0 %v7284_v31  ;;  %6722 = vmatprep.subr.bf16.mxu1 %v7285_v32 }
 0xc88   :  { %6701 = vmatpush3.bf16.msra.mxu0 %v7286_v34  ;;  %6723 = vmatpush3.bf16.msra.mxu1 %v7287_v35  ;;  %v7298_v34 = vld [vmem:[%s9328_s10 + $0x100] sm:$0xff]  }
 0xc89   :  { %6702 = vmatprep.subr.bf16.mxu0 %v7288_v36  ;;  %6724 = vmatprep.subr.bf16.mxu1 %v7289_v38  ;;  %v7299_v35 = vld [vmem:[%s9328_s10 + $0x180] sm:$0xff]  }
 0xc8c   :  { %6703 = vmatpush3.bf16.msra.mxu0 %v7290_v39  ;;  %6725 = vmatpush3.bf16.msra.mxu1 %v7291_v40 }
 0xc8d   :  { %6704 = vmatprep.subr.bf16.mxu0 %v7292_v41  ;;  %6726 = vmatprep.subr.bf16.mxu1 %v7293_v42  ;;  %v7300_v41 = vld [vmem:[%s9328_s10 + $0x148] sm:$0xff]  }
 0xc8e   :  { %v7301_v42 = vld [vmem:[%s9328_s10 + $0x1c8] sm:$0xff]  }
 0xc90   :  { %6705 = vmatpush3.bf16.msra.mxu0 %v7294_v43  ;;  %6727 = vmatpush3.bf16.msra.mxu1 %v7295_v44  ;;  %v1009_v43 = vrot.slane %v8184_v24, %v7900_v18 }
 0xc91   :  { %6734 = vmatprep.subr.bf16.mxu0 %v7296_v16  ;;  %6756 = vmatprep.subr.bf16.mxu1 %v7297_v17 }
 0xd2e   :  { %v1251_v53 = vpop.f32.mrb[28].mxu0  ;;  %v1294_v55 = vpop.f32.mrb[28].mxu1 }
 0xd2f   :  { %v1252_v37 = vadd.f32 %v1251_v53, %v977_v47  ;;  %v1295_v58 = vadd.f32 %v1294_v55, %v985_v48  ;;  %v1253_v59 = vpop.f32.mrb[29].mxu0  ;;  %v1296_v60 = vpop.f32.mrb[29].mxu1  ;;  %v1013_v55 = vrot.slane %v8184_v24, %v7954_v57 }
 0xd30   :  { %v1254_v26 = vadd.f32 %v1253_v59, %v981_v49  ;;  %v1297_v61 = vadd.f32 %v1296_v60, %v989_v50  ;;  %v1255_v63 = vpop.f32.mrb[30].mxu0  ;;  %v1298_v0 = vpop.f32.mrb[30].mxu1  ;;  %v7302_v59 = vld [vmem:[%s9328_s10 + $0x108] sm:$0xff]  }
 0xd31   :  { %v1256_v2 = vadd.f32 %v1255_v63, %v977_v47  ;;  %v1299_v3 = vadd.f32 %v1298_v0, %v985_v48  ;;  %v1257_v4 = vpop.f32.mrb[31].mxu0  ;;  %v1300_v5 = vpop.f32.mrb[31].mxu1  ;;  %v1561_v10 = vmax.f32 %v1252_v37, 0.0  ;;  %v1563_v11 = vmax.f32 %v1295_v58, 0.0  ;;  %v7303_v60 = vld [vmem:[%s9328_s10 + $0x188] sm:$0xff]  }
 0xd32   :  { %v1258_v8 = vadd.f32 %v1257_v4, %v981_v49  ;;  %v1301_v54 = vadd.f32 %v1300_v5, %v989_v50  ;;  %v1562_v20 = vmax.f32 %v1254_v26, 0.0  ;;  %v1564_v21 = vmax.f32 %v1297_v61, 0.0  ;;  %v7305_v4 = vld [vmem:[%s9328_s10 + $0x1d0] sm:$0xff]  }
 0xd33   :  { %v1577_v13 = vmax.f32 %v1256_v2, 0.0  ;;  %v1579_v14 = vmax.f32 %v1299_v3, 0.0  ;;  %v1017_v47 = vrot.slane %v8184_v24, %v7959_v12  ;;  %v1021_v26 = vrot.slane %v8184_v24, %v8159_v46  ;;  %v7304_v3 = vld [vmem:[%s9328_s10 + $0x150] sm:$0xff]  }
 0xd34   :  { %v1578_v22 = vmax.f32 %v1258_v8, 0.0  ;;  %v1580_v23 = vmax.f32 %v1301_v54, 0.0 }
 0xd35   :  { %v1593_v25 = vpack.c.bf16 %v1577_v13, %v1561_v10  ;;  %v1595_v27 = vpack.c.bf16 %v1579_v14, %v1563_v11  ;;  %v7306_v14 = vld [vmem:[%s9328_s10 + $0x110] sm:$0xff]  }
 0xd36   :  { %v1594_v28 = vpack.c.bf16 %v1578_v22, %v1562_v20  ;;  %v1596_v30 = vpack.c.bf16 %v1580_v23, %v1564_v21  ;;  %v1337_v31 = vpop.f32.mrb[32].mxu0  ;;  %v1380_v32 = vpop.f32.mrb[32].mxu1  ;;  %v7307_v20 = vld [vmem:[%s9328_s10 + $0x190] sm:$0xff]  }
 0xd37   :  { %v1338_v36 = vadd.f32 %v1337_v31, %v993_v6  ;;  %v1381_v38 = vadd.f32 %v1380_v32, %v1001_v7  ;;  %v1339_v39 = vpop.f32.mrb[33].mxu0  ;;  %v1382_v40 = vpop.f32.mrb[33].mxu1 }
 0xd38   :  { %v1340_v44 = vadd.f32 %v1339_v39, %v997_v15  ;;  %v1383_v16 = vadd.f32 %v1382_v40, %v1005_v9  ;;  %v1341_v17 = vpop.f32.mrb[34].mxu0  ;;  %v1384_v45 = vpop.f32.mrb[34].mxu1  ;;  %2669 = vmatprep.mubr.bf16.mxu0 %v1594_v28  ;;  %2710 = vmatprep.mubr.bf16.mxu1 %v1596_v30  ;;  %v7309_v28 = vld [vmem:[%s9328_s10 + $0x1d8] sm:$0xff]  }
 0xd39   :  { %v1342_v48 = vadd.f32 %v1341_v17, %v993_v6  ;;  %v1385_v49 = vadd.f32 %v1384_v45, %v1001_v7  ;;  %v1343_v50 = vpop.f32.mrb[35].mxu0  ;;  %v1386_v53 = vpop.f32.mrb[35].mxu1  ;;  %2670 = vmatmul.mubr.bf16.vlgmr.msra.gmra.mrb[44].mxu0 %v1593_v25  ;;  %2711 = vmatmul.mubr.bf16.vlgmr.msra.gmra.mrb[44].mxu1 %v1595_v27  ;;  %v1565_v61 = vmax.f32 %v1338_v36, 0.0  ;;  %v1567_v63 = vmax.f32 %v1381_v38, 0.0  ;;  %v7308_v27 = vld [vmem:[%s9328_s10 + $0x158] sm:$0xff]  }
 0xd3a   :  { %v1344_v37 = vadd.f32 %v1343_v50, %v997_v15  ;;  %v1387_v58 = vadd.f32 %v1386_v53, %v1005_v9  ;;  %6735 = vmatpush3.bf16.msra.mxu0 %v7298_v34  ;;  %6757 = vmatpush3.bf16.msra.mxu1 %v7299_v35  ;;  %v1566_v5 = vmax.f32 %v1340_v44, 0.0  ;;  %v1568_v6 = vmax.f32 %v1383_v16, 0.0  ;;  %v7310_v17 = vld [vmem:[%s9328_s10 + $0x118] sm:$0xff]   ;;  %v7312_v53 = vld [vmem:[%s9328_s10 + $0x160] sm:$0xff]  }
 0xd3b   :  { %v1581_v0 = vmax.f32 %v1342_v48, 0.0  ;;  %v1583_v2 = vmax.f32 %v1385_v49, 0.0  ;;  %6736 = vmatprep.subr.bf16.mxu0 %v7300_v41  ;;  %6758 = vmatprep.subr.bf16.mxu1 %v7301_v42  ;;  %v1025_v35 = vrot.slane %v8184_v24, %v8166_v51  ;;  %v1033_v41 = vrot.slane %v8184_v24, %v8169_v52 }
 0xd3c   :  { %v1582_v7 = vmax.f32 %v1344_v37, 0.0  ;;  %v1584_v8 = vmax.f32 %v1387_v58, 0.0  ;;  %v1029_v42 = vrot.slane %v8184_v24, %v8172_v33  ;;  %v1037_v45 = vrot.slane %v8184_v24, %v8175_v56 }
 0xd3d   :  { %v8218_v54 = vpack.c.bf16 %v1581_v0, %v1565_v61  ;;  %v8220_v15 = vpack.c.bf16 %v1583_v2, %v1567_v63 }
 0xd3e   :  { %v1598_v9 = vpack.c.bf16 %v1582_v7, %v1566_v5  ;;  %v1600_v10 = vpack.c.bf16 %v1584_v8, %v1568_v6  ;;  %6737 = vmatpush3.bf16.msra.mxu0 %v7302_v59  ;;  %6759 = vmatpush3.bf16.msra.mxu1 %v7303_v60  ;;  %v1423_v11 = vpop.f32.mrb[36].mxu0  ;;  %v1466_v13 = vpop.f32.mrb[36].mxu1 }
 0xd3f   :  { %v1424_v21 = vadd.f32 %v1423_v11, %v1009_v43  ;;  %v1467_v22 = vadd.f32 %v1466_v13, %v1017_v47  ;;  %v1425_v23 = vpop.f32.mrb[37].mxu0  ;;  %v1468_v25 = vpop.f32.mrb[37].mxu1  ;;  %6738 = vmatprep.subr.bf16.mxu0 %v7304_v3  ;;  %6760 = vmatprep.subr.bf16.mxu1 %v7305_v4  ;;  %v7314_v3 = vld [vmem:[%s9328_s10 + $0x120] sm:$0xff]  }
 0xd40   :  { %v1426_v30 = vadd.f32 %v1425_v23, %v1013_v55  ;;  %v1469_v31 = vadd.f32 %v1468_v25, %v1021_v26  ;;  %v1427_v32 = vpop.f32.mrb[38].mxu0  ;;  %v1470_v34 = vpop.f32.mrb[38].mxu1  ;;  %2751 = vmatprep.mubr.bf16.mxu0 %v1598_v9  ;;  %2792 = vmatprep.mubr.bf16.mxu1 %v1600_v10  ;;  %v7315_v4 = vld [vmem:[%s9328_s10 + $0x1a0] sm:$0xff]   ;;  %v7316_v9 = vld [vmem:[%s9328_s10 + $0x168] sm:$0xff]  }
 0xd41   :  { %v1428_v36 = vadd.f32 %v1427_v32, %v1009_v43  ;;  %v1471_v38 = vadd.f32 %v1470_v34, %v1017_v47  ;;  %v1429_v39 = vpop.f32.mrb[39].mxu0  ;;  %v1472_v40 = vpop.f32.mrb[39].mxu1  ;;  %v7311_v43 = vld [vmem:[%s9328_s10 + $0x198] sm:$0xff]   ;;  %v1569_v47 = vmax.f32 %v1424_v21, 0.0  ;;  %v1571_v48 = vmax.f32 %v1467_v22, 0.0  ;;  %v7317_v10 = vld [vmem:[%s9328_s10 + $0x1e8] sm:$0xff]  }
 0xd42   :  { %v1430_v44 = vadd.f32 %v1429_v39, %v1013_v55  ;;  %v1473_v16 = vadd.f32 %v1472_v40, %v1021_v26  ;;  %6739 = vmatpush3.bf16.msra.mxu0 %v7306_v14  ;;  %6761 = vmatpush3.bf16.msra.mxu1 %v7307_v20  ;;  %v7313_v55 = vld [vmem:[%s9328_s10 + $0x1e0] sm:$0xff]   ;;  %v1570_v37 = vmax.f32 %v1426_v30, 0.0  ;;  %v1572_v58 = vmax.f32 %v1469_v31, 0.0  ;;  %v7318_v30 = vld [vmem:[%s9328_s10 + $0x128] sm:$0xff]   ;;  %v7321_v39 = vld [vmem:[%s9328_s10 + $0x1f0] sm:$0xff]  }
 0xd43   :  { %v1585_v49 = vmax.f32 %v1428_v36, 0.0  ;;  %v1587_v50 = vmax.f32 %v1471_v38, 0.0  ;;  %6740 = vmatprep.subr.bf16.mxu0 %v7308_v27  ;;  %6762 = vmatprep.subr.bf16.mxu1 %v7309_v28  ;;  %v7319_v31 = vld [vmem:[%s9328_s10 + $0x1a8] sm:$0xff]  }
 0xd44   :  { %v1586_v59 = vmax.f32 %v1430_v44, 0.0  ;;  %v1588_v60 = vmax.f32 %v1473_v16, 0.0 }
 0xd45   :  { %v8254_v26 = vpack.c.bf16 %v1585_v49, %v1569_v47  ;;  %v8256_v24 = vpack.c.bf16 %v1587_v50, %v1571_v48  ;;  %v7322_v47 = vld [vmem:[%s9328_s10 + $0x130] sm:$0xff]   ;;  %v7324_v49 = vld [vmem:[%s9328_s10 + $0x178] sm:$0xff]  }
 0xd46   :  { %v8258_v61 = vpack.c.bf16 %v1586_v59, %v1570_v37  ;;  %v8260_v63 = vpack.c.bf16 %v1588_v60, %v1572_v58  ;;  %6741 = vmatpush3.bf16.msra.mxu0 %v7310_v17  ;;  %6763 = vmatpush3.bf16.msra.mxu1 %v7311_v43  ;;  %v1509_v0 = vpop.f32.mrb[40].mxu0  ;;  %v1552_v2 = vpop.f32.mrb[40].mxu1  ;;  %v7323_v48 = vld [vmem:[%s9328_s10 + $0x1b0] sm:$0xff]   ;;  %v7325_v50 = vld [vmem:[%s9328_s10 + $0x1f8] sm:$0xff]   ;;  %v7328_v37 = vld [vmem:[%s9328_s10 + $0x240] sm:$0xff]  }
 0xd47   :  { %v1510_v5 = vadd.f32 %v1509_v0, %v1025_v35  ;;  %v1553_v6 = vadd.f32 %v1552_v2, %v1033_v41  ;;  %v1511_v7 = vpop.f32.mrb[41].mxu0  ;;  %v1554_v8 = vpop.f32.mrb[41].mxu1  ;;  %6742 = vmatprep.subr.bf16.mxu0 %v7312_v53  ;;  %6764 = vmatprep.subr.bf16.mxu1 %v7313_v55  ;;  %v7326_v53 = vld [vmem:[%s9328_s10 + $0x138] sm:$0xff]   ;;  %v7329_v58 = vld [vmem:[%s9328_s10 + $0x2c0] sm:$0xff]   ;;  %v7332_v0 = vld [vmem:[%s9328_s10 + $0x248] sm:$0xff]  }
 0xd48   :  { %v1512_v11 = vadd.f32 %v1511_v7, %v1029_v42  ;;  %v1555_v13 = vadd.f32 %v1554_v8, %v1037_v45  ;;  %v1513_v14 = vpop.f32.mrb[42].mxu0  ;;  %v1556_v20 = vpop.f32.mrb[42].mxu1  ;;  %v7327_v55 = vld [vmem:[%s9328_s10 + $0x1b8] sm:$0xff]   ;;  %v7330_v59 = vld [vmem:[%s9328_s10 + $0x200] sm:$0xff]   ;;  %v7333_v2 = vld [vmem:[%s9328_s10 + $0x2c8] sm:$0xff]  }
 0xd49   :  { %v1514_v21 = vadd.f32 %v1513_v14, %v1025_v35  ;;  %v1557_v22 = vadd.f32 %v1556_v20, %v1033_v41  ;;  %v1515_v23 = vpop.f32.mrb[43].mxu0  ;;  %v1558_v25 = vpop.f32.mrb[43].mxu1  ;;  %v1573_v32 = vmax.f32 %v1510_v5, 0.0  ;;  %v1575_v34 = vmax.f32 %v1553_v6, 0.0  ;;  %v7320_v35 = vld [vmem:[%s9328_s10 + $0x170] sm:$0xff]   ;;  %v7331_v60 = vld [vmem:[%s9328_s10 + $0x280] sm:$0xff]  }
 0xd4a   :  { %v1516_v27 = vadd.f32 %v1515_v23, %v1029_v42  ;;  %v1559_v28 = vadd.f32 %v1558_v25, %v1037_v45  ;;  %6743 = vmatpush3.bf16.msra.mxu0 %v7314_v3  ;;  %6765 = vmatpush3.bf16.msra.mxu1 %v7315_v4  ;;  %v1574_v40 = vmax.f32 %v1512_v11, 0.0  ;;  %v1576_v41 = vmax.f32 %v1555_v13, 0.0  ;;  %v7334_v3 = vld [vmem:[%s9328_s10 + $0x208] sm:$0xff]   ;;  %v7340_v5 = vld [vmem:[%s9328_s10 + $0x258] sm:$0xff]   ;;  %v7346_v11 = vld [vmem:[%s9328_s10 + $0x220] sm:$0xff]  }
 0xd4b   :  { %v1589_v36 = vmax.f32 %v1514_v21, 0.0  ;;  %v1591_v38 = vmax.f32 %v1557_v22, 0.0  ;;  %6744 = vmatprep.subr.bf16.mxu0 %v7316_v9  ;;  %6766 = vmatprep.subr.bf16.mxu1 %v7317_v10  ;;  %v7335_v4 = vld [vmem:[%s9328_s10 + $0x288] sm:$0xff]   ;;  %v7341_v6 = vld [vmem:[%s9328_s10 + $0x2d8] sm:$0xff]   ;;  %v7344_v9 = vld [vmem:[%s9328_s10 + $0x260] sm:$0xff]  }
 0xd4c   :  { %v1590_v42 = vmax.f32 %v1516_v27, 0.0  ;;  %v1592_v44 = vmax.f32 %v1559_v28, 0.0  ;;  %v7342_v7 = vld [vmem:[%s9328_s10 + $0x218] sm:$0xff]   ;;  %v7345_v10 = vld [vmem:[%s9328_s10 + $0x2e0] sm:$0xff]   ;;  %v7348_v14 = vld [vmem:[%s9328_s10 + $0x268] sm:$0xff]  }
 0xd4d   :  { %v8286_v16 = vpack.c.bf16 %v1589_v36, %v1573_v32  ;;  %v8288_v17 = vpack.c.bf16 %v1591_v38, %v1575_v34  ;;  %v7343_v8 = vld [vmem:[%s9328_s10 + $0x298] sm:$0xff]   ;;  %v7347_v13 = vld [vmem:[%s9328_s10 + $0x2a0] sm:$0xff]   ;;  %v7349_v20 = vld [vmem:[%s9328_s10 + $0x2e8] sm:$0xff]  }
 0xd4e   :  { %v8290_v43 = vpack.c.bf16 %v1590_v42, %v1574_v40  ;;  %v8292_v45 = vpack.c.bf16 %v1592_v44, %v1576_v41  ;;  %6745 = vmatpush3.bf16.msra.mxu0 %v7318_v30  ;;  %6767 = vmatpush3.bf16.msra.mxu1 %v7319_v31  ;;  %v7350_v21 = vld [vmem:[%s9328_s10 + $0x228] sm:$0xff]   ;;  %v7352_v23 = vld [vmem:[%s9328_s10 + $0x270] sm:$0xff]   ;;  %v7356_v30 = vld [vmem:[%s9328_s10 + $0x278] sm:$0xff]  }
 0xd4f   :  { %6746 = vmatprep.subr.bf16.mxu0 %v7320_v35  ;;  %6768 = vmatprep.subr.bf16.mxu1 %v7321_v39  ;;  %v7351_v22 = vld [vmem:[%s9328_s10 + $0x2a8] sm:$0xff]   ;;  %v7353_v25 = vld [vmem:[%s9328_s10 + $0x2f0] sm:$0xff]   ;;  %v7357_v31 = vld [vmem:[%s9328_s10 + $0x2f8] sm:$0xff]  }
 0xd50   :  { %v7354_v27 = vld [vmem:[%s9328_s10 + $0x230] sm:$0xff]   ;;  %v7358_v32 = vld [vmem:[%s9328_s10 + $0x238] sm:$0xff]   ;;  %v7360_v36 = vld [vmem:[%s9328_s10 + $0x340] sm:$0xff]  }
 0xd51   :  { %v7355_v28 = vld [vmem:[%s9328_s10 + $0x2b0] sm:$0xff]   ;;  %v7359_v34 = vld [vmem:[%s9328_s10 + $0x2b8] sm:$0xff]   ;;  %v7361_v38 = vld [vmem:[%s9328_s10 + $0x3c0] sm:$0xff]  }
 0xd52   :  { %6747 = vmatpush3.bf16.msra.mxu0 %v7322_v47  ;;  %6769 = vmatpush3.bf16.msra.mxu1 %v7323_v48  ;;  %v7362_v35 = vld [vmem:[%s9328_s10 + $0x300] sm:$0xff]   ;;  %v7364_v40 = vld [vmem:[%s9328_s10 + $0x348] sm:$0xff]   ;;  %v7371_v47 = vld [vmem:[%s9328_s10 + $0x390] sm:$0xff]  }
 0xd53   :  { %6748 = vmatprep.subr.bf16.mxu0 %v7324_v49  ;;  %6770 = vmatprep.subr.bf16.mxu1 %v7325_v50  ;;  %v7363_v39 = vld [vmem:[%s9328_s10 + $0x380] sm:$0xff]   ;;  %v7365_v41 = vld [vmem:[%s9328_s10 + $0x3c8] sm:$0xff]   ;;  %v7373_v48 = vld [vmem:[%s9328_s10 + $0x3d8] sm:$0xff]  }
 0xd54   :  { %v7366_v42 = vld [vmem:[%s9328_s10 + $0x308] sm:$0xff]   ;;  %v7374_v49 = vld [vmem:[%s9328_s10 + $0x318] sm:$0xff]  }
 0xd55   :  { %v7367_v44 = vld [vmem:[%s9328_s10 + $0x388] sm:$0xff]   ;;  %v7375_v50 = vld [vmem:[%s9328_s10 + $0x398] sm:$0xff]  }
 0xd56   :  { %6749 = vmatpush3.bf16.msra.mxu0 %v7326_v53  ;;  %6771 = vmatpush3.bf16.msra.mxu1 %v7327_v55  ;;  %v7376_v53 = vld [vmem:[%s9328_s10 + $0x360] sm:$0xff]  }
 0xd57   :  { %6778 = vmatprep.subr.bf16.mxu0 %v7328_v37  ;;  %6800 = vmatprep.subr.bf16.mxu1 %v7329_v58  ;;  %v7377_v55 = vld [vmem:[%s9328_s10 + $0x3e0] sm:$0xff]  }
 0xd58   :  { %v7378_v37 = vld [vmem:[%s9328_s10 + $0x320] sm:$0xff]  }
 0xd59   :  { %2752 = vmatmul.mubr.bf16.vlgmr.msra.gmra.mrb[48].mxu0 %v8218_v54  ;;  %2793 = vmatmul.mubr.bf16.vlgmr.msra.gmra.mrb[48].mxu1 %v8220_v15  ;;  %v7336_v54 = vld [vmem:[%s9328_s10 + $0x250] sm:$0xff]   ;;  %v7379_v58 = vld [vmem:[%s9328_s10 + $0x3a0] sm:$0xff]  }
 0xd5a   :  { %6779 = vmatpush3.bf16.msra.mxu0 %v7330_v59  ;;  %2833 = vmatprep.mubr.bf16.mxu0 %v8258_v61  ;;  %v7337_v15 = vld [vmem:[%s9328_s10 + $0x2d0] sm:$0xff]   ;;  %v7380_v59 = vld [vmem:[%s9328_s10 + $0x368] sm:$0xff]  }
 0xd5b   :  { %6801 = vmatpush3.bf16.msra.mxu1 %v7331_v60  ;;  %2874 = vmatprep.mubr.bf16.mxu1 %v8260_v63  ;;  %v7338_v61 = vld [vmem:[%s9328_s10 + $0x210] sm:$0xff]   ;;  %v7381_v60 = vld [vmem:[%s9328_s10 + $0x3e8] sm:$0xff]  }
 0xd5c   :  { %6780 = vmatprep.subr.bf16.mxu0 %v7332_v0  ;;  %6802 = vmatprep.subr.bf16.mxu1 %v7333_v2  ;;  %v7339_v63 = vld [vmem:[%s9328_s10 + $0x290] sm:$0xff]   ;;  %v7382_v0 = vld [vmem:[%s9328_s10 + $0x328] sm:$0xff]  }
 0xd5d   :  { %v7383_v2 = vld [vmem:[%s9328_s10 + $0x3a8] sm:$0xff]  }
 0xd5e   :  { %6781 = vmatpush3.bf16.msra.mxu0 %v7334_v3  ;;  %v7384_v3 = vld [vmem:[%s9328_s10 + $0x370] sm:$0xff]  }
 0xd5f   :  { %6803 = vmatpush3.bf16.msra.mxu1 %v7335_v4  ;;  %6782 = vmatprep.subr.bf16.mxu0 %v7336_v54  ;;  %v7385_v4 = vld [vmem:[%s9328_s10 + $0x3f0] sm:$0xff]  }
 0xd60   :  { %6804 = vmatprep.subr.bf16.mxu1 %v7337_v15  ;;  %v7386_v54 = vld [vmem:[%s9328_s10 + $0x330] sm:$0xff]  }
 0xd61   :  { %v7387_v15 = vld [vmem:[%s9328_s10 + $0x3b0] sm:$0xff]  }
 0xd62   :  { %6783 = vmatpush3.bf16.msra.mxu0 %v7338_v61  ;;  %v7388_v61 = vld [vmem:[%s9328_s10 + $0x378] sm:$0xff]  }
 0xd63   :  { %6805 = vmatpush3.bf16.msra.mxu1 %v7339_v63  ;;  %6784 = vmatprep.subr.bf16.mxu0 %v7340_v5  ;;  %v7389_v63 = vld [vmem:[%s9328_s10 + $0x3f8] sm:$0xff]  }
 0xd64   :  { %6806 = vmatprep.subr.bf16.mxu1 %v7341_v6  ;;  %v7390_v5 = vld [vmem:[%s9328_s10 + $0x338] sm:$0xff]  }
 0xd65   :  { %v7391_v6 = vld [vmem:[%s9328_s10 + $0x3b8] sm:$0xff]  }
 0xd66   :  { %6785 = vmatpush3.bf16.msra.mxu0 %v7342_v7 }
 0xd67   :  { %6807 = vmatpush3.bf16.msra.mxu1 %v7343_v8  ;;  %6786 = vmatprep.subr.bf16.mxu0 %v7344_v9  ;;  %v8523_v9 = vld [vmem:[%s9329_s11] sm:$0x3f] }
 0xd68   :  { %6808 = vmatprep.subr.bf16.mxu1 %v7345_v10  ;;  %v1868_v10 = vrot.slane %v8523_v9, %v8159_v46 }
 0xd6a   :  { %6787 = vmatpush3.bf16.msra.mxu0 %v7346_v11 }
 0xd6b   :  { %6809 = vmatpush3.bf16.msra.mxu1 %v7347_v13  ;;  %6788 = vmatprep.subr.bf16.mxu0 %v7348_v14 }
 0xd6c   :  { %6810 = vmatprep.subr.bf16.mxu1 %v7349_v20 }
 0xd6e   :  { %6789 = vmatpush3.bf16.msra.mxu0 %v7350_v21 }
 0xd6f   :  { %6811 = vmatpush3.bf16.msra.mxu1 %v7351_v22  ;;  %6790 = vmatprep.subr.bf16.mxu0 %v7352_v23 }
 0xd70   :  { %6812 = vmatprep.subr.bf16.mxu1 %v7353_v25 }
 0xd72   :  { %6791 = vmatpush3.bf16.msra.mxu0 %v7354_v27 }
 0xd73   :  { %6813 = vmatpush3.bf16.msra.mxu1 %v7355_v28  ;;  %6792 = vmatprep.subr.bf16.mxu0 %v7356_v30 }
 0xd74   :  { %6814 = vmatprep.subr.bf16.mxu1 %v7357_v31 }
 0xd76   :  { %6793 = vmatpush3.bf16.msra.mxu0 %v7358_v32 }
 0xd77   :  { %6815 = vmatpush3.bf16.msra.mxu1 %v7359_v34  ;;  %6822 = vmatprep.subr.bf16.mxu0 %v7360_v36 }
 0xd78   :  { %6844 = vmatprep.subr.bf16.mxu1 %v7361_v38 }
 0xd79   :  { %2834 = vmatmul.mubr.bf16.vlgmr.msra.gmra.mrb[52].mxu0 %v8254_v26  ;;  %v7368_v26 = vld [vmem:[%s9328_s10 + $0x350] sm:$0xff]  }
 0xd7a   :  { %2875 = vmatmul.mubr.bf16.vlgmr.msra.gmra.mrb[52].mxu1 %v8256_v24  ;;  %6823 = vmatpush3.bf16.msra.mxu0 %v7362_v35  ;;  %v7369_v24 = vld [vmem:[%s9328_s10 + $0x3d0] sm:$0xff]  }
 0xd7b   :  { %2915 = vmatprep.mubr.bf16.mxu0 %v8290_v43  ;;  %6845 = vmatpush3.bf16.msra.mxu1 %v7363_v39  ;;  %v7370_v43 = vld [vmem:[%s9328_s10 + $0x310] sm:$0xff]  }
 0xd7c   :  { %2956 = vmatprep.mubr.bf16.mxu1 %v8292_v45  ;;  %6824 = vmatprep.subr.bf16.mxu0 %v7364_v40  ;;  %v7372_v45 = vld [vmem:[%s9328_s10 + $0x358] sm:$0xff]  }
 0xd7d   :  { %6846 = vmatprep.subr.bf16.mxu1 %v7365_v41 }
 0xd7e   :  { %6825 = vmatpush3.bf16.msra.mxu0 %v7366_v42 }
 0xd7f   :  { %6847 = vmatpush3.bf16.msra.mxu1 %v7367_v44  ;;  %6826 = vmatprep.subr.bf16.mxu0 %v7368_v26 }
 0xd80   :  { %6848 = vmatprep.subr.bf16.mxu1 %v7369_v24 }
 0xd82   :  { %6827 = vmatpush3.bf16.msra.mxu0 %v7370_v43 }
 0xd83   :  { %6849 = vmatpush3.bf16.msra.mxu1 %v7371_v47  ;;  %6828 = vmatprep.subr.bf16.mxu0 %v7372_v45 }
 0xd84   :  { %6850 = vmatprep.subr.bf16.mxu1 %v7373_v48 }
 0xd86   :  { %6829 = vmatpush3.bf16.msra.mxu0 %v7374_v49 }
 0xd87   :  { %6851 = vmatpush3.bf16.msra.mxu1 %v7375_v50  ;;  %6830 = vmatprep.subr.bf16.mxu0 %v7376_v53 }
 0xd88   :  { %6852 = vmatprep.subr.bf16.mxu1 %v7377_v55 }
 0xd8a   :  { %6831 = vmatpush3.bf16.msra.mxu0 %v7378_v37 }
 0xd8b   :  { %6853 = vmatpush3.bf16.msra.mxu1 %v7379_v58  ;;  %6832 = vmatprep.subr.bf16.mxu0 %v7380_v59 }
 0xd8c   :  { %6854 = vmatprep.subr.bf16.mxu1 %v7381_v60 }
 0xd8e   :  { %6833 = vmatpush3.bf16.msra.mxu0 %v7382_v0 }
 0xd8f   :  { %6855 = vmatpush3.bf16.msra.mxu1 %v7383_v2  ;;  %6834 = vmatprep.subr.bf16.mxu0 %v7384_v3 }
 0xd90   :  { %6856 = vmatprep.subr.bf16.mxu1 %v7385_v4 }
 0xd92   :  { %6835 = vmatpush3.bf16.msra.mxu0 %v7386_v54 }
 0xd93   :  { %6857 = vmatpush3.bf16.msra.mxu1 %v7387_v15  ;;  %6836 = vmatprep.subr.bf16.mxu0 %v7388_v61 }
 0xd94   :  { %6858 = vmatprep.subr.bf16.mxu1 %v7389_v63 }
 0xd96   :  { %6837 = vmatpush3.bf16.msra.mxu0 %v7390_v5 }
 0xd97   :  { %6859 = vmatpush3.bf16.msra.mxu1 %v7391_v6  ;;  %7158 = vmatprep.subr.bf16.mxu0 %v7632_v1 }
 0xd98   :  { %7166 = vmatprep.subr.bf16.mxu1 %v7632_v1 }
 0xd99   :  { %2916 = vmatmul.mubr.bf16.vlgmr.msra.gmra.mrb[56].mxu0 %v8286_v16 }
 0xd9a   :  { %2957 = vmatmul.mubr.bf16.vlgmr.msra.gmra.mrb[56].mxu1 %v8288_v17  ;;  %7162 = vmatprep.mubr.msk.bf16.mxu0 %vm7633_vm1, %v7632_v1 }
 0xd9b   :  { %7168 = vmatprep.mubr.msk.bf16.mxu1 %vm7633_vm1, %v7632_v1 }
 0xe0c   :  { %v6706_v7 = vpop.f32.mrb[44].mxu0  ;;  %v6728_v8 = vpop.f32.mrb[44].mxu1 }
 0xe0d   :  { %v6707_v11 = vpop.f32.mrb[45].mxu0  ;;  %v6729_v16 = vpop.f32.mrb[45].mxu1 }
 0xe0e   :  { %v6708_v13 = vadd.f32 %v6707_v11, %v6706_v7  ;;  %v6730_v17 = vadd.f32 %v6729_v16, %v6728_v8  ;;  %v6709_v14 = vpop.f32.mrb[46].mxu0  ;;  %v6731_v20 = vpop.f32.mrb[46].mxu1 }
 0xe0f   :  { %v6710_v21 = vpop.f32.mrb[47].mxu0  ;;  %v6732_v22 = vpop.f32.mrb[47].mxu1 }
 0xe10   :  { %v2672_v23 = vadd.f32 %v6708_v13, %v1868_v10  ;;  %v6711_v25 = vadd.f32 %v6710_v21, %v6709_v14  ;;  %v6733_v27 = vadd.f32 %v6732_v22, %v6731_v20 }
 0xe12   :  { %v2713_v28 = vadd.f32 %v6730_v17, %v2672_v23  ;;  %v2675_v30 = vadd.f32 %v6711_v25, %v1868_v10 }
 0xe14   :  { %v2716_v31 = vadd.f32 %v6733_v27, %v2675_v30 }
 0xe2c   :  { %v6750_v32 = vpop.f32.mrb[48].mxu0  ;;  %v6772_v34 = vpop.f32.mrb[48].mxu1 }
 0xe2d   :  { %v6751_v36 = vpop.f32.mrb[49].mxu0  ;;  %v6773_v38 = vpop.f32.mrb[49].mxu1 }
 0xe2e   :  { %v6752_v35 = vadd.f32 %v6751_v36, %v6750_v32  ;;  %v6774_v39 = vadd.f32 %v6773_v38, %v6772_v34  ;;  %v6753_v40 = vpop.f32.mrb[50].mxu0  ;;  %v6775_v41 = vpop.f32.mrb[50].mxu1 }
 0xe2f   :  { %v6754_v42 = vpop.f32.mrb[51].mxu0  ;;  %v6776_v44 = vpop.f32.mrb[51].mxu1 }
 0xe30   :  { %v2754_v26 = vadd.f32 %v6752_v35, %v2713_v28  ;;  %v6755_v24 = vadd.f32 %v6754_v42, %v6753_v40  ;;  %v6777_v43 = vadd.f32 %v6776_v44, %v6775_v41 }
 0xe32   :  { %v2795_v47 = vadd.f32 %v6774_v39, %v2754_v26  ;;  %v2757_v45 = vadd.f32 %v6755_v24, %v2716_v31  ;;  %v7393_v26 = vld [vmem:[%s9323_s5 + $0x18] sm:$0xff]  }
 0xe34   :  { %v2798_v48 = vadd.f32 %v6777_v43, %v2757_v45 }
 0xe4c   :  { %v6794_v49 = vpop.f32.mrb[52].mxu0 }
 0xe4d   :  { %v6816_v50 = vpop.f32.mrb[52].mxu1  ;;  %v6795_v53 = vpop.f32.mrb[53].mxu0 }
 0xe4e   :  { %v6796_v55 = vadd.f32 %v6795_v53, %v6794_v49  ;;  %v6817_v37 = vpop.f32.mrb[53].mxu1  ;;  %v6797_v58 = vpop.f32.mrb[54].mxu0  ;;  %v2996_v53 = vrot.slane %v8523_v9, %v8166_v51 }
 0xe4f   :  { %v6818_v59 = vadd.f32 %v6817_v37, %v6816_v50  ;;  %v6819_v60 = vpop.f32.mrb[54].mxu1  ;;  %v6798_v0 = vpop.f32.mrb[55].mxu0 }
 0xe50   :  { %v2836_v2 = vadd.f32 %v6796_v55, %v2795_v47  ;;  %v6799_v3 = vadd.f32 %v6798_v0, %v6797_v58  ;;  %v6820_v4 = vpop.f32.mrb[55].mxu1 }
 0xe51   :  { %v6821_v54 = vadd.f32 %v6820_v4, %v6819_v60  ;;  %v3002_v60 = vrot.slane %v8523_v9, %v8172_v33 }
 0xe52   :  { %v2877_v15 = vadd.f32 %v6818_v59, %v2836_v2  ;;  %v2839_v61 = vadd.f32 %v6799_v3, %v2798_v48 }
 0xe54   :  { %v2880_v63 = vadd.f32 %v6821_v54, %v2839_v61  ;;  %v6183_v54 = vld [vmem:[%s9324_s6 + $0x1] ss:$0 sm:$0xff] }
 0xe6c   :  { %v6838_v5 = vpop.f32.mrb[56].mxu0 }
 0xe6d   :  { %v6860_v6 = vpop.f32.mrb[56].mxu1  ;;  %v6839_v7 = vpop.f32.mrb[57].mxu0 }
 0xe6e   :  { %v6840_v8 = vadd.f32 %v6839_v7, %v6838_v5  ;;  %v6861_v10 = vpop.f32.mrb[57].mxu1  ;;  %v6841_v11 = vpop.f32.mrb[58].mxu0 }
 0xe6f   :  { %v6862_v16 = vadd.f32 %v6861_v10, %v6860_v6  ;;  %v6863_v13 = vpop.f32.mrb[58].mxu1  ;;  %v6842_v17 = vpop.f32.mrb[59].mxu0 }
 0xe70   :  { %v2918_v14 = vadd.f32 %v6840_v8, %v2877_v15  ;;  %v6843_v20 = vadd.f32 %v6842_v17, %v6841_v11  ;;  %v6864_v21 = vpop.f32.mrb[59].mxu1 }
 0xe71   :  { %v6865_v22 = vadd.f32 %v6864_v21, %v6863_v13 }
 0xe72   :  { %v2959_v23 = vadd.f32 %v6862_v16, %v2918_v14  ;;  %v2921_v25 = vadd.f32 %v6843_v20, %v2880_v63 }
 0xe74   :  { %v2962_v27 = vadd.f32 %v6865_v22, %v2921_v25  ;;  %v2965_v28 = vadd.f32 %v2959_v23, %v7975_v19  ;;  %v8579_v25 = vld [vmem:[%s9320_s2] sm:$0xff] }
 0xe76   :  { %v2967_v30 = vsel %vm147_vm2, %v2965_v28, 0.0  ;;  %v2966_v31 = vadd.f32 %v2962_v27, %v7977_v29  ;;  %v7392_v29 = vld [vmem:[%s9323_s5 + $0x10] sm:$0xff]  }
 0xe77   :  { %2968 = vadd.xlane.f32.xlu1 %v2967_v30  ;;  %7159 = vmatpush3.bf16.msra.mxu0 %v7392_v29  ;;  %v8586_v30 = vld [vmem:[%s9320_s2 + $0x8] sm:$0xff] }
 0xe78   :  { %v2970_v32 = vsel %vm147_vm2, %v2966_v31, 0.0  ;;  %7160 = vmatprep.subr.bf16.mxu0 %v7632_v1 }
 0xe79   :  { %2971 = vadd.xlane.f32.xlu0 %v2970_v32 }
 0xe7b   :  { %7161 = vmatpush3.bf16.msra.mxu0 %v7393_v26 }
 0xe7c   :  { %7172 = vmatprep.subr.bf16.mxu0 %v7632_v1 }
 0xf04   :  { %v2969_v34 = vpop.xlane.xlu1 %2968 }
 0xf05   :  { %v2973_v36 = vmul.f32 0.03125, %v2969_v34 }
 0xf06   :  { %v2972_v38 = vpop.xlane.xlu0 %2971 }
 0xf07   :  { %v2975_v35 = vsub.f32 %v2965_v28, %v2973_v36  ;;  %v2974_v39 = vmul.f32 0.03125, %v2972_v38 }
 0xf09   :  { %v2976_v40 = vsub.f32 %v2966_v31, %v2974_v39  ;;  %v2977_v41 = vmul.f32 %v2975_v35, %v2975_v35 }
 0xf0b   :  { %v2979_v42 = vsel %vm147_vm2, %v2977_v41, 0.0  ;;  %v2978_v44 = vmul.f32 %v2976_v40, %v2976_v40 }
 0xf0c   :  { %2980 = vadd.xlane.f32.xlu0 %v2979_v42 }
 0xf0d   :  { %v2982_v19 = vsel %vm147_vm2, %v2978_v44, 0.0 }
 0xf10   :  { %2983 = vadd.xlane.f32.xlu0 %v2982_v19 }
 0xf99   :  { %v2981_v24 = vpop.xlane.xlu0 %2980 }
 0xf9a   :  { %v2985_v43 = vmul.f32 0.03125, %v2981_v24 }
 0xf9c   :  { %v2987_v47 = vadd.f32 1e-05, %v2985_v43 }
 0xf9d   :  { %v2984_v45 = vpop.xlane.xlu0 %2983 }
 0xf9e   :  { %7560 = vrsqrt.f32 %v2987_v47  ;;  %v2986_v48 = vmul.f32 0.03125, %v2984_v45 }
 0xfa0   :  { %v2988_v49 = vadd.f32 1e-05, %v2986_v48 }
 0xfa2   :  { %7562 = vrsqrt.f32 %v2988_v49 }
 0xfa8   :  { %v7561_v50 = vpop.eup %7560 }
 0xfa9   :  { %v2991_v55 = vmul.f32 %v7561_v50, %v2975_v35 }
 0xfab   :  { %v2997_v58 = vmul.f32 %v2996_v53, %v2991_v55 }
 0xfac   :  { %v7563_v37 = vpop.eup %7562 }
 0xfad   :  { %v2992_v59 = vmul.f32 %v7563_v37, %v2976_v40  ;;  %v8545_v2 = vadd.f32 %v3002_v60, %v2997_v58 }
 0xfaf   :  { %v2998_v0 = vmul.f32 %v2996_v53, %v2992_v59 }
 0xfb1   :  { %v8547_v3 = vadd.f32 %v3002_v60, %v2998_v0 }
 0xfb3   :  { %v3012_v4 = vpack.c.bf16 %v8547_v3, %v8545_v2 }
 0xfb5   :  { %7163 = vmatmul.mubr.msk.bf16.vlgmr.msra.gmra.mrb[60].mxu0 %vm147_vm2, %v3012_v4 }
 0xfb6   :  { %7174 = vmatprep.mubr.msk.bf16.mxu0 %vm7633_vm1, %v7632_v1 }
0x1088   :  { %v3075_v15 = vpop.f32.mrb[60].mxu0 }
0x1089   :  { %v7164_v61 = vpop.f32.mrb[61].mxu0  ;;  %v3076_v63 = vadd.f32 %v6183_v54, %v3075_v15 }
0x108a   :  { %v3078_v9 = vpop.f32.mrb[62].mxu0 }
0x108b   :  { %v3079_v5 = vadd.f32 %v6183_v54, %v3078_v9  ;;  %v7165_v6 = vpop.f32.mrb[63].mxu0 }
0x108d   :  { %v8557_v7 = vpack.c.bf16 %v3079_v5, %v3076_v63 }
0x108f   :  { %3208 = vrot.lane.b32.xlu1 %v8557_v7, %s7634_s1  ;;  %3084 = vrot.lane.b32.xlu0 %v8557_v7, %s7635_s28 }
0x1093   :  { %3210 = vrot.lane.b32.xlu0 %v8557_v7, %s7636_s29 }
0x1101   :  { %v3085_v8 = vpop.permute.xlu0 %3084  ;;  %v3209_v13 = vpop.permute.xlu1 %3208 }
0x1102   :  { %v3090_v10 = vsel %vm196_vm3, %v3085_v8, 0 }
0x1103   :  { %7167 = vmatpush3.bf16.xpose.msra.mxu1 %v3090_v10 }
0x1104   :  { %7178 = vmatprep.subr.bf16.mxu1 %v7632_v1 }
0x1105   :  { %v3211_v11 = vpop.permute.xlu0 %3210 }
0x1106   :  { %v3216_v16 = vsel %vm196_vm3, %v3211_v11, 0 }
0x110a   :  { %7169 = vmatmul.mubr.msk.bf16.vlgmr.msra.gmra.mrb[60].mxu1 %vm196_vm3, %v8557_v7 }
0x110b   :  { %7179 = vmatpush3.bf16.xpose.msra.mxu1 %v3216_v16  ;;  %7180 = vmatprep.mubr.msk.bf16.mxu1 %vm7633_vm1, %v7632_v1 }
0x110c   :  { %7190 = vmatprep.subr.bf16.mxu1 %v7632_v1 }
0x1112   :  { %7181 = vmatmul.mubr.msk.bf16.vlgmr.msra.gmra.mrb[64].mxu1 %vm196_vm3, %v3209_v13 }
0x1113   :  { %7192 = vmatprep.mubr.msk.bf16.mxu1 %vm7633_vm1, %v7632_v1 }
0x11dd   :  { %v3126_v17 = vpop.f32.mrb[60].mxu1 }
0x11de   :  { %v3133_v14 = vmul.f32 0.35355338, %v3126_v17  ;;  %v7170_v20 = vpop.f32.mrb[61].mxu1 }
0x11df   :  { %v3129_v21 = vpop.f32.mrb[62].mxu1 }
0x11e0   :  { %v3134_v22 = vmul.f32 0.35355338, %v3129_v21  ;;  %v7171_v23 = vpop.f32.mrb[63].mxu1  ;;  %v3135_v27 = vadd.f32 %v8579_v25, %v3133_v14 }
0x11e2   :  { %v3137_v28 = vsel %vm69_vm0, %v3135_v27, -inf  ;;  %v3136_v31 = vadd.f32 %v8586_v30, %v3134_v22 }
0x11e3   :  { %3138 = vmax.xlane.f32.xlu0 %v3137_v28  ;;  %v6174_v28 = vld [vmem:[%s9325_s7 + $0x10] sm:$0xf] }
0x11e4   :  { %v3140_v32 = vsel %vm69_vm0, %v3136_v31, -inf }
0x11e5   :  { %3141 = vmax.xlane.f32.xlu1 %v3140_v32  ;;  %v3252_v34 = vpop.f32.mrb[64].mxu1  ;;  %v6175_v32 = vld [vmem:[%s9325_s7 + $0x14] sm:$0xf] }
0x11e6   :  { %v3259_v36 = vmul.f32 0.35355338, %v3252_v34  ;;  %v7182_v38 = vpop.f32.mrb[65].mxu1  ;;  %v3338_v34 = vsel %vm448_vm4, %v6175_v32, 0 }
0x11e7   :  { %v3255_v35 = vpop.f32.mrb[66].mxu1  ;;  %7191 = vmatpush3.bf16.msra.mxu1 %v3338_v34 }
0x11e8   :  { %v3260_v39 = vmul.f32 0.35355338, %v3255_v35  ;;  %v7183_v40 = vpop.f32.mrb[67].mxu1  ;;  %v3261_v41 = vadd.f32 %v8579_v25, %v3259_v36  ;;  %7202 = vmatprep.subr.bf16.mxu1 %v7632_v1 }
0x11ea   :  { %v3263_v42 = vsel %vm69_vm0, %v3261_v41, -inf  ;;  %v3262_v44 = vadd.f32 %v8586_v30, %v3260_v39 }
0x11eb   :  { %3264 = vmax.xlane.f32.xlu0 %v3263_v42 }
0x11ec   :  { %v3266_v19 = vsel %vm69_vm0, %v3262_v44, -inf }
0x11ef   :  { %3267 = vmax.xlane.f32.xlu0 %v3266_v19 }
0x1270   :  { %v3139_v29 = vpop.xlane.xlu0 %3138 }
0x1271   :  { %v3143_v26 = vsub.f32 %v3135_v27, %v3139_v29 }
0x1272   :  { %v3142_v24 = vpop.xlane.xlu1 %3141 }
0x1273   :  { %v3145_v43 = vmul.f32 1.442695, %v3143_v26  ;;  %v3144_v47 = vsub.f32 %v3136_v31, %v3142_v24  ;;  %v3385_v31 = vsel %vm448_vm4, %v6174_v28, 0 }
0x1275   :  { %7564 = vpow2.f32 %v3145_v43  ;;  %v3147_v45 = vmul.f32 1.442695, %v3144_v47 }
0x1277   :  { %7566 = vpow2.f32 %v3147_v45 }
0x1278   :  { %v3265_v48 = vpop.xlane.xlu0 %3264 }
0x1279   :  { %v3269_v49 = vsub.f32 %v3261_v41, %v3265_v48 }
0x127b   :  { %v3271_v50 = vmul.f32 1.442695, %v3269_v49 }
0x127c   :  { %v3268_v53 = vpop.xlane.xlu0 %3267 }
0x127d   :  { %7568 = vpow2.f32 %v3271_v50  ;;  %v3270_v55 = vsub.f32 %v3262_v44, %v3268_v53 }
0x127f   :  { %v7565_v37 = vpop.eup %7564  ;;  %v3273_v58 = vmul.f32 1.442695, %v3270_v55 }
0x1280   :  { %v3149_v59 = vsel %vm69_vm0, %v7565_v37, 0.0 }
0x1281   :  { %v7567_v60 = vpop.eup %7566  ;;  %7570 = vpow2.f32 %v3273_v58  ;;  %3150 = vadd.xlane.f32.xlu0 %v3149_v59 }
0x1282   :  { %v3152_v0 = vsel %vm69_vm0, %v7567_v60, 0.0 }
0x1285   :  { %3153 = vadd.xlane.f32.xlu0 %v3152_v0 }
0x1287   :  { %v7569_v4 = vpop.eup %7568 }
0x1288   :  { %v3275_v54 = vsel %vm69_vm0, %v7569_v4, 0.0 }
0x1289   :  { %3276 = vadd.xlane.f32.xlu0 %v3275_v54 }
0x128b   :  { %v7571_v15 = vpop.eup %7570 }
0x128c   :  { %v3278_v61 = vsel %vm69_vm0, %v7571_v15, 0.0 }
0x128d   :  { %3279 = vadd.xlane.f32.xlu1 %v3278_v61 }
0x129e   :  { %3286 = vrot.lane.b32.xlu1 %v8557_v7, %s7637_s18 }
0x129f   :  { %3160 = vrot.lane.b32.xlu0 %v8557_v7, %s7638_s0 }
0x12a2   :  { %3430 = vrot.lane.b32.xlu1 %v8557_v7, %s7639_s3 }
0x12a3   :  { %3428 = vrot.lane.b32.xlu0 %v8557_v7, %s7640_s19 }
0x130e   :  { %v3151_v9 = vpop.xlane.xlu0 %3150 }
0x130f   :  { %7572 = vrcp.f32 %v3151_v9 }
0x1312   :  { %v3154_v63 = vpop.xlane.xlu0 %3153 }
0x1313   :  { %7574 = vrcp.f32 %v3154_v63 }
0x1316   :  { %v3277_v5 = vpop.xlane.xlu0 %3276 }
0x1317   :  { %7576 = vrcp.f32 %v3277_v5 }
0x1319   :  { %v7573_v10 = vpop.eup %7572 }
0x131a   :  { %v3280_v6 = vpop.xlane.xlu1 %3279  ;;  %v3161_v8 = vpop.permute.xlu0 %3160  ;;  %v3156_v16 = vmul.f32 %v7573_v10, %v7565_v37 }
0x131b   :  { %7578 = vrcp.f32 %v3280_v6  ;;  %7173 = vmatpush3.bf16.msra.mxu0 %v3161_v8 }
0x131c   :  { %7184 = vmatprep.subr.bf16.mxu0 %v7632_v1 }
0x131d   :  { %v7575_v11 = vpop.eup %7574 }
0x131e   :  { %v3158_v13 = vmul.f32 %v7575_v11, %v7567_v60  ;;  %v3287_v14 = vpop.permute.xlu1 %3286  ;;  %v3429_v43 = vpop.permute.xlu0 %3428 }
0x1320   :  { %v3159_v17 = vpack.c.bf16 %v3158_v13, %v3156_v16 }
0x1321   :  { %v7577_v20 = vpop.eup %7576 }
0x1322   :  { %7175 = vmatmul.mubr.msk.bf16.vlgmr.msra.gmra.mrb[64].mxu0 %vm69_vm0, %v3159_v17  ;;  %v3282_v22 = vmul.f32 %v7577_v20, %v7569_v4  ;;  %v3431_v44 = vpop.permute.xlu1 %3430 }
0x1323   :  { %7185 = vmatpush3.bf16.msra.mxu0 %v3287_v14  ;;  %7186 = vmatprep.mubr.msk.bf16.mxu0 %vm7633_vm1, %v7632_v1  ;;  %v3436_v24 = vsel %vm196_vm3, %v3431_v44, 0 }
0x1324   :  { %7196 = vmatprep.subr.bf16.mxu0 %v7632_v1 }
0x1325   :  { %v7579_v21 = vpop.eup %7578 }
0x1326   :  { %v3284_v23 = vmul.f32 %v7579_v21, %v7571_v15 }
0x1328   :  { %v3285_v27 = vpack.c.bf16 %v3284_v23, %v3282_v22 }
0x132a   :  { %7187 = vmatmul.mubr.msk.bf16.vlgmr.msra.gmra.mrb[68].mxu0 %vm69_vm0, %v3285_v27 }
0x132b   :  { %7198 = vmatprep.mubr.msk.bf16.mxu0 %vm7633_vm1, %v7632_v1  ;;  %7197 = vmatpush3.bf16.msra.mxu0 %v3385_v31 }
0x132c   :  { %7208 = vmatprep.subr.bf16.mxu0 %v7632_v1 }
0x13f5   :  { %v3200_v36 = vpop.f32.mrb[64].mxu0 }
0x13f6   :  { %v7176_v38 = vpop.f32.mrb[65].mxu0 }
0x13f7   :  { %v3203_v35 = vpop.f32.mrb[66].mxu0 }
0x13f8   :  { %v3207_v39 = vpack.c.bf16 %v3203_v35, %v3200_v36  ;;  %v7177_v40 = vpop.f32.mrb[67].mxu0 }
0x13fa   :  { %7199 = vmatmul.mubr.msk.bf16.vlgmr.msra.gmra.mrb[72].mxu0 %vm196_vm3, %v3207_v39 }
0x13fb   :  { %7210 = vmatprep.mubr.msk.bf16.mxu0 %vm7633_vm1, %v7632_v1 }
0x13fd   :  { %v3326_v41 = vpop.f32.mrb[68].mxu0 }
0x13fe   :  { %v7188_v42 = vpop.f32.mrb[69].mxu0 }
0x13ff   :  { %v3329_v19 = vpop.f32.mrb[70].mxu0 }
0x1400   :  { %v3333_v29 = vpack.c.bf16 %v3329_v19, %v3326_v41  ;;  %v7189_v26 = vpop.f32.mrb[71].mxu0  ;;  %v6176_v41 = vld [vmem:[%s9325_s7 + $0x18] sm:$0xf] }
0x1401   :  { %v3558_v42 = vsel %vm448_vm4, %v6176_v41, 0 }
0x1402   :  { %7193 = vmatmul.mubr.msk.bf16.vlgmr.msra.gmra.mrb[68].mxu1 %vm196_vm3, %v3333_v29 }
0x1403   :  { %7203 = vmatpush3.bf16.xpose.msra.mxu1 %v3436_v24  ;;  %7204 = vmatprep.mubr.msk.bf16.mxu1 %vm7633_vm1, %v7632_v1 }
0x1404   :  { %7214 = vmatprep.subr.bf16.mxu1 %v7632_v1 }
0x140a   :  { %7205 = vmatmul.mubr.msk.bf16.vlgmr.msra.gmra.mrb[72].mxu1 %vm196_vm3, %v3429_v43 }
0x140b   :  { %7216 = vmatprep.mubr.msk.bf16.mxu1 %vm7633_vm1, %v7632_v1  ;;  %7215 = vmatpush3.bf16.msra.mxu1 %v3558_v42 }
0x140c   :  { %7226 = vmatprep.subr.bf16.mxu1 %v7632_v1 }
0x14cd   :  { %v3421_v47 = vpop.f32.mrb[72].mxu0 }
0x14ce   :  { %v7200_v45 = vpop.f32.mrb[73].mxu0 }
0x14cf   :  { %v3424_v48 = vpop.f32.mrb[74].mxu0 }
0x14d0   :  { %v7201_v49 = vpop.f32.mrb[75].mxu0 }
0x14d5   :  { %v3374_v50 = vpop.f32.mrb[68].mxu1 }
0x14d6   :  { %v8635_v53 = vadd.f32 %v3421_v47, %v3374_v50  ;;  %v7194_v55 = vpop.f32.mrb[69].mxu1 }
0x14d7   :  { %v3377_v37 = vpop.f32.mrb[70].mxu1 }
0x14d8   :  { %v8637_v58 = vadd.f32 %v3424_v48, %v3377_v37  ;;  %v7195_v59 = vpop.f32.mrb[71].mxu1 }
0x14dd   :  { %v3472_v60 = vpop.f32.mrb[72].mxu1 }
0x14de   :  { %v3479_v0 = vmul.f32 0.35355338, %v3472_v60  ;;  %v7206_v4 = vpop.f32.mrb[73].mxu1 }
0x14df   :  { %v3475_v54 = vpop.f32.mrb[74].mxu1 }
0x14e0   :  { %v3480_v15 = vmul.f32 0.35355338, %v3475_v54  ;;  %v7207_v61 = vpop.f32.mrb[75].mxu1  ;;  %v3481_v9 = vadd.f32 %v8579_v25, %v3479_v0 }
0x14e2   :  { %v3483_v63 = vsel %vm69_vm0, %v3481_v9, -inf  ;;  %v3482_v5 = vadd.f32 %v8586_v30, %v3480_v15 }
0x14e3   :  { %3484 = vmax.xlane.f32.xlu1 %v3483_v63 }
0x14e4   :  { %v3486_v6 = vsel %vm69_vm0, %v3482_v5, -inf }
0x14e5   :  { %3487 = vmax.xlane.f32.xlu0 %v3486_v6 }
0x1570   :  { %v3485_v8 = vpop.xlane.xlu1 %3484 }
0x1571   :  { %v3489_v10 = vsub.f32 %v3481_v9, %v3485_v8 }
0x1572   :  { %v3488_v11 = vpop.xlane.xlu0 %3487 }
0x1573   :  { %v3491_v16 = vmul.f32 1.442695, %v3489_v10  ;;  %v3490_v13 = vsub.f32 %v3482_v5, %v3488_v11 }
0x1575   :  { %7580 = vpow2.f32 %v3491_v16  ;;  %v3493_v17 = vmul.f32 1.442695, %v3490_v13 }
0x1577   :  { %7582 = vpow2.f32 %v3493_v17 }
0x157f   :  { %v7581_v14 = vpop.eup %7580 }
0x1580   :  { %v3495_v20 = vsel %vm69_vm0, %v7581_v14, 0.0 }
0x1581   :  { %v7583_v21 = vpop.eup %7582  ;;  %3496 = vadd.xlane.f32.xlu0 %v3495_v20 }
0x1582   :  { %v3498_v22 = vsel %vm69_vm0, %v7583_v21, 0.0 }
0x1583   :  { %3499 = vadd.xlane.f32.xlu1 %v3498_v22 }
0x1594   :  { %3605 = vrot.lane.b32.xlu1 %v8557_v7, %s7641_s24 }
0x1597   :  { %3506 = vrot.lane.b32.xlu0 %v8557_v7, %s7642_s25  ;;  %s9334_s25 = smov 40  }
0x1598   :  { %3603 = vrot.lane.b32.xlu1 %v8557_v7, %s7643_s26 }
0x160e   :  { %v3497_v23 = vpop.xlane.xlu0 %3496 }
0x160f   :  { %7584 = vrcp.f32 %v3497_v23 }
0x1610   :  { %v3500_v27 = vpop.xlane.xlu1 %3499 }
0x1611   :  { %7586 = vrcp.f32 %v3500_v27 }
0x1612   :  { %v3507_v28 = vpop.permute.xlu0 %3506 }
0x1613   :  { %7209 = vmatpush3.bf16.msra.mxu0 %v3507_v28 }
0x1614   :  { %7220 = vmatprep.subr.bf16.mxu0 %v7632_v1  ;;  %v3606_v38 = vpop.permute.xlu1 %3605 }
0x1615   :  { %v3611_v39 = vsel %vm196_vm3, %v3606_v38, 0  ;;  %v8689_v38 = vld [vmem:[%s9329_s11 + $0x8] sm:$0x3f] }
0x1618   :  { %v3604_v40 = vpop.permute.xlu1 %3603 }
0x1619   :  { %v7585_v31 = vpop.eup %7584 }
0x161a   :  { %v3502_v34 = vmul.f32 %v7585_v31, %v7581_v14 }
0x161b   :  { %v7587_v32 = vpop.eup %7586 }
0x161c   :  { %v3504_v36 = vmul.f32 %v7587_v32, %v7583_v21 }
0x161e   :  { %v3505_v35 = vpack.c.bf16 %v3504_v36, %v3502_v34 }
0x1620   :  { %7211 = vmatmul.mubr.msk.bf16.vlgmr.msra.gmra.mrb[76].mxu0 %vm69_vm0, %v3505_v35  ;;  %v3781_v35 = vrot.slane %v8689_v38, %v7900_v18 }
0x1621   :  { %7221 = vmatpush3.bf16.xpose.msra.mxu0 %v3611_v39  ;;  %7222 = vmatprep.mubr.msk.bf16.mxu0 %vm7633_vm1, %v7632_v1 }
0x1622   :  { %7232 = vmatprep.subr.bf16.mxu0 %v7632_v1 }
0x1628   :  { %7223 = vmatmul.mubr.msk.bf16.vlgmr.msra.gmra.mrb[80].mxu0 %vm196_vm3, %v3604_v40 }
0x1629   :  { %7234 = vmatprep.mubr.msk.bf16.mxu0 %vm7633_vm1, %v7632_v1 }
0x16f3   :  { %v3546_v44 = vpop.f32.mrb[76].mxu0 }
0x16f4   :  { %v7212_v19 = vpop.f32.mrb[77].mxu0 }
0x16f5   :  { %v3549_v29 = vpop.f32.mrb[78].mxu0 }
0x16f6   :  { %v3553_v26 = vpack.c.bf16 %v3549_v29, %v3546_v44  ;;  %v7213_v24 = vpop.f32.mrb[79].mxu0 }
0x16f8   :  { %7217 = vmatmul.mubr.msk.bf16.vlgmr.msra.gmra.mrb[76].mxu1 %vm196_vm3, %v3553_v26 }
0x16f9   :  { %7228 = vmatprep.mubr.msk.bf16.mxu1 %vm7633_vm1, %v7632_v1 }
0x16fb   :  { %v3647_v43 = vpop.f32.mrb[80].mxu0 }
0x16fc   :  { %v3654_v47 = vmul.f32 0.35355338, %v3647_v43  ;;  %v7224_v45 = vpop.f32.mrb[81].mxu0 }
0x16fd   :  { %v3650_v48 = vpop.f32.mrb[82].mxu0 }
0x16fe   :  { %v3655_v49 = vmul.f32 0.35355338, %v3650_v48  ;;  %v7225_v50 = vpop.f32.mrb[83].mxu0  ;;  %v3656_v55 = vadd.f32 %v8579_v25, %v3654_v47 }
0x1700   :  { %v3658_v37 = vsel %vm69_vm0, %v3656_v55, -inf  ;;  %v3657_v59 = vadd.f32 %v8586_v30, %v3655_v49 }
0x1701   :  { %3659 = vmax.xlane.f32.xlu0 %v3658_v37 }
0x1702   :  { %v3661_v60 = vsel %vm69_vm0, %v3657_v59, -inf }
0x1703   :  { %3662 = vmax.xlane.f32.xlu1 %v3661_v60 }
0x1714   :  { %3681 = vrot.lane.b32.xlu1 %v8557_v7, %s9334_s25 }
0x178e   :  { %v3660_v0 = vpop.xlane.xlu0 %3659 }
0x178f   :  { %v3664_v4 = vsub.f32 %v3656_v55, %v3660_v0 }
0x1790   :  { %v3663_v54 = vpop.xlane.xlu1 %3662 }
0x1791   :  { %v3666_v15 = vmul.f32 1.442695, %v3664_v4  ;;  %v3665_v61 = vsub.f32 %v3657_v59, %v3663_v54  ;;  %v6207_v54 = vld [vmem:[%s9326_s8 + $0x140] sm:$0xff] }
0x1793   :  { %7588 = vpow2.f32 %v3666_v15  ;;  %v3668_v9 = vmul.f32 1.442695, %v3665_v61  ;;  %v6200_v15 = vld [vmem:[%s9326_s8 + $0x108] sm:$0xff] }
0x1794   :  { %v3682_v63 = vpop.permute.xlu1 %3681 }
0x1795   :  { %7590 = vpow2.f32 %v3668_v9  ;;  %7227 = vmatpush3.bf16.msra.mxu1 %v3682_v63  ;;  %v6208_v9 = vld [vmem:[%s9326_s8 + $0x148] sm:$0xff] }
0x179d   :  { %v7589_v25 = vpop.eup %7588 }
0x179e   :  { %v3670_v30 = vsel %vm69_vm0, %v7589_v25, 0.0 }
0x179f   :  { %v7591_v5 = vpop.eup %7590  ;;  %3671 = vadd.xlane.f32.xlu0 %v3670_v30  ;;  %v6236_v30 = vcombine.high %v6200_v15, %v6208_v9 }
0x17a0   :  { %v3673_v6 = vsel %vm69_vm0, %v7591_v5, 0.0 }
0x17a3   :  { %3674 = vadd.xlane.f32.xlu0 %v3673_v6  ;;  %v6223_v6 = vld [vmem:[%s9326_s8 + $0x1c0] sm:$0xff] }
0x17cb   :  { %v3594_v8 = vpop.f32.mrb[76].mxu1 }
0x17cc   :  { %v3601_v7 = vadd.f32 %v3594_v8, %v8635_v53  ;;  %v7218_v10 = vpop.f32.mrb[77].mxu1  ;;  %v6177_v53 = vld [vmem:[%s9325_s7 + $0x1c] sm:$0xf]  ;;  %v6216_v8 = vld [vmem:[%s9326_s8 + $0x188] sm:$0xff]  ;;  %s7608_s7 = scalar_lea.vmem %s5979_s23, 32 }
0x17cd   :  { %v3597_v11 = vpop.f32.mrb[78].mxu1  ;;  %v6224_v10 = vld [vmem:[%s9326_s8 + $0x1c8] sm:$0xff]  ;;  %p7609_p0 = scmp.ne.s32.totalorder %s5979_s23, %s7608_s7  ;;  %p7614_p2 = scmp.lt.s32.totalorder %s7608_s7, %s7608_s7 }
0x17ce   :  { %v3602_v16 = vadd.f32 %v3597_v11, %v8637_v58  ;;  %v7219_v13 = vpop.f32.mrb[79].mxu1  ;;  %v3733_v58 = vsel %vm448_vm4, %v6177_v53, 0 }
0x17cf   :  { %7233 = vmatpush3.bf16.msra.mxu0 %v3733_v58  ;;  %v6252_v13 = vcombine.high %v6216_v8, %v6224_v10  ;;  %p7615_p3 = por %p7614_p2, %p7613_p1 }
0x17d0   :  { %4149 = vmatprep.subr.bf16.mxu0 %v6236_v30 }
0x17d1   :  { %p7616_p4 = pnand %p7615_p3, %p7609_p0 }
0x182c   :  { %v3672_v17 = vpop.xlane.xlu0 %3671 }
0x182d   :  { %7592 = vrcp.f32 %v3672_v17  ;;  %v6201_v17 = vld [vmem:[%s9326_s8 + $0x110] sm:$0xff] }
0x1830   :  { %v3675_v14 = vpop.xlane.xlu0 %3674 }
0x1831   :  { %7594 = vrcp.f32 %v3675_v14  ;;  %v6209_v14 = vld [vmem:[%s9326_s8 + $0x150] sm:$0xff] }
0x1837   :  { %v7593_v20 = vpop.eup %7592 }
0x1838   :  { %v3677_v22 = vmul.f32 %v7593_v20, %v7589_v25  ;;  %v6235_v25 = vcombine.low %v6200_v15, %v6208_v9  ;;  %v6202_v20 = vld [vmem:[%s9326_s8 + $0x118] sm:$0xff]  ;;  %v6227_v15 = vld [vmem:[%s9326_s8 + $0x1e0] sm:$0xff]  ;;  %v6228_v9 = vld [vmem:[%s9326_s8 + $0x1e8] sm:$0xff] }
0x183b   :  { %v7595_v21 = vpop.eup %7594 }
0x183c   :  { %v3679_v23 = vmul.f32 %v7595_v21, %v7591_v5  ;;  %v6215_v5 = vld [vmem:[%s9326_s8 + $0x180] sm:$0xff]  ;;  %v6237_v21 = vcombine.low %v6201_v17, %v6209_v14 }
0x183d   :  { %v6249_v11 = vcombine.low %v6215_v5, %v6223_v6 }
0x183e   :  { %v3680_v27 = vpack.c.bf16 %v3679_v23, %v3677_v22  ;;  %v6238_v22 = vcombine.high %v6201_v17, %v6209_v14  ;;  %v6210_v23 = vld [vmem:[%s9326_s8 + $0x158] sm:$0xff]  ;;  %v6221_v14 = vld [vmem:[%s9326_s8 + $0x1b0] sm:$0xff] }
0x183f   :  { %v6240_v53 = vcombine.high %v6202_v20, %v6210_v23 }
0x1840   :  { %7229 = vmatmul.mubr.msk.bf16.vlgmr.msra.gmra.mrb[80].mxu1 %vm69_vm0, %v3680_v27  ;;  %v6239_v27 = vcombine.low %v6202_v20, %v6210_v23  ;;  %v6229_v20 = vld [vmem:[%s9326_s8 + $0x1f0] sm:$0xff] }
0x1841   :  { %4138 = vmatprep.mubr.bf16.mxu1 %v7645_v62 }
0x1913   :  { %v3721_v28 = vpop.f32.mrb[80].mxu1 }
0x1914   :  { %v7230_v31 = vpop.f32.mrb[81].mxu1 }
0x1915   :  { %v3724_v32 = vpop.f32.mrb[82].mxu1 }
0x1916   :  { %v3728_v34 = vpack.c.bf16 %v3724_v32, %v3721_v28  ;;  %v7231_v36 = vpop.f32.mrb[83].mxu1 }
0x1918   :  { %7235 = vmatmul.mubr.msk.bf16.vlgmr.msra.gmra.mrb[84].mxu0 %vm196_vm3, %v3728_v34 }
0x1919   :  { %4181 = vmatprep.mubr.bf16.mxu0 %v7645_v62  ;;  %4150 = vmatpush1.bf16.msra.mxu0 %v6235_v25 }
0x191a   :  { %4151 = vmatprep.subr.bf16.mxu0 %v6252_v13 }
0x19eb   :  { %v3769_v39 = vpop.f32.mrb[84].mxu0 }
0x19ec   :  { %v3776_v40 = vadd.f32 %v3769_v39, %v3601_v7  ;;  %v7236_v41 = vpop.f32.mrb[85].mxu0  ;;  %v6250_v7 = vcombine.high %v6215_v5, %v6223_v6  ;;  %v3815_v39 = vrot.slane %v8689_v38, %v7954_v57  ;;  %v6205_v6 = vld [vmem:[%s9326_s8 + $0x130] sm:$0xff] }
0x19ed   :  { %v3772_v42 = vpop.f32.mrb[86].mxu0 }
0x19ee   :  { %v3782_v44 = vadd.f32 %v3781_v35, %v3776_v40  ;;  %v3777_v19 = vadd.f32 %v3772_v42, %v3602_v16  ;;  %v7237_v29 = vpop.f32.mrb[87].mxu0  ;;  %v6251_v16 = vcombine.low %v6216_v8, %v6224_v10  ;;  %v3821_v42 = vrot.slane %v8689_v38, %v7959_v12  ;;  %v6213_v8 = vld [vmem:[%s9326_s8 + $0x170] sm:$0xff]  ;;  %v6214_v10 = vld [vmem:[%s9326_s8 + $0x178] sm:$0xff] }
0x19ef   :  { %v6246_v13 = vcombine.high %v6205_v6, %v6213_v8  ;;  %v6245_v23 = vcombine.low %v6205_v6, %v6213_v8 }
0x19f0   :  { %v3783_v26 = vadd.f32 %v3781_v35, %v3777_v19  ;;  %v3784_v24 = vadd.f32 %v3782_v44, %v8545_v2  ;;  %4152 = vmatpush1.bf16.msra.mxu0 %v6251_v16 }
0x19f1   :  { %4235 = vmatprep.subr.bf16.mxu0 %v6240_v53  ;;  %v6262_v53 = vcombine.high %v6221_v14, %v6229_v20 }
0x19f2   :  { %v3786_v43 = vsel %vm147_vm2, %v3784_v24, 0.0  ;;  %v3785_v47 = vadd.f32 %v3783_v26, %v8547_v3  ;;  %v6199_v3 = vld [vmem:[%s9326_s8 + $0x100] sm:$0xff]  ;;  %v6217_v26 = vld [vmem:[%s9326_s8 + $0x190] sm:$0xff] }
0x19f3   :  { %3787 = vadd.xlane.f32.xlu0 %v3786_v43  ;;  %v6234_v61 = vcombine.high %v6199_v3, %v6207_v54  ;;  %v6233_v63 = vcombine.low %v6199_v3, %v6207_v54  ;;  %v6218_v43 = vld [vmem:[%s9326_s8 + $0x198] sm:$0xff]  ;;  %v6219_v54 = vld [vmem:[%s9326_s8 + $0x1a0] sm:$0xff] }
0x19f4   :  { %v3789_v45 = vsel %vm147_vm2, %v3785_v47, 0.0  ;;  %v6258_v30 = vcombine.high %v6219_v54, %v6227_v15 }
0x19f5   :  { %4106 = vmatprep.subr.bf16.mxu1 %v6234_v61  ;;  %v6220_v61 = vld [vmem:[%s9326_s8 + $0x1a8] sm:$0xff] }
0x19f6   :  { %4107 = vmatpush1.bf16.msra.mxu1 %v6233_v63  ;;  %v6260_v5 = vcombine.high %v6220_v61, %v6228_v9  ;;  %v6259_v16 = vcombine.low %v6220_v61, %v6228_v9  ;;  %v7423_v61 = vld [vmem:[%s9328_s10 + $0x4f8] sm:$0xff]  }
0x19f7   :  { %3790 = vadd.xlane.f32.xlu0 %v3789_v45  ;;  %4108 = vmatprep.subr.bf16.mxu1 %v6250_v7  ;;  %v6206_v7 = vld [vmem:[%s9326_s8 + $0x138] sm:$0xff] }
0x19f8   :  { %v6248_v17 = vcombine.high %v6206_v7, %v6214_v10  ;;  %v7424_v9 = vld [vmem:[%s9328_s10 + $0x438] sm:$0xff]  }
0x19fa   :  { %4109 = vmatpush1.bf16.msra.mxu1 %v6249_v11  ;;  %v6257_v11 = vcombine.low %v6219_v54, %v6227_v15  ;;  %v7421_v54 = vld [vmem:[%s9328_s10 + $0x4b0] sm:$0xff]   ;;  %v7422_v15 = vld [vmem:[%s9328_s10 + $0x478] sm:$0xff]  }
0x19fb   :  { %4192 = vmatprep.subr.bf16.mxu1 %v6238_v22  ;;  %v6230_v22 = vld [vmem:[%s9326_s8 + $0x1f8] sm:$0xff] }
0x1a80   :  { %v3788_v48 = vpop.xlane.xlu0 %3787 }
0x1a81   :  { %v3792_v49 = vmul.f32 0.03125, %v3788_v48 }
0x1a83   :  { %v3794_v50 = vsub.f32 %v3784_v24, %v3792_v49  ;;  %v6225_v24 = vld [vmem:[%s9326_s8 + $0x1d0] sm:$0xff] }
0x1a84   :  { %v3791_v55 = vpop.xlane.xlu0 %3790  ;;  %v6254_v49 = vcombine.high %v6217_v26, %v6225_v24 }
0x1a85   :  { %v3793_v37 = vmul.f32 0.03125, %v3791_v55  ;;  %v3796_v59 = vmul.f32 %v3794_v50, %v3794_v50  ;;  %v6203_v55 = vld [vmem:[%s9326_s8 + $0x120] sm:$0xff] }
0x1a87   :  { %v3795_v60 = vsub.f32 %v3785_v47, %v3793_v37  ;;  %v3798_v0 = vsel %vm147_vm2, %v3796_v59, 0.0  ;;  %v6226_v47 = vld [vmem:[%s9326_s8 + $0x1d8] sm:$0xff]  ;;  %v6211_v37 = vld [vmem:[%s9326_s8 + $0x160] sm:$0xff]  ;;  %v6204_v59 = vld [vmem:[%s9326_s8 + $0x128] sm:$0xff] }
0x1a88   :  { %3799 = vadd.xlane.f32.xlu0 %v3798_v0  ;;  %v6253_v0 = vcombine.low %v6217_v26, %v6225_v24  ;;  %v6241_v63 = vcombine.low %v6203_v55, %v6211_v37  ;;  %v7406_v26 = vld [vmem:[%s9328_s10 + $0x458] sm:$0xff]  }
0x1a89   :  { %v3797_v4 = vmul.f32 %v3795_v60, %v3795_v60  ;;  %v7407_v24 = vld [vmem:[%s9328_s10 + $0x4d8] sm:$0xff]  }
0x1a8b   :  { %v3801_v2 = vsel %vm147_vm2, %v3797_v4, 0.0  ;;  %v6255_v4 = vcombine.low %v6218_v43, %v6226_v47 }
0x1a8c   :  { %3802 = vadd.xlane.f32.xlu0 %v3801_v2  ;;  %v6242_v2 = vcombine.high %v6203_v55, %v6211_v37  ;;  %v7413_v55 = vld [vmem:[%s9328_s10 + $0x4a0] sm:$0xff]   ;;  %v7414_v37 = vld [vmem:[%s9328_s10 + $0x468] sm:$0xff]  }
0x1b15   :  { %v3800_v58 = vpop.xlane.xlu0 %3799 }
0x1b16   :  { %v3804_v28 = vmul.f32 0.03125, %v3800_v58 }
0x1b18   :  { %v3806_v31 = vadd.f32 1e-05, %v3804_v28  ;;  %v6261_v28 = vcombine.low %v6221_v14, %v6229_v20 }
0x1b19   :  { %v3803_v32 = vpop.xlane.xlu0 %3802 }
0x1b1a   :  { %7596 = vrsqrt.f32 %v3806_v31  ;;  %v3805_v34 = vmul.f32 0.03125, %v3803_v32  ;;  %v7394_v32 = vld [vmem:[%s9328_s10 + $0x440] sm:$0xff]  }
0x1b1c   :  { %v3807_v36 = vadd.f32 1e-05, %v3805_v34  ;;  %v7395_v34 = vld [vmem:[%s9328_s10 + $0x4c0] sm:$0xff]  }
0x1b1e   :  { %7598 = vrsqrt.f32 %v3807_v36  ;;  %v7396_v36 = vld [vmem:[%s9328_s10 + $0x400] sm:$0xff]  }
0x1b24   :  { %v7597_v35 = vpop.eup %7596 }
0x1b25   :  { %v3810_v40 = vmul.f32 %v7597_v35, %v3794_v50  ;;  %v6256_v50 = vcombine.high %v6218_v43, %v6226_v47  ;;  %v7397_v35 = vld [vmem:[%s9328_s10 + $0x480] sm:$0xff]   ;;  %v7408_v43 = vld [vmem:[%s9328_s10 + $0x418] sm:$0xff]  }
0x1b26   :  { %v7409_v47 = vld [vmem:[%s9328_s10 + $0x498] sm:$0xff]  }
0x1b27   :  { %v3816_v44 = vmul.f32 %v3815_v39, %v3810_v40  ;;  %v7400_v40 = vld [vmem:[%s9328_s10 + $0x408] sm:$0xff]  }
0x1b28   :  { %v7599_v41 = vpop.eup %7598 }
0x1b29   :  { %v3811_v19 = vmul.f32 %v7599_v41, %v3795_v60  ;;  %v8751_v38 = vadd.f32 %v3821_v42, %v3816_v44  ;;  %v6212_v60 = vld [vmem:[%s9326_s8 + $0x168] sm:$0xff]  ;;  %v7403_v44 = vld [vmem:[%s9328_s10 + $0x4d0] sm:$0xff]  }
0x1b2a   :  { %v6244_v3 = vcombine.high %v6204_v59, %v6212_v60  ;;  %v6243_v25 = vcombine.low %v6204_v59, %v6212_v60  ;;  %v7401_v41 = vld [vmem:[%s9328_s10 + $0x488] sm:$0xff]  }
0x1b2b   :  { %v3817_v29 = vmul.f32 %v3815_v39, %v3811_v19  ;;  %v7398_v39 = vld [vmem:[%s9328_s10 + $0x448] sm:$0xff]   ;;  %v7404_v19 = vld [vmem:[%s9328_s10 + $0x410] sm:$0xff]  }
0x1b2c   :  { %v7415_v59 = vld [vmem:[%s9328_s10 + $0x4e8] sm:$0xff]  }
0x1b2d   :  { %v8753_v45 = vadd.f32 %v3821_v42, %v3817_v29  ;;  %v7402_v42 = vld [vmem:[%s9328_s10 + $0x450] sm:$0xff]   ;;  %v7416_v60 = vld [vmem:[%s9328_s10 + $0x428] sm:$0xff]  }
0x1b2e   :  { %v7405_v29 = vld [vmem:[%s9328_s10 + $0x490] sm:$0xff]  }
0x1b2f   :  { %v8757_v48 = vpack.c.bf16 %v8753_v45, %v8751_v38 }
0x1b31   :  { %6265 = vmatmul.mubr.msk.bf16.vlgmr.msra.gmra.mrb[84].mxu1 %vm147_vm2, %v8757_v48  ;;  %6266 = vmatmul.mubr.msk.bf16.vlgmr.msra.gmra.mrb[88].mxu0 %vm147_vm2, %v8757_v48 }
0x1b32   :  { %4193 = vmatpush1.bf16.msra.mxu1 %v6237_v21  ;;  %4236 = vmatpush1.bf16.msra.mxu0 %v6239_v27  ;;  %v6222_v21 = vld [vmem:[%s9326_s8 + $0x1b8] sm:$0xff]  ;;  %v6247_v27 = vcombine.low %v6206_v7, %v6214_v10 }
0x1b33   :  { %4194 = vmatprep.subr.bf16.mxu1 %v6254_v49  ;;  %4237 = vmatprep.subr.bf16.mxu0 %v6256_v50  ;;  %v6264_v58 = vcombine.high %v6222_v21, %v6230_v22  ;;  %v6263_v31 = vcombine.low %v6222_v21, %v6230_v22  ;;  %v7411_v49 = vld [vmem:[%s9328_s10 + $0x4e0] sm:$0xff]  }
0x1b34   :  { %4224 = vmatprep.mubr.bf16.mxu1 %v7645_v62  ;;  %4267 = vmatprep.mubr.bf16.mxu0 %v7645_v62  ;;  %v7412_v50 = vld [vmem:[%s9328_s10 + $0x420] sm:$0xff]  }
0x1b36   :  { %4195 = vmatpush1.bf16.msra.mxu1 %v6253_v0  ;;  %4238 = vmatpush1.bf16.msra.mxu0 %v6255_v4  ;;  %v7417_v0 = vld [vmem:[%s9328_s10 + $0x4a8] sm:$0xff]   ;;  %v7418_v4 = vld [vmem:[%s9328_s10 + $0x470] sm:$0xff]  }
0x1b37   :  { %4278 = vmatprep.subr.bf16.mxu1 %v6242_v2  ;;  %4321 = vmatprep.subr.bf16.mxu0 %v6244_v3  ;;  %v7419_v2 = vld [vmem:[%s9328_s10 + $0x4f0] sm:$0xff]  }
0x1b38   :  { %v7420_v3 = vld [vmem:[%s9328_s10 + $0x430] sm:$0xff]  }
0x1b39   :  { %6267 = vmatmul.mubr.msk.bf16.vlgmr.msra.gmra.mrb[88].mxu1 %vm147_vm2, %v8757_v48  ;;  %6268 = vmatmul.mubr.msk.bf16.vlgmr.msra.gmra.mrb[92].mxu0 %vm147_vm2, %v8757_v48 }
0x1b3a   :  { %4279 = vmatpush1.bf16.msra.mxu1 %v6241_v63  ;;  %4322 = vmatpush1.bf16.msra.mxu0 %v6243_v25  ;;  %v7425_v63 = vld [vmem:[%s9328_s10 + $0x4b8] sm:$0xff]   ;;  %v7426_v25 = vld [vmem:[%s9328_s10 + $0x540] sm:$0xff]  }
0x1b3b   :  { %4280 = vmatprep.subr.bf16.mxu1 %v6258_v30  ;;  %4323 = vmatprep.subr.bf16.mxu0 %v6260_v5  ;;  %v7427_v30 = vld [vmem:[%s9328_s10 + $0x5c0] sm:$0xff]   ;;  %v6231_v5 = vld [vmem:[%s9327_s9 + $0x10] sm:$0xff] }
0x1b3c   :  { %4310 = vmatprep.mubr.bf16.mxu1 %v7645_v62  ;;  %4353 = vmatprep.mubr.bf16.mxu0 %v7645_v62  ;;  %v3866_v6 = vrot.slane %v6231_v5, %v7900_v18  ;;  %v3874_v8 = vrot.slane %v6231_v5, %v7959_v12  ;;  %v3870_v7 = vrot.slane %v6231_v5, %v7954_v57 }
0x1b3d   :  { %v3878_v10 = vrot.slane %v6231_v5, %v8159_v46 }
0x1b3e   :  { %4281 = vmatpush1.bf16.msra.mxu1 %v6257_v11  ;;  %4324 = vmatpush1.bf16.msra.mxu0 %v6259_v16 }
0x1b3f   :  { %4364 = vmatprep.subr.bf16.mxu1 %v6246_v13  ;;  %4407 = vmatprep.subr.bf16.mxu0 %v6248_v17 }
0x1b41   :  { %6269 = vmatmul.mubr.msk.bf16.vlgmr.msra.gmra.mrb[92].mxu1 %vm147_vm2, %v8757_v48  ;;  %6270 = vmatmul.mubr.msk.bf16.vlgmr.msra.gmra.mrb[96].mxu0 %vm147_vm2, %v8757_v48 }
0x1b42   :  { %4365 = vmatpush1.bf16.msra.mxu1 %v6245_v23  ;;  %4408 = vmatpush1.bf16.msra.mxu0 %v6247_v27 }
0x1b43   :  { %4366 = vmatprep.subr.bf16.mxu1 %v6262_v53  ;;  %4409 = vmatprep.subr.bf16.mxu0 %v6264_v58 }
0x1b44   :  { %4396 = vmatprep.mubr.bf16.mxu1 %v7645_v62  ;;  %4439 = vmatprep.mubr.bf16.mxu0 %v7645_v62  ;;  %v7399_v62 = vld [vmem:[%s9328_s10 + $0x4c8] sm:$0xff]  }
0x1b46   :  { %4367 = vmatpush1.bf16.msra.mxu1 %v6261_v28  ;;  %4410 = vmatpush1.bf16.msra.mxu0 %v6263_v31 }
0x1b47   :  { %6893 = vmatprep.subr.bf16.mxu1 %v7394_v32  ;;  %6915 = vmatprep.subr.bf16.mxu0 %v7395_v34  ;;  %v3882_v32 = vrot.slane %v6231_v5, %v8166_v51  ;;  %v3890_v34 = vrot.slane %v6231_v5, %v8169_v52 }
0x1b49   :  { %6271 = vmatmul.mubr.msk.bf16.vlgmr.msra.gmra.mrb[96].mxu1 %vm147_vm2, %v8757_v48  ;;  %6272 = vmatmul.mubr.msk.bf16.vlgmr.msra.gmra.mrb[100].mxu0 %vm147_vm2, %v8757_v48  ;;  %v7410_v48 = vld [vmem:[%s9328_s10 + $0x460] sm:$0xff]  }
0x1b4a   :  { %6894 = vmatpush3.bf16.msra.mxu1 %v7396_v36  ;;  %6916 = vmatpush3.bf16.msra.mxu0 %v7397_v35 }
0x1b4b   :  { %6895 = vmatprep.subr.bf16.mxu1 %v7398_v39  ;;  %6917 = vmatprep.subr.bf16.mxu0 %v7399_v62  ;;  %v3886_v39 = vrot.slane %v6231_v5, %v8172_v33  ;;  %v3894_v62 = vrot.slane %v6231_v5, %v8175_v56 }
0x1b4e   :  { %6896 = vmatpush3.bf16.msra.mxu1 %v7400_v40  ;;  %6918 = vmatpush3.bf16.msra.mxu0 %v7401_v41 }
0x1b4f   :  { %6897 = vmatprep.subr.bf16.mxu1 %v7402_v42  ;;  %6919 = vmatprep.subr.bf16.mxu0 %v7403_v44 }
0x1b52   :  { %6898 = vmatpush3.bf16.msra.mxu1 %v7404_v19  ;;  %6920 = vmatpush3.bf16.msra.mxu0 %v7405_v29 }
0x1b53   :  { %6899 = vmatprep.subr.bf16.mxu1 %v7406_v26  ;;  %6921 = vmatprep.subr.bf16.mxu0 %v7407_v24 }
0x1b56   :  { %6900 = vmatpush3.bf16.msra.mxu1 %v7408_v43  ;;  %6922 = vmatpush3.bf16.msra.mxu0 %v7409_v47  ;;  %v8945_v43 = vld [vmem:[%s9327_s9 + $0x18] sm:$0xff] }
0x1b57   :  { %6901 = vmatprep.subr.bf16.mxu1 %v7410_v48  ;;  %6923 = vmatprep.subr.bf16.mxu0 %v7411_v49  ;;  %v3906_v5 = vrot.slane %v8945_v43, %v7959_v12  ;;  %v7433_v12 = vld [vmem:[%s9328_s10 + $0x588] sm:$0xff]  }
0x1b5a   :  { %6902 = vmatpush3.bf16.msra.mxu1 %v7412_v50  ;;  %6924 = vmatpush3.bf16.msra.mxu0 %v7413_v55 }
0x1b5b   :  { %6903 = vmatprep.subr.bf16.mxu1 %v7414_v37  ;;  %6925 = vmatprep.subr.bf16.mxu0 %v7415_v59  ;;  %v7428_v59 = vld [vmem:[%s9328_s10 + $0x500] sm:$0xff]  }
0x1b5e   :  { %6904 = vmatpush3.bf16.msra.mxu1 %v7416_v60  ;;  %6926 = vmatpush3.bf16.msra.mxu0 %v7417_v0  ;;  %v7429_v60 = vld [vmem:[%s9328_s10 + $0x580] sm:$0xff]  }
0x1b5f   :  { %6905 = vmatprep.subr.bf16.mxu1 %v7418_v4  ;;  %6927 = vmatprep.subr.bf16.mxu0 %v7419_v2 }
0x1b62   :  { %6906 = vmatpush3.bf16.msra.mxu1 %v7420_v3  ;;  %6928 = vmatpush3.bf16.msra.mxu0 %v7421_v54  ;;  %v7430_v54 = vld [vmem:[%s9328_s10 + $0x548] sm:$0xff]  }
0x1b63   :  { %6907 = vmatprep.subr.bf16.mxu1 %v7422_v15  ;;  %6929 = vmatprep.subr.bf16.mxu0 %v7423_v61  ;;  %v7431_v15 = vld [vmem:[%s9328_s10 + $0x5c8] sm:$0xff]   ;;  %v3898_v61 = vrot.slane %v8945_v43, %v7900_v18 }
0x1b66   :  { %6908 = vmatpush3.bf16.msra.mxu1 %v7424_v9  ;;  %6930 = vmatpush3.bf16.msra.mxu0 %v7425_v63 }
0x1b67   :  { %6937 = vmatprep.subr.bf16.mxu1 %v7426_v25  ;;  %6959 = vmatprep.subr.bf16.mxu0 %v7427_v30 }
0x1c04   :  { %v4140_v11 = vpop.f32.mrb[84].mxu1  ;;  %v4183_v16 = vpop.f32.mrb[88].mxu0 }
0x1c05   :  { %v4141_v13 = vadd.f32 %v4140_v11, %v3866_v6  ;;  %v4184_v17 = vadd.f32 %v4183_v16, %v3874_v8  ;;  %v4142_v14 = vpop.f32.mrb[85].mxu1  ;;  %v4185_v20 = vpop.f32.mrb[89].mxu0  ;;  %v3902_v11 = vrot.slane %v8945_v43, %v7954_v57  ;;  %v7434_v57 = vld [vmem:[%s9328_s10 + $0x550] sm:$0xff]  }
0x1c06   :  { %v4143_v21 = vadd.f32 %v4142_v14, %v3870_v7  ;;  %v4186_v22 = vadd.f32 %v4185_v20, %v3878_v10  ;;  %v4144_v23 = vpop.f32.mrb[86].mxu1  ;;  %v4187_v27 = vpop.f32.mrb[90].mxu0 }
0x1c07   :  { %v4145_v53 = vadd.f32 %v4144_v23, %v3866_v6  ;;  %v4188_v58 = vadd.f32 %v4187_v27, %v3874_v8  ;;  %v4146_v28 = vpop.f32.mrb[87].mxu1  ;;  %v4189_v31 = vpop.f32.mrb[91].mxu0  ;;  %v4450_v40 = vmax.f32 %v4141_v13, 0.0  ;;  %v4452_v41 = vmax.f32 %v4184_v17, 0.0  ;;  %v7432_v13 = vld [vmem:[%s9328_s10 + $0x508] sm:$0xff]   ;;  %v7435_v23 = vld [vmem:[%s9328_s10 + $0x5d0] sm:$0xff]  }
0x1c08   :  { %v4147_v36 = vadd.f32 %v4146_v28, %v3870_v7  ;;  %v4190_v35 = vadd.f32 %v4189_v31, %v3878_v10  ;;  %v4451_v19 = vmax.f32 %v4143_v21, 0.0  ;;  %v4453_v29 = vmax.f32 %v4186_v22, 0.0 }
0x1c09   :  { %v4466_v42 = vmax.f32 %v4145_v53, 0.0  ;;  %v4468_v44 = vmax.f32 %v4188_v58, 0.0  ;;  %v3910_v17 = vrot.slane %v8945_v43, %v8159_v46 }
0x1c0a   :  { %v4467_v26 = vmax.f32 %v4147_v36, 0.0  ;;  %v4469_v24 = vmax.f32 %v4190_v35, 0.0 }
0x1c0b   :  { %v4482_v47 = vpack.c.bf16 %v4466_v42, %v4450_v40  ;;  %v4484_v48 = vpack.c.bf16 %v4468_v44, %v4452_v41  ;;  %v7437_v40 = vld [vmem:[%s9328_s10 + $0x590] sm:$0xff]  }
0x1c0c   :  { %v4483_v49 = vpack.c.bf16 %v4467_v26, %v4451_v19  ;;  %v4485_v50 = vpack.c.bf16 %v4469_v24, %v4453_v29  ;;  %v4226_v55 = vpop.f32.mrb[88].mxu1  ;;  %v4269_v37 = vpop.f32.mrb[92].mxu0  ;;  %v7438_v29 = vld [vmem:[%s9328_s10 + $0x558] sm:$0xff]  }
0x1c0d   :  { %v4227_v0 = vadd.f32 %v4226_v55, %v3882_v32  ;;  %v4270_v4 = vadd.f32 %v4269_v37, %v3890_v34  ;;  %v4228_v2 = vpop.f32.mrb[89].mxu1  ;;  %v4271_v3 = vpop.f32.mrb[93].mxu0  ;;  %v7439_v26 = vld [vmem:[%s9328_s10 + $0x5d8] sm:$0xff]  }
0x1c0e   :  { %v4229_v9 = vadd.f32 %v4228_v2, %v3886_v39  ;;  %v4272_v63 = vadd.f32 %v4271_v3, %v3894_v62  ;;  %v4230_v25 = vpop.f32.mrb[90].mxu1  ;;  %v4273_v30 = vpop.f32.mrb[94].mxu0  ;;  %5559 = vmatprep.mubr.bf16.mxu1 %v4483_v49  ;;  %5600 = vmatprep.mubr.bf16.mxu0 %v4485_v50  ;;  %v3914_v50 = vrot.slane %v8945_v43, %v8166_v51 }
0x1c0f   :  { %v4231_v6 = vadd.f32 %v4230_v25, %v3882_v32  ;;  %v4274_v8 = vadd.f32 %v4273_v30, %v3890_v34  ;;  %v4232_v7 = vpop.f32.mrb[91].mxu1  ;;  %v4275_v10 = vpop.f32.mrb[95].mxu0  ;;  %5560 = vmatmul.mubr.bf16.vlgmr.msra.gmra.mrb[100].mxu1 %v4482_v47  ;;  %5601 = vmatmul.mubr.bf16.vlgmr.msra.gmra.mrb[104].mxu0 %v4484_v48  ;;  %v4454_v14 = vmax.f32 %v4227_v0, 0.0  ;;  %v4456_v20 = vmax.f32 %v4270_v4, 0.0  ;;  %v7442_v30 = vld [vmem:[%s9328_s10 + $0x560] sm:$0xff]  }
0x1c10   :  { %v4233_v16 = vadd.f32 %v4232_v7, %v3886_v39  ;;  %v4276_v18 = vadd.f32 %v4275_v10, %v3894_v62  ;;  %6938 = vmatpush3.bf16.msra.mxu1 %v7428_v59  ;;  %6960 = vmatpush3.bf16.msra.mxu0 %v7429_v60  ;;  %v4455_v27 = vmax.f32 %v4229_v9, 0.0  ;;  %v4457_v53 = vmax.f32 %v4272_v63, 0.0  ;;  %v7436_v62 = vld [vmem:[%s9328_s10 + $0x510] sm:$0xff]  }
0x1c11   :  { %v4470_v21 = vmax.f32 %v4231_v6, 0.0  ;;  %v4472_v22 = vmax.f32 %v4274_v8, 0.0  ;;  %6939 = vmatprep.subr.bf16.mxu1 %v7430_v54  ;;  %6961 = vmatprep.subr.bf16.mxu0 %v7431_v15  ;;  %v3922_v0 = vrot.slane %v8945_v43, %v8169_v52  ;;  %v3918_v4 = vrot.slane %v8945_v43, %v8172_v33  ;;  %v7440_v54 = vld [vmem:[%s9328_s10 + $0x518] sm:$0xff]  }
0x1c12   :  { %v4471_v58 = vmax.f32 %v4233_v16, 0.0  ;;  %v4473_v28 = vmax.f32 %v4276_v18, 0.0  ;;  %v7441_v15 = vld [vmem:[%s9328_s10 + $0x598] sm:$0xff]  }
0x1c13   :  { %v8979_v31 = vpack.c.bf16 %v4470_v21, %v4454_v14  ;;  %v8981_v32 = vpack.c.bf16 %v4472_v22, %v4456_v20 }
0x1c14   :  { %v4487_v34 = vpack.c.bf16 %v4471_v58, %v4455_v27  ;;  %v4489_v36 = vpack.c.bf16 %v4473_v28, %v4457_v53  ;;  %6940 = vmatpush3.bf16.msra.mxu1 %v7432_v13  ;;  %6962 = vmatpush3.bf16.msra.mxu0 %v7433_v12  ;;  %v4312_v35 = vpop.f32.mrb[92].mxu1  ;;  %v4355_v39 = vpop.f32.mrb[96].mxu0  ;;  %v7444_v12 = vld [vmem:[%s9328_s10 + $0x520] sm:$0xff]  }
0x1c15   :  { %v4313_v41 = vadd.f32 %v4312_v35, %v3898_v61  ;;  %v4356_v42 = vadd.f32 %v4355_v39, %v3906_v5  ;;  %v4314_v44 = vpop.f32.mrb[93].mxu1  ;;  %v4357_v19 = vpop.f32.mrb[97].mxu0  ;;  %6941 = vmatprep.subr.bf16.mxu1 %v7434_v57  ;;  %6963 = vmatprep.subr.bf16.mxu0 %v7435_v23  ;;  %v7446_v57 = vld [vmem:[%s9328_s10 + $0x568] sm:$0xff]  }
0x1c16   :  { %v4315_v24 = vadd.f32 %v4314_v44, %v3902_v11  ;;  %v4358_v47 = vadd.f32 %v4357_v19, %v3910_v17  ;;  %v4316_v48 = vpop.f32.mrb[94].mxu1  ;;  %v4359_v49 = vpop.f32.mrb[98].mxu0  ;;  %5641 = vmatprep.mubr.bf16.mxu1 %v4487_v34  ;;  %5682 = vmatprep.mubr.bf16.mxu0 %v4489_v36  ;;  %v7447_v23 = vld [vmem:[%s9328_s10 + $0x5e8] sm:$0xff]  }
0x1c17   :  { %v4317_v55 = vadd.f32 %v4316_v48, %v3898_v61  ;;  %v4360_v37 = vadd.f32 %v4359_v49, %v3906_v5  ;;  %v4318_v59 = vpop.f32.mrb[95].mxu1  ;;  %v4361_v60 = vpop.f32.mrb[99].mxu0  ;;  %v3926_v61 = vrot.slane %v8945_v43, %v8175_v56  ;;  %v4458_v9 = vmax.f32 %v4313_v41, 0.0  ;;  %v7443_v5 = vld [vmem:[%s9328_s10 + $0x5e0] sm:$0xff]   ;;  %v7448_v41 = vld [vmem:[%s9328_s10 + $0x528] sm:$0xff]  }
0x1c18   :  { %v4319_v2 = vadd.f32 %v4318_v59, %v3902_v11  ;;  %v4362_v3 = vadd.f32 %v4361_v60, %v3910_v17  ;;  %6942 = vmatpush3.bf16.msra.mxu1 %v7436_v62  ;;  %6964 = vmatpush3.bf16.msra.mxu0 %v7437_v40  ;;  %v4460_v52 = vmax.f32 %v4356_v42, 0.0  ;;  %v4459_v6 = vmax.f32 %v4315_v24, 0.0  ;;  %v7445_v17 = vld [vmem:[%s9328_s10 + $0x5a0] sm:$0xff]   ;;  %v7449_v42 = vld [vmem:[%s9328_s10 + $0x5a8] sm:$0xff]   ;;  %v7450_v24 = vld [vmem:[%s9328_s10 + $0x570] sm:$0xff]  }
0x1c19   :  { %v4474_v63 = vmax.f32 %v4317_v55, 0.0  ;;  %v4476_v25 = vmax.f32 %v4360_v37, 0.0  ;;  %6943 = vmatprep.subr.bf16.mxu1 %v7438_v29  ;;  %6965 = vmatprep.subr.bf16.mxu0 %v7439_v26  ;;  %v4461_v8 = vmax.f32 %v4358_v47, 0.0  ;;  %v7451_v47 = vld [vmem:[%s9328_s10 + $0x5f0] sm:$0xff]  }
0x1c1a   :  { %v4475_v7 = vmax.f32 %v4319_v2, 0.0  ;;  %v4477_v10 = vmax.f32 %v4362_v3, 0.0  ;;  %v7453_v2 = vld [vmem:[%s9328_s10 + $0x5b0] sm:$0xff]   ;;  %v7454_v3 = vld [vmem:[%s9328_s10 + $0x578] sm:$0xff]  }
0x1c1b   :  { %v9015_v11 = vpack.c.bf16 %v4474_v63, %v4458_v9  ;;  %v9017_v56 = vpack.c.bf16 %v4476_v25, %v4460_v52  ;;  %v7458_v9 = vld [vmem:[%s9328_s10 + $0x640] sm:$0xff]  }
0x1c1c   :  { %v9019_v43 = vpack.c.bf16 %v4475_v7, %v4459_v6  ;;  %v9021_v16 = vpack.c.bf16 %v4477_v10, %v4461_v8  ;;  %6944 = vmatpush3.bf16.msra.mxu1 %v7440_v54  ;;  %6966 = vmatpush3.bf16.msra.mxu0 %v7441_v15  ;;  %v4398_v18 = vpop.f32.mrb[96].mxu1  ;;  %v4441_v13 = vpop.f32.mrb[100].mxu0  ;;  %v7455_v54 = vld [vmem:[%s9328_s10 + $0x5f8] sm:$0xff]   ;;  %v7459_v52 = vld [vmem:[%s9328_s10 + $0x6c0] sm:$0xff]   ;;  %v7464_v6 = vld [vmem:[%s9328_s10 + $0x608] sm:$0xff]  }
0x1c1d   :  { %v4399_v14 = vadd.f32 %v4398_v18, %v3914_v50  ;;  %v4442_v20 = vadd.f32 %v4441_v13, %v3922_v0  ;;  %v4400_v21 = vpop.f32.mrb[97].mxu1  ;;  %v4443_v22 = vpop.f32.mrb[101].mxu0  ;;  %6945 = vmatprep.subr.bf16.mxu1 %v7442_v30  ;;  %6967 = vmatprep.subr.bf16.mxu0 %v7443_v5  ;;  %v7456_v15 = vld [vmem:[%s9328_s10 + $0x538] sm:$0xff]   ;;  %v7460_v63 = vld [vmem:[%s9328_s10 + $0x600] sm:$0xff]   ;;  %v7462_v30 = vld [vmem:[%s9328_s10 + $0x648] sm:$0xff]  }
0x1c1e   :  { %v4401_v27 = vadd.f32 %v4400_v21, %v3918_v4  ;;  %v4444_v53 = vadd.f32 %v4443_v22, %v3926_v61  ;;  %v4402_v58 = vpop.f32.mrb[98].mxu1  ;;  %v4445_v28 = vpop.f32.mrb[102].mxu0  ;;  %v7461_v25 = vld [vmem:[%s9328_s10 + $0x680] sm:$0xff]   ;;  %v7463_v5 = vld [vmem:[%s9328_s10 + $0x6c8] sm:$0xff]   ;;  %v7468_v7 = vld [vmem:[%s9328_s10 + $0x610] sm:$0xff]  }
0x1c1f   :  { %v4403_v34 = vadd.f32 %v4402_v58, %v3914_v50  ;;  %v4446_v36 = vadd.f32 %v4445_v28, %v3922_v0  ;;  %v4404_v35 = vpop.f32.mrb[99].mxu1  ;;  %v4447_v39 = vpop.f32.mrb[103].mxu0  ;;  %v4462_v44 = vmax.f32 %v4399_v14, 0.0  ;;  %v4464_v19 = vmax.f32 %v4442_v20, 0.0  ;;  %v7465_v8 = vld [vmem:[%s9328_s10 + $0x688] sm:$0xff]   ;;  %v7469_v10 = vld [vmem:[%s9328_s10 + $0x690] sm:$0xff]  }
0x1c20   :  { %v4405_v62 = vadd.f32 %v4404_v35, %v3918_v4  ;;  %v4448_v40 = vadd.f32 %v4447_v39, %v3926_v61  ;;  %6946 = vmatpush3.bf16.msra.mxu1 %v7444_v12  ;;  %6968 = vmatpush3.bf16.msra.mxu0 %v7445_v17  ;;  %v4463_v48 = vmax.f32 %v4401_v27, 0.0  ;;  %v4465_v49 = vmax.f32 %v4444_v53, 0.0  ;;  %v7452_v4 = vld [vmem:[%s9328_s10 + $0x530] sm:$0xff]   ;;  %v7457_v61 = vld [vmem:[%s9328_s10 + $0x5b8] sm:$0xff]   ;;  %v7474_v12 = vld [vmem:[%s9328_s10 + $0x660] sm:$0xff]  }
0x1c21   :  { %v4478_v29 = vmax.f32 %v4403_v34, 0.0  ;;  %v4480_v26 = vmax.f32 %v4446_v36, 0.0  ;;  %6947 = vmatprep.subr.bf16.mxu1 %v7446_v57  ;;  %6969 = vmatprep.subr.bf16.mxu0 %v7447_v23  ;;  %v7472_v18 = vld [vmem:[%s9328_s10 + $0x618] sm:$0xff]   ;;  %v7475_v17 = vld [vmem:[%s9328_s10 + $0x6e0] sm:$0xff]   ;;  %v7478_v21 = vld [vmem:[%s9328_s10 + $0x668] sm:$0xff]  }
0x1c22   :  { %v4479_v50 = vmax.f32 %v4405_v62, 0.0  ;;  %v4481_v55 = vmax.f32 %v4448_v40, 0.0  ;;  %v7473_v13 = vld [vmem:[%s9328_s10 + $0x698] sm:$0xff]   ;;  %v7476_v14 = vld [vmem:[%s9328_s10 + $0x620] sm:$0xff]   ;;  %v7479_v22 = vld [vmem:[%s9328_s10 + $0x6e8] sm:$0xff]  }
0x1c23   :  { %v9047_v37 = vpack.c.bf16 %v4478_v29, %v4462_v44  ;;  %v9049_v59 = vpack.c.bf16 %v4480_v26, %v4464_v19  ;;  %v7477_v20 = vld [vmem:[%s9328_s10 + $0x6a0] sm:$0xff]   ;;  %v7480_v57 = vld [vmem:[%s9328_s10 + $0x628] sm:$0xff]   ;;  %v7482_v27 = vld [vmem:[%s9328_s10 + $0x670] sm:$0xff]  }
0x1c24   :  { %v9051_v60 = vpack.c.bf16 %v4479_v50, %v4463_v48  ;;  %v9053_v0 = vpack.c.bf16 %v4481_v55, %v4465_v49  ;;  %6948 = vmatpush3.bf16.msra.mxu1 %v7448_v41  ;;  %6970 = vmatpush3.bf16.msra.mxu0 %v7449_v42  ;;  %v7481_v23 = vld [vmem:[%s9328_s10 + $0x6a8] sm:$0xff]   ;;  %v7483_v53 = vld [vmem:[%s9328_s10 + $0x6f0] sm:$0xff]   ;;  %v7486_v34 = vld [vmem:[%s9328_s10 + $0x678] sm:$0xff]  }
0x1c25   :  { %6949 = vmatprep.subr.bf16.mxu1 %v7450_v24  ;;  %6971 = vmatprep.subr.bf16.mxu0 %v7451_v47  ;;  %v7484_v58 = vld [vmem:[%s9328_s10 + $0x630] sm:$0xff]   ;;  %v7487_v36 = vld [vmem:[%s9328_s10 + $0x6f8] sm:$0xff]   ;;  %v7490_v62 = vld [vmem:[%s9328_s10 + $0x740] sm:$0xff]  }
0x1c26   :  { %v7485_v28 = vld [vmem:[%s9328_s10 + $0x6b0] sm:$0xff]   ;;  %v7488_v35 = vld [vmem:[%s9328_s10 + $0x638] sm:$0xff]   ;;  %v7491_v40 = vld [vmem:[%s9328_s10 + $0x7c0] sm:$0xff]  }
0x1c27   :  { %v7489_v39 = vld [vmem:[%s9328_s10 + $0x6b8] sm:$0xff]   ;;  %v7492_v41 = vld [vmem:[%s9328_s10 + $0x700] sm:$0xff]   ;;  %v7494_v44 = vld [vmem:[%s9328_s10 + $0x748] sm:$0xff]  }
0x1c28   :  { %6950 = vmatpush3.bf16.msra.mxu1 %v7452_v4  ;;  %6972 = vmatpush3.bf16.msra.mxu0 %v7453_v2  ;;  %v7493_v42 = vld [vmem:[%s9328_s10 + $0x780] sm:$0xff]   ;;  %v7495_v19 = vld [vmem:[%s9328_s10 + $0x7c8] sm:$0xff]   ;;  %v7500_v24 = vld [vmem:[%s9328_s10 + $0x710] sm:$0xff]  }
0x1c29   :  { %6951 = vmatprep.subr.bf16.mxu1 %v7454_v3  ;;  %6973 = vmatprep.subr.bf16.mxu0 %v7455_v54  ;;  %v7496_v29 = vld [vmem:[%s9328_s10 + $0x708] sm:$0xff]   ;;  %v7501_v47 = vld [vmem:[%s9328_s10 + $0x790] sm:$0xff]   ;;  %v7502_v48 = vld [vmem:[%s9328_s10 + $0x758] sm:$0xff]  }
0x1c2a   :  { %v7497_v26 = vld [vmem:[%s9328_s10 + $0x788] sm:$0xff]   ;;  %v7503_v49 = vld [vmem:[%s9328_s10 + $0x7d8] sm:$0xff]   ;;  %v7508_v4 = vld [vmem:[%s9328_s10 + $0x720] sm:$0xff]  }
0x1c2b   :  { %v7504_v50 = vld [vmem:[%s9328_s10 + $0x718] sm:$0xff]   ;;  %v7509_v2 = vld [vmem:[%s9328_s10 + $0x7a0] sm:$0xff]   ;;  %v7510_v3 = vld [vmem:[%s9328_s10 + $0x768] sm:$0xff]  }
0x1c2c   :  { %6952 = vmatpush3.bf16.msra.mxu1 %v7456_v15  ;;  %6974 = vmatpush3.bf16.msra.mxu0 %v7457_v61  ;;  %v7505_v55 = vld [vmem:[%s9328_s10 + $0x798] sm:$0xff]   ;;  %v7511_v54 = vld [vmem:[%s9328_s10 + $0x7e8] sm:$0xff]  }
0x1c2d   :  { %6981 = vmatprep.subr.bf16.mxu1 %v7458_v9  ;;  %7003 = vmatprep.subr.bf16.mxu0 %v7459_v52  ;;  %v7512_v15 = vld [vmem:[%s9328_s10 + $0x728] sm:$0xff]   ;;  %v7514_v9 = vld [vmem:[%s9328_s10 + $0x770] sm:$0xff]  }
0x1c2e   :  { %v7513_v61 = vld [vmem:[%s9328_s10 + $0x7a8] sm:$0xff]   ;;  %v7515_v52 = vld [vmem:[%s9328_s10 + $0x7f0] sm:$0xff]  }
0x1c2f   :  { %5642 = vmatmul.mubr.bf16.vlgmr.msra.gmra.mrb[104].mxu1 %v8979_v31  ;;  %5683 = vmatmul.mubr.bf16.vlgmr.msra.gmra.mrb[108].mxu0 %v8981_v32  ;;  %v7466_v31 = vld [vmem:[%s9328_s10 + $0x650] sm:$0xff]  }
0x1c30   :  { %6982 = vmatpush3.bf16.msra.mxu1 %v7460_v63  ;;  %5723 = vmatprep.mubr.bf16.mxu1 %v9019_v43  ;;  %v7467_v32 = vld [vmem:[%s9328_s10 + $0x6d0] sm:$0xff]   ;;  %v7470_v43 = vld [vmem:[%s9328_s10 + $0x658] sm:$0xff]  }
0x1c31   :  { %7004 = vmatpush3.bf16.msra.mxu0 %v7461_v25  ;;  %5764 = vmatprep.mubr.bf16.mxu0 %v9021_v16  ;;  %v7471_v16 = vld [vmem:[%s9328_s10 + $0x6d8] sm:$0xff]   ;;  %v7516_v63 = vld [vmem:[%s9328_s10 + $0x730] sm:$0xff]  }
0x1c32   :  { %6983 = vmatprep.subr.bf16.mxu1 %v7462_v30  ;;  %7005 = vmatprep.subr.bf16.mxu0 %v7463_v5  ;;  %v7517_v25 = vld [vmem:[%s9328_s10 + $0x7b0] sm:$0xff]   ;;  %v7518_v30 = vld [vmem:[%s9328_s10 + $0x778] sm:$0xff]  }
0x1c33   :  { %v7519_v5 = vld [vmem:[%s9328_s10 + $0x7f8] sm:$0xff]  }
0x1c34   :  { %6984 = vmatpush3.bf16.msra.mxu1 %v7464_v6  ;;  %v7520_v6 = vld [vmem:[%s9328_s10 + $0x738] sm:$0xff]  }
0x1c35   :  { %7006 = vmatpush3.bf16.msra.mxu0 %v7465_v8  ;;  %6985 = vmatprep.subr.bf16.mxu1 %v7466_v31  ;;  %v7521_v8 = vld [vmem:[%s9328_s10 + $0x7b8] sm:$0xff]  }
0x1c36   :  { %7007 = vmatprep.subr.bf16.mxu0 %v7467_v32 }
0x1c38   :  { %6986 = vmatpush3.bf16.msra.mxu1 %v7468_v7  ;;  %v9281_v7 = vld [vmem:[%s9329_s11 + $0x8] sm:$0x3f] }
0x1c39   :  { %7008 = vmatpush3.bf16.msra.mxu0 %v7469_v10  ;;  %6987 = vmatprep.subr.bf16.mxu1 %v7470_v43  ;;  %v4758_v10 = vrot.slane %v9281_v7, %v8159_v46 }
0x1c3a   :  { %7009 = vmatprep.subr.bf16.mxu0 %v7471_v16 }
0x1c3c   :  { %6988 = vmatpush3.bf16.msra.mxu1 %v7472_v18 }
0x1c3d   :  { %7010 = vmatpush3.bf16.msra.mxu0 %v7473_v13  ;;  %6989 = vmatprep.subr.bf16.mxu1 %v7474_v12 }
0x1c3e   :  { %7011 = vmatprep.subr.bf16.mxu0 %v7475_v17 }
0x1c40   :  { %6990 = vmatpush3.bf16.msra.mxu1 %v7476_v14 }
0x1c41   :  { %7012 = vmatpush3.bf16.msra.mxu0 %v7477_v20  ;;  %6991 = vmatprep.subr.bf16.mxu1 %v7478_v21 }
0x1c42   :  { %7013 = vmatprep.subr.bf16.mxu0 %v7479_v22 }
0x1c44   :  { %6992 = vmatpush3.bf16.msra.mxu1 %v7480_v57 }
0x1c45   :  { %7014 = vmatpush3.bf16.msra.mxu0 %v7481_v23  ;;  %6993 = vmatprep.subr.bf16.mxu1 %v7482_v27 }
0x1c46   :  { %7015 = vmatprep.subr.bf16.mxu0 %v7483_v53 }
0x1c48   :  { %6994 = vmatpush3.bf16.msra.mxu1 %v7484_v58 }
0x1c49   :  { %7016 = vmatpush3.bf16.msra.mxu0 %v7485_v28  ;;  %6995 = vmatprep.subr.bf16.mxu1 %v7486_v34 }
0x1c4a   :  { %7017 = vmatprep.subr.bf16.mxu0 %v7487_v36 }
0x1c4c   :  { %6996 = vmatpush3.bf16.msra.mxu1 %v7488_v35 }
0x1c4d   :  { %7018 = vmatpush3.bf16.msra.mxu0 %v7489_v39  ;;  %7025 = vmatprep.subr.bf16.mxu1 %v7490_v62 }
0x1c4e   :  { %7047 = vmatprep.subr.bf16.mxu0 %v7491_v40 }
0x1c4f   :  { %5724 = vmatmul.mubr.bf16.vlgmr.msra.gmra.mrb[108].mxu1 %v9015_v11  ;;  %v7498_v11 = vld [vmem:[%s9328_s10 + $0x750] sm:$0xff]  }
0x1c50   :  { %5765 = vmatmul.mubr.bf16.vlgmr.msra.gmra.mrb[112].mxu0 %v9017_v56  ;;  %7026 = vmatpush3.bf16.msra.mxu1 %v7492_v41  ;;  %v7499_v56 = vld [vmem:[%s9328_s10 + $0x7d0] sm:$0xff]  }
0x1c51   :  { %5805 = vmatprep.mubr.bf16.mxu1 %v9051_v60  ;;  %7048 = vmatpush3.bf16.msra.mxu0 %v7493_v42  ;;  %v7506_v60 = vld [vmem:[%s9328_s10 + $0x760] sm:$0xff]  }
0x1c52   :  { %5846 = vmatprep.mubr.bf16.mxu0 %v9053_v0  ;;  %7027 = vmatprep.subr.bf16.mxu1 %v7494_v44  ;;  %v7507_v0 = vld [vmem:[%s9328_s10 + $0x7e0] sm:$0xff]  }
0x1c53   :  { %7049 = vmatprep.subr.bf16.mxu0 %v7495_v19 }
0x1c54   :  { %7028 = vmatpush3.bf16.msra.mxu1 %v7496_v29 }
0x1c55   :  { %7050 = vmatpush3.bf16.msra.mxu0 %v7497_v26  ;;  %7029 = vmatprep.subr.bf16.mxu1 %v7498_v11 }
0x1c56   :  { %7051 = vmatprep.subr.bf16.mxu0 %v7499_v56 }
0x1c58   :  { %7030 = vmatpush3.bf16.msra.mxu1 %v7500_v24 }
0x1c59   :  { %7052 = vmatpush3.bf16.msra.mxu0 %v7501_v47  ;;  %7031 = vmatprep.subr.bf16.mxu1 %v7502_v48 }
0x1c5a   :  { %7053 = vmatprep.subr.bf16.mxu0 %v7503_v49 }
0x1c5c   :  { %7032 = vmatpush3.bf16.msra.mxu1 %v7504_v50 }
0x1c5d   :  { %7054 = vmatpush3.bf16.msra.mxu0 %v7505_v55  ;;  %7033 = vmatprep.subr.bf16.mxu1 %v7506_v60 }
0x1c5e   :  { %7055 = vmatprep.subr.bf16.mxu0 %v7507_v0 }
0x1c60   :  { %7034 = vmatpush3.bf16.msra.mxu1 %v7508_v4 }
0x1c61   :  { %7056 = vmatpush3.bf16.msra.mxu0 %v7509_v2  ;;  %7035 = vmatprep.subr.bf16.mxu1 %v7510_v3 }
0x1c62   :  { %7057 = vmatprep.subr.bf16.mxu0 %v7511_v54 }
0x1c64   :  { %7036 = vmatpush3.bf16.msra.mxu1 %v7512_v15 }
0x1c65   :  { %7058 = vmatpush3.bf16.msra.mxu0 %v7513_v61  ;;  %7037 = vmatprep.subr.bf16.mxu1 %v7514_v9 }
0x1c66   :  { %7059 = vmatprep.subr.bf16.mxu0 %v7515_v52 }
0x1c68   :  { %7038 = vmatpush3.bf16.msra.mxu1 %v7516_v63 }
0x1c69   :  { %7060 = vmatpush3.bf16.msra.mxu0 %v7517_v25  ;;  %7039 = vmatprep.subr.bf16.mxu1 %v7518_v30 }
0x1c6a   :  { %7061 = vmatprep.subr.bf16.mxu0 %v7519_v5 }
0x1c6c   :  { %7040 = vmatpush3.bf16.msra.mxu1 %v7520_v6 }
0x1c6d   :  { %7062 = vmatpush3.bf16.msra.mxu0 %v7521_v8  ;;  %7238 = vmatprep.subr.bf16.mxu1 %v7632_v1 }
0x1c6f   :  { %5806 = vmatmul.mubr.bf16.vlgmr.msra.gmra.mrb[112].mxu1 %v9047_v37 }
0x1c70   :  { %5847 = vmatmul.mubr.bf16.vlgmr.msra.gmra.mrb[116].mxu0 %v9049_v59  ;;  %7242 = vmatprep.mubr.msk.bf16.mxu1 %vm7633_vm1, %v7632_v1 }
0x1ce2   :  { %v6909_v31 = vpop.f32.mrb[100].mxu1  ;;  %v6931_v32 = vpop.f32.mrb[104].mxu0 }
0x1ce3   :  { %v6910_v43 = vpop.f32.mrb[101].mxu1  ;;  %v6932_v16 = vpop.f32.mrb[105].mxu0 }
0x1ce4   :  { %v6911_v18 = vadd.f32 %v6910_v43, %v6909_v31  ;;  %v6933_v13 = vadd.f32 %v6932_v16, %v6931_v32  ;;  %v6912_v37 = vpop.f32.mrb[102].mxu1  ;;  %v6934_v12 = vpop.f32.mrb[106].mxu0 }
0x1ce5   :  { %v6913_v59 = vpop.f32.mrb[103].mxu1  ;;  %v6935_v17 = vpop.f32.mrb[107].mxu0 }
0x1ce6   :  { %v5562_v14 = vadd.f32 %v6911_v18, %v4758_v10  ;;  %v6914_v20 = vadd.f32 %v6913_v59, %v6912_v37  ;;  %v6936_v21 = vadd.f32 %v6935_v17, %v6934_v12 }
0x1ce8   :  { %v5603_v22 = vadd.f32 %v6933_v13, %v5562_v14  ;;  %v5565_v57 = vadd.f32 %v6914_v20, %v4758_v10 }
0x1cea   :  { %v5606_v23 = vadd.f32 %v6936_v21, %v5565_v57 }
0x1d02   :  { %v6953_v27 = vpop.f32.mrb[104].mxu1  ;;  %v6975_v53 = vpop.f32.mrb[108].mxu0 }
0x1d03   :  { %v6954_v58 = vpop.f32.mrb[105].mxu1  ;;  %v6976_v28 = vpop.f32.mrb[109].mxu0 }
0x1d04   :  { %v6955_v34 = vadd.f32 %v6954_v58, %v6953_v27  ;;  %v6977_v46 = vadd.f32 %v6976_v28, %v6975_v53  ;;  %v6956_v36 = vpop.f32.mrb[106].mxu1  ;;  %v6978_v35 = vpop.f32.mrb[110].mxu0  ;;  %v7523_v28 = vld [vmem:[%s9330_s12 + $0x8] sm:$0xff]  }
0x1d05   :  { %v6957_v39 = vpop.f32.mrb[107].mxu1  ;;  %v6979_v62 = vpop.f32.mrb[111].mxu0 }
0x1d06   :  { %v5644_v40 = vadd.f32 %v6955_v34, %v5603_v22  ;;  %v6958_v41 = vadd.f32 %v6957_v39, %v6956_v36  ;;  %v6980_v42 = vadd.f32 %v6979_v62, %v6978_v35 }
0x1d08   :  { %v5685_v44 = vadd.f32 %v6977_v46, %v5644_v40  ;;  %v5647_v19 = vadd.f32 %v6958_v41, %v5606_v23  ;;  %v5886_v40 = vrot.slane %v9281_v7, %v8166_v51  ;;  %v6657_v51 = vld [vmem:[%s9331_s13] ss:$0 sm:$0xff] }
0x1d0a   :  { %v5688_v29 = vadd.f32 %v6980_v42, %v5647_v19 }
0x1d22   :  { %v6997_v26 = vpop.f32.mrb[108].mxu1 }
0x1d23   :  { %v7019_v11 = vpop.f32.mrb[112].mxu0  ;;  %v6998_v56 = vpop.f32.mrb[109].mxu1 }
0x1d24   :  { %v6999_v24 = vadd.f32 %v6998_v56, %v6997_v26  ;;  %v7020_v47 = vpop.f32.mrb[113].mxu0  ;;  %v7000_v48 = vpop.f32.mrb[110].mxu1 }
0x1d25   :  { %v7021_v49 = vadd.f32 %v7020_v47, %v7019_v11  ;;  %v7022_v50 = vpop.f32.mrb[114].mxu0  ;;  %v7001_v55 = vpop.f32.mrb[111].mxu1 }
0x1d26   :  { %v5726_v60 = vadd.f32 %v6999_v24, %v5685_v44  ;;  %v7002_v0 = vadd.f32 %v7001_v55, %v7000_v48  ;;  %v7023_v4 = vpop.f32.mrb[115].mxu0  ;;  %v5892_v44 = vrot.slane %v9281_v7, %v8172_v33 }
0x1d27   :  { %v7024_v2 = vadd.f32 %v7023_v4, %v7022_v50 }
0x1d28   :  { %v5767_v3 = vadd.f32 %v7021_v49, %v5726_v60  ;;  %v5729_v54 = vadd.f32 %v7002_v0, %v5688_v29 }
0x1d2a   :  { %v5770_v15 = vadd.f32 %v7024_v2, %v5729_v54 }
0x1d42   :  { %v7041_v61 = vpop.f32.mrb[112].mxu1 }
0x1d43   :  { %v7063_v9 = vpop.f32.mrb[116].mxu0  ;;  %v7042_v52 = vpop.f32.mrb[113].mxu1 }
0x1d44   :  { %v7043_v63 = vadd.f32 %v7042_v52, %v7041_v61  ;;  %v7064_v25 = vpop.f32.mrb[117].mxu0  ;;  %v7044_v30 = vpop.f32.mrb[114].mxu1 }
0x1d45   :  { %v7065_v5 = vadd.f32 %v7064_v25, %v7063_v9  ;;  %v7066_v6 = vpop.f32.mrb[118].mxu0  ;;  %v7045_v8 = vpop.f32.mrb[115].mxu1 }
0x1d46   :  { %v5808_v31 = vadd.f32 %v7043_v63, %v5767_v3  ;;  %v7046_v32 = vadd.f32 %v7045_v8, %v7044_v30  ;;  %v7067_v10 = vpop.f32.mrb[119].mxu0 }
0x1d47   :  { %v7068_v43 = vadd.f32 %v7067_v10, %v7066_v6 }
0x1d48   :  { %v5849_v16 = vadd.f32 %v7065_v5, %v5808_v31  ;;  %v5811_v18 = vadd.f32 %v7046_v32, %v5770_v15 }
0x1d4a   :  { %v5852_v13 = vadd.f32 %v7068_v43, %v5811_v18  ;;  %v5855_v37 = vadd.f32 %v5849_v16, %v8751_v38 }
0x1d4c   :  { %v5857_v12 = vsel %vm147_vm2, %v5855_v37, 0.0  ;;  %v5856_v59 = vadd.f32 %v5852_v13, %v8753_v45  ;;  %v7522_v45 = vld [vmem:[%s9330_s12] sm:$0xff]  }
0x1d4d   :  { %5858 = vadd.xlane.f32.xlu1 %v5857_v12  ;;  %7239 = vmatpush3.bf16.msra.mxu1 %v7522_v45 }
0x1d4e   :  { %v5860_v17 = vsel %vm147_vm2, %v5856_v59, 0.0  ;;  %7240 = vmatprep.subr.bf16.mxu1 %v7632_v1 }
0x1d4f   :  { %5861 = vadd.xlane.f32.xlu0 %v5860_v17 }
0x1d51   :  { %7241 = vmatpush3.bf16.msra.mxu1 %v7523_v28 }
0x1dda   :  { %v5859_v14 = vpop.xlane.xlu1 %5858 }
0x1ddb   :  { %v5863_v20 = vmul.f32 0.03125, %v5859_v14 }
0x1ddc   :  { %v5862_v21 = vpop.xlane.xlu0 %5861 }
0x1ddd   :  { %v5865_v22 = vsub.f32 %v5855_v37, %v5863_v20  ;;  %v5864_v57 = vmul.f32 0.03125, %v5862_v21 }
0x1ddf   :  { %v5866_v23 = vsub.f32 %v5856_v59, %v5864_v57  ;;  %v5867_v27 = vmul.f32 %v5865_v22, %v5865_v22 }
0x1de1   :  { %v5869_v53 = vsel %vm147_vm2, %v5867_v27, 0.0  ;;  %v5868_v58 = vmul.f32 %v5866_v23, %v5866_v23 }
0x1de2   :  { %5870 = vadd.xlane.f32.xlu0 %v5869_v53 }
0x1de3   :  { %v5872_v38 = vsel %vm147_vm2, %v5868_v58, 0.0 }
0x1de6   :  { %5873 = vadd.xlane.f32.xlu0 %v5872_v38 }
0x1e6f   :  { %v5871_v34 = vpop.xlane.xlu0 %5870 }
0x1e70   :  { %v5875_v46 = vmul.f32 0.03125, %v5871_v34 }
0x1e72   :  { %v5877_v36 = vadd.f32 1e-05, %v5875_v46 }
0x1e73   :  { %v5874_v35 = vpop.xlane.xlu0 %5873 }
0x1e74   :  { %7600 = vrsqrt.f32 %v5877_v36  ;;  %v5876_v39 = vmul.f32 0.03125, %v5874_v35 }
0x1e76   :  { %v5878_v62 = vadd.f32 1e-05, %v5876_v39 }
0x1e78   :  { %7602 = vrsqrt.f32 %v5878_v62 }
0x1e7e   :  { %v7601_v41 = vpop.eup %7600 }
0x1e7f   :  { %v5881_v42 = vmul.f32 %v7601_v41, %v5865_v22 }
0x1e81   :  { %v5887_v19 = vmul.f32 %v5886_v40, %v5881_v42 }
0x1e82   :  { %v7603_v29 = vpop.eup %7602 }
0x1e83   :  { %v5882_v1 = vmul.f32 %v7603_v29, %v5866_v23  ;;  %v5893_v26 = vadd.f32 %v5892_v44, %v5887_v19 }
0x1e85   :  { %v5888_v11 = vmul.f32 %v5886_v40, %v5882_v1  ;;  %v5896_v47 = vrot.slane %v5893_v26, 7 }
0x1e87   :  { %v5894_v56 = vadd.f32 %v5892_v44, %v5888_v11 }
0x1e89   :  { %v5899_v24 = vrot.slane %v5894_v56, 6 }
0x1e8b   :  { %v5902_v48 = vsel %vm5901_vm5, %v5896_v47, %v5899_v24 }
0x1e8c   :  { %v5903_v49 = vpack.c.bf16 %v5902_v48, %v5902_v48 }
0x1e8e   :  { %7243 = vmatmul.mubr.msk.bf16.vlgmr.msra.gmra.mrb[116].mxu1 %vm147_vm2, %v5903_v49 }
0x1f61   :  { %v5964_v33 = vpop.f32.mrb[116].mxu1 }
0x1f62   :  { %v5965_v7 = vadd.f32 %v6657_v51, %v5964_v33  ;;  %v7244_v50 = vpop.f32.mrb[117].mxu1 }
0x1f63   :  { %v5967_v55 = vpop.f32.mrb[118].mxu1 }
0x1f64   :  { %v7245_v60 = vpop.f32.mrb[119].mxu1  ;;  %5971 = vst.msk [vmem:[#allocation2] sm:$0x3] %vm5970_vm6, %v5965_v7 }
0x1f65   :  { %7619 = shalt.err (!%p7616_p4)
}
0x1f66   :  { %s7620_s13 = scalar_lea.hbm %s9332_s14, 32 }
0x1f67   :  { %p7621_p5 = scmp.ne.s32.totalorder %s9332_s14, %s7620_s13  ;;  %p7624_p6 = scmp.lt.u32.totalorder %s7620_s13, %s9332_s14 }
0x1f69   :  { %p7626_p7 = pnand %p7624_p6, %p7621_p5 }
0x1f6b   :  { %7629 = shalt.err (!%p7626_p7)
}
0x1f6c   :  { %5981 = dma.vmem_to_hbm [thread:$0]  %s5979_s23, 32, %s9332_s14, [#allocation3]  }
0x1f6d   :  { %7630 = dma.done.wait [#allocation3], 32  }
0x1f6e   :  { %7631 = vsyncadd [#allocation3], 4294967264 }
0x1f6f   :  { %5985 = vsyncpa [#allocation3], 1 }

</bundles_post_ra>
